<compile_context>
chip_gen: v6e
topology: v6e:2x2x1
jax: 0.10.0
libtpu: 0.0.40
codegen_flags: <defaults>
</compile_context>

<pallas_src>
import jax
import jax.numpy as jnp
from jax import lax
from jax.experimental import pallas as pl
from jax.experimental.pallas import tpu as pltpu


def _silu(v):
    # SiLU with the reciprocal pushed onto the EUP slot (free vs. a VALU divide).
    return v * pl.reciprocal(1.0 + jnp.exp(-v), approx=True)


def c3_kernel(x_ref,                      # (nb, H*W, c1)            bf16
              w12_ref, b12_ref,           # cv1|cv2 fused 1x1        (c1, 2c_) bf16 / (1, 2c_) f32
              wb1_ref, bb1_ref,           # Bottleneck.cv1 1x1, zero-extended to K=2c_
              wb2_ref, bb2_ref,           # Bottleneck.cv2 3x3, (9, c_, c_) bf16
              w3ab_ref, w3a_ref, b3_ref,  # cv3 1x1, lane-padded to CP=128*k
              o_ref,                      # (rows, CP) bf16 — lane-dense, unmasked store
              pad_ref):                   # VMEM (nb, H+2, W+2, c_) bf16 — 3x3 halo
    nb, hw, c1 = x_ref.shape
    H = pad_ref.shape[1] - 2
    W = pad_ref.shape[2] - 2
    c_ = pad_ref.shape[3]
    rows = nb * hw
    f32 = jnp.float32
    bf16 = jnp.bfloat16

    x = x_ref[...].reshape(rows, c1)                       # bf16, batch folded into rows

    # ---- cv1 + cv2 as ONE matmul (N = 2*c_), bf16 operands, f32 accumulation ----
    y12 = _silu(jnp.dot(x, w12_ref[...], preferred_element_type=f32)
                + b12_ref[...]).astype(bf16)               # (rows, 2c_) = [y1 | y2]

    # ---- Bottleneck.cv1 (1x1): weight zero-extended to K=2c_, no lane-slice of y12 ----
    t = _silu(jnp.dot(y12, wb1_ref[...], preferred_element_type=f32)
              + bb1_ref[...]).astype(bf16)                 # (rows, c_)

    # ---- Bottleneck.cv2 (3x3, pad=1, stride=1): bf16 halo + 9 accumulating dots ----
    t4 = t.reshape(nb, H, W, c_)
    zc = jnp.zeros((nb, H, 1, c_), bf16)                   # left/right halo columns
    zr = jnp.zeros((nb, 1, W + 2, c_), bf16)               # top/bottom halo rows
    mid = jnp.concatenate([zc, t4, zc], axis=2)            # (nb, H, W+2, c_)
    pad_ref[...] = jnp.concatenate([zr, mid, zr], axis=1)  # ONE dense full-ref store

    acc = jnp.zeros((rows, c_), f32)
    for dy in range(3):
        for dx in range(3):
            tap = pad_ref[:, dy:dy + H, dx:dx + W, :].reshape(rows, c_)
            acc = acc + jnp.dot(tap, wb2_ref[dy * 3 + dx],
                                preferred_element_type=f32)
    yb = _silu(acc + bb2_ref[...]).astype(bf16)            # (rows, c_)

    # ---- cv3 on concat([y1 + yb, y2]):  y12 @ [w3a;w3b] + yb @ w3a  (shortcut folded) ----
    y3 = (jnp.dot(y12, w3ab_ref[...], preferred_element_type=f32)
          + jnp.dot(yb, w3a_ref[...], preferred_element_type=f32)
          + b3_ref[...])
    o_ref[...] = _silu(y3).astype(o_ref.dtype)             # dense, unmasked bf16 store


def c3_pallas(x_nhwc, p):
    N, H, W, c1 = x_nhwc.shape
    c_ = p["w1"].shape[1]
    c2 = p["w3a"].shape[1]
    CP = 128 * pl.cdiv(c2, 128)                            # lane-dense output channel pad

    # Whole images per grid step (~<=2048 matmul rows); force grid length >= 2
    # when N >= 2 so the "parallel" axis can span both v7x TensorCores.
    cap = max(1, 2048 // (H * W))
    if N >= 2:
        cap = min(cap, N // 2)
    nb = 1
    for d in range(1, N + 1):
        if N % d == 0 and d <= cap:
            nb = d
    rows = nb * H * W

    bf = jnp.bfloat16
    f32 = jnp.float32
    x_rows = x_nhwc.reshape(N, H * W, c1).astype(bf)                      # (N, H*W, c1)

    w12 = jnp.concatenate([p["w1"], p["w2"]], axis=1).astype(bf)          # (c1, 2c_)
    b12 = jnp.concatenate([p["b1"], p["b2"]], axis=1).astype(f32)         # (1, 2c_)
    wb1x = jnp.concatenate([p["wb1"], jnp.zeros_like(p["wb1"])],
                           axis=0).astype(bf)                             # (2c_, c_)
    wb2 = p["wb2"].reshape(9, c_, c_).astype(bf)                          # (ky*3+kx, ci, co)
    w3ab = jnp.pad(jnp.concatenate([p["w3a"], p["w3b"]], axis=0),
                   ((0, 0), (0, CP - c2))).astype(bf)                     # (2c_, CP)
    w3a = jnp.pad(p["w3a"], ((0, 0), (0, CP - c2))).astype(bf)            # (c_, CP)
    b3 = jnp.pad(p["b3"], ((0, 0), (0, CP - c2))).astype(f32)             # (1, CP)
    bb1, bb2 = p["bb1"].astype(f32), p["bb2"].astype(f32)

    def rep(a):  # whole-array block, replicated across the grid
        nd = a.ndim
        return pl.BlockSpec(a.shape, lambda n, nd=nd: (0,) * nd)

    grid_spec = pltpu.PrefetchScalarGridSpec(
        num_scalar_prefetch=0,
        grid=(N // nb,),
        in_specs=[
            pl.BlockSpec((nb, H * W, c1), lambda n: (n, 0, 0)),
            rep(w12), rep(b12), rep(wb1x), rep(bb1),
            rep(wb2), rep(bb2), rep(w3ab), rep(w3a), rep(b3),
        ],
        out_specs=pl.BlockSpec((rows, CP), lambda n: (n, 0)),
        scratch_shapes=[pltpu.VMEM((nb, H + 2, W + 2, c_), bf)],          # bf16 halo
    )
    out = pl.pallas_call(
        c3_kernel,
        out_shape=jax.ShapeDtypeStruct((N * H * W, CP), bf),
        grid_spec=grid_spec,
        compiler_params=pltpu.CompilerParams(
            dimension_semantics=("parallel",),       # batch blocks are independent
            vmem_limit_bytes=64 * 1024 * 1024),      # cap; usage here is tiny
    )(x_rows, w12, b12, wb1x, bb1, wb2, bb2, w3ab, w3a, b3)

    return out[:, :c2].reshape(N, H, W, c2)          # drop lane pad outside the kernel


# ----------------------------- pure-JAX reference -----------------------------
# Mirrors the kernel's numerics (bf16 matmul operands, f32 accumulation) but is
# structurally independent: lax.conv for the 3x3, einsum for 1x1, explicit
# channel concat for cv3, jax.nn.silu for the activation.
def c3_reference(x, p):
    bf = jnp.bfloat16
    f32 = jnp.float32

    def conv1x1(inp, w, b):
        y = jnp.einsum("nhwc,co->nhwo", inp.astype(bf), w.astype(bf),
                       preferred_element_type=f32)
        return jax.nn.silu(y + b.reshape(1, 1, 1, -1))

    y1 = conv1x1(x, p["w1"], p["b1"])
    y2 = conv1x1(x, p["w2"], p["b2"])
    t = conv1x1(y1, p["wb1"], p["bb1"])
    yb = lax.conv_general_dilated(
        t.astype(bf), p["wb2"].astype(bf), window_strides=(1, 1), padding="SAME",
        dimension_numbers=("NHWC", "HWIO", "NHWC"), preferred_element_type=f32)
    yb = jax.nn.silu(yb + p["bb2"].reshape(1, 1, 1, -1))
    m_out = y1 + yb
    cat = jnp.concatenate([m_out, y2], axis=-1)
    w3 = jnp.concatenate([p["w3a"], p["w3b"]], axis=0)
    y3 = jnp.einsum("nhwc,co->nhwo", cat.astype(bf), w3.astype(bf),
                    preferred_element_type=f32)
    return jax.nn.silu(y3 + p["b3"].reshape(1, 1, 1, -1))


# --------------------------------- main ---------------------------------------
if __name__ == "__main__":
    key = jax.random.PRNGKey(0)
    N, C1, C2, H, W = 2, 8, 8, 16, 16
    C_ = C2 // 2         # hidden channels of the CSP branch (= 4)
    EPS = 1e-5           # nn.BatchNorm2d default eps

    keys = iter(jax.random.split(key, 16))

    def conv_w(k, cin, cout, ksize=1):
        shape = (cin, cout) if ksize == 1 else (ksize, ksize, cin, cout)
        return jax.random.normal(k, shape, jnp.float32) * 0.2

    def bn_params(k, c):
        k1, k2, k3, k4 = jax.random.split(k, 4)
        gamma = 1.0 + 0.1 * jax.random.normal(k1, (c,), jnp.float32)
        beta = 0.1 * jax.random.normal(k2, (c,), jnp.float32)
        mean = 0.1 * jax.random.normal(k3, (c,), jnp.float32)
        var = jnp.abs(jax.random.normal(k4, (c,), jnp.float32)) + 0.5
        return gamma, beta, mean, var

    def fold(w, bn):
        gamma, beta, mean, var = bn
        scale = gamma / jnp.sqrt(var + EPS)          # per output channel
        return w * scale, (beta - mean * scale).reshape(1, -1)

    w1, b1 = fold(conv_w(next(keys), C1, C_), bn_params(next(keys), C_))
    w2, b2 = fold(conv_w(next(keys), C1, C_), bn_params(next(keys), C_))
    wb1, bb1 = fold(conv_w(next(keys), C_, C_), bn_params(next(keys), C_))
    wb2, bb2 = fold(conv_w(next(keys), C_, C_, 3), bn_params(next(keys), C_))
    w3, b3 = fold(conv_w(next(keys), 2 * C_, C2), bn_params(next(keys), C2))

    params = dict(w1=w1, b1=b1, w2=w2, b2=b2,
                  wb1=wb1, bb1=bb1, wb2=wb2, bb2=bb2,
                  w3a=w3[:C_], w3b=w3[C_:], b3=b3)

    x_nchw = jax.random.normal(next(keys), (N, C1, H, W), jnp.float32)
    x_nhwc = jnp.transpose(x_nchw, (0, 2, 3, 1))     # NCHW -> NHWC

    out = jax.block_until_ready(c3_pallas(x_nhwc, params))
    ref = jax.block_until_ready(c3_reference(x_nhwc, params))

    assert out.shape == (N, H, W, C2)
    # bf16 kernel output + bf16 matmul operands + approx EUP reciprocal vs. the
    # bf16-matmul / f32-intermediate reference: differences are at the bf16
    # rounding level (~0.4% rel) -> comfortably within 3e-2.
    outf = out.astype(jnp.float32)
    assert jnp.allclose(outf, ref, rtol=3e-2, atol=3e-2), (
        f"max abs err {jnp.max(jnp.abs(outf - ref))}")

    print("KERNEL_OK")
</pallas_src>

<mosaic_0001>
module attributes {stable_mosaic.version = 11 : i64} {
  func.func @c3_kernel(%arg0: i32, %arg1: memref<1x256x8xbf16, #tpu.memory_space<vmem>>, %arg2: memref<8x8xbf16, #tpu.memory_space<vmem>>, %arg3: memref<1x8xf32, #tpu.memory_space<vmem>>, %arg4: memref<8x4xbf16, #tpu.memory_space<vmem>>, %arg5: memref<1x4xf32, #tpu.memory_space<vmem>>, %arg6: memref<9x4x4xbf16, #tpu.memory_space<vmem>>, %arg7: memref<1x4xf32, #tpu.memory_space<vmem>>, %arg8: memref<8x128xbf16, #tpu.memory_space<vmem>>, %arg9: memref<4x128xbf16, #tpu.memory_space<vmem>>, %arg10: memref<1x128xf32, #tpu.memory_space<vmem>>, %arg11: memref<256x128xbf16, #tpu.memory_space<vmem>>, %arg12: memref<1x18x18x4xbf16, #tpu.memory_space<vmem>>) attributes {dimension_semantics = [#tpu.dimension_semantics<parallel>], iteration_bounds = array<i64: 2>, scalar_prefetch = 0 : i64, scratch_operands = 1 : i64, tpu.core_type = #tpu.core_type<tc>, window_params = [{transform_indices = @transform_0, window_bounds = array<i64: 1, 256, 8>}, {pipeline_mode = #tpu.pipeline_mode<synchronous>, transform_indices = @transform_1, window_bounds = array<i64: 8, 8>}, {pipeline_mode = #tpu.pipeline_mode<synchronous>, transform_indices = @transform_2, window_bounds = array<i64: 1, 8>}, {pipeline_mode = #tpu.pipeline_mode<synchronous>, transform_indices = @transform_3, window_bounds = array<i64: 8, 4>}, {pipeline_mode = #tpu.pipeline_mode<synchronous>, transform_indices = @transform_4, window_bounds = array<i64: 1, 4>}, {pipeline_mode = #tpu.pipeline_mode<synchronous>, transform_indices = @transform_5, window_bounds = array<i64: 9, 4, 4>}, {pipeline_mode = #tpu.pipeline_mode<synchronous>, transform_indices = @transform_6, window_bounds = array<i64: 1, 4>}, {pipeline_mode = #tpu.pipeline_mode<synchronous>, transform_indices = @transform_7, window_bounds = array<i64: 8, 128>}, {pipeline_mode = #tpu.pipeline_mode<synchronous>, transform_indices = @transform_8, window_bounds = array<i64: 4, 128>}, {pipeline_mode = #tpu.pipeline_mode<synchronous>, transform_indices = @transform_9, window_bounds = array<i64: 1, 128>}, {transform_indices = @transform_10, window_bounds = array<i64: 256, 128>}]} {
    %c0 = arith.constant 0 : index
    %c0_0 = arith.constant 0 : index
    %c0_1 = arith.constant 0 : index
    %0 = vector.load %arg1[%c0, %c0_0, %c0_1] : memref<1x256x8xbf16, #tpu.memory_space<vmem>>, vector<1x256x8xbf16>
    %1 = vector.shape_cast %0 : vector<1x256x8xbf16> to vector<256x8xbf16>
    %c0_2 = arith.constant 0 : index
    %c0_3 = arith.constant 0 : index
    %2 = vector.load %arg2[%c0_2, %c0_3] : memref<8x8xbf16, #tpu.memory_space<vmem>>, vector<8x8xbf16>
    %cst = arith.constant dense<0.000000e+00> : vector<256x8xf32>
    %3 = tpu.matmul %1, %2, %cst {dimension_numbers = #tpu.dot_dimension_numbers<[1], [0], [0], [1], [0, 0, 1, 1], [], []>} : vector<256x8xbf16>, vector<8x8xbf16>, vector<256x8xf32> -> vector<256x8xf32>
    %c0_4 = arith.constant 0 : index
    %c0_5 = arith.constant 0 : index
    %4 = vector.load %arg3[%c0_4, %c0_5] : memref<1x8xf32, #tpu.memory_space<vmem>>, vector<1x8xf32>
    %5 = vector.broadcast %4 : vector<1x8xf32> to vector<256x8xf32>
    %6 = arith.addf %3, %5 : vector<256x8xf32>
    %cst_6 = arith.constant 0.000000e+00 : f32
    %7 = vector.broadcast %cst_6 : f32 to vector<256x8xf32>
    %8 = arith.subf %7, %6 : vector<256x8xf32>
    %9 = math.exp %8 : vector<256x8xf32>
    %cst_7 = arith.constant 1.000000e+00 : f32
    %10 = vector.broadcast %cst_7 : f32 to vector<256x8xf32>
    %11 = arith.addf %10, %9 : vector<256x8xf32>
    %12 = tpu.reciprocal %11 {approx = true} : vector<256x8xf32> -> vector<256x8xf32>
    %13 = arith.mulf %6, %12 : vector<256x8xf32>
    %14 = arith.truncf %13 : vector<256x8xf32> to vector<256x8xbf16>
    %c0_8 = arith.constant 0 : index
    %c0_9 = arith.constant 0 : index
    %15 = vector.load %arg4[%c0_8, %c0_9] : memref<8x4xbf16, #tpu.memory_space<vmem>>, vector<8x4xbf16>
    %cst_10 = arith.constant dense<0.000000e+00> : vector<256x4xf32>
    %16 = tpu.matmul %14, %15, %cst_10 {dimension_numbers = #tpu.dot_dimension_numbers<[1], [0], [0], [1], [0, 0, 1, 1], [], []>} : vector<256x8xbf16>, vector<8x4xbf16>, vector<256x4xf32> -> vector<256x4xf32>
    %c0_11 = arith.constant 0 : index
    %c0_12 = arith.constant 0 : index
    %17 = vector.load %arg5[%c0_11, %c0_12] : memref<1x4xf32, #tpu.memory_space<vmem>>, vector<1x4xf32>
    %18 = vector.broadcast %17 : vector<1x4xf32> to vector<256x4xf32>
    %19 = arith.addf %16, %18 : vector<256x4xf32>
    %cst_13 = arith.constant 0.000000e+00 : f32
    %20 = vector.broadcast %cst_13 : f32 to vector<256x4xf32>
    %21 = arith.subf %20, %19 : vector<256x4xf32>
    %22 = math.exp %21 : vector<256x4xf32>
    %cst_14 = arith.constant 1.000000e+00 : f32
    %23 = vector.broadcast %cst_14 : f32 to vector<256x4xf32>
    %24 = arith.addf %23, %22 : vector<256x4xf32>
    %25 = tpu.reciprocal %24 {approx = true} : vector<256x4xf32> -> vector<256x4xf32>
    %26 = arith.mulf %19, %25 : vector<256x4xf32>
    %27 = arith.truncf %26 : vector<256x4xf32> to vector<256x4xbf16>
    %28 = vector.shape_cast %27 : vector<256x4xbf16> to vector<1x16x16x4xbf16>
    %cst_15 = arith.constant 0.000000e+00 : bf16
    %29 = vector.broadcast %cst_15 : bf16 to vector<1x16x1x4xbf16>
    %cst_16 = arith.constant 0.000000e+00 : bf16
    %30 = vector.broadcast %cst_16 : bf16 to vector<1x1x18x4xbf16>
    %31 = tpu.concatenate %29, %28, %29 in 2 : vector<1x16x1x4xbf16>, vector<1x16x16x4xbf16>, vector<1x16x1x4xbf16> -> vector<1x16x18x4xbf16>
    %32 = tpu.concatenate %30, %31, %30 in 1 : vector<1x1x18x4xbf16>, vector<1x16x18x4xbf16>, vector<1x1x18x4xbf16> -> vector<1x18x18x4xbf16>
    %c0_17 = arith.constant 0 : index
    %c0_18 = arith.constant 0 : index
    %c0_19 = arith.constant 0 : index
    %c0_20 = arith.constant 0 : index
    %33 = vector.load %arg12[%c0_17, %c0_18, %c0_19, %c0_20] : memref<1x18x18x4xbf16, #tpu.memory_space<vmem>>, vector<1x18x18x4xbf16>
    tpu.vector_store %arg12[%c0_17, %c0_18, %c0_19, %c0_20], %32 {strides = array<i32>} : memref<1x18x18x4xbf16, #tpu.memory_space<vmem>>, vector<1x18x18x4xbf16>,
    %cst_21 = arith.constant 0.000000e+00 : f32
    %34 = vector.broadcast %cst_21 : f32 to vector<256x4xf32>
    %c0_22 = arith.constant 0 : index
    %c0_23 = arith.constant 0 : index
    %c0_24 = arith.constant 0 : index
    %c0_25 = arith.constant 0 : index
    %35 = vector.load %arg12[%c0_22, %c0_23, %c0_24, %c0_25] : memref<1x18x18x4xbf16, #tpu.memory_space<vmem>>, vector<1x16x16x4xbf16>
    %36 = vector.shape_cast %35 : vector<1x16x16x4xbf16> to vector<256x4xbf16>
    %c0_26 = arith.constant 0 : index
    %c0_27 = arith.constant 0 : index
    %c0_28 = arith.constant 0 : index
    %37 = vector.load %arg6[%c0_26, %c0_27, %c0_28] : memref<9x4x4xbf16, #tpu.memory_space<vmem>>, vector<1x4x4xbf16>
    %38 = vector.shape_cast %37 : vector<1x4x4xbf16> to vector<4x4xbf16>
    %cst_29 = arith.constant dense<0.000000e+00> : vector<256x4xf32>
    %39 = tpu.matmul %36, %38, %cst_29 {dimension_numbers = #tpu.dot_dimension_numbers<[1], [0], [0], [1], [0, 0, 1, 1], [], []>} : vector<256x4xbf16>, vector<4x4xbf16>, vector<256x4xf32> -> vector<256x4xf32>
    %40 = arith.addf %34, %39 : vector<256x4xf32>
    %c0_30 = arith.constant 0 : index
    %c0_31 = arith.constant 0 : index
    %c1 = arith.constant 1 : index
    %c0_32 = arith.constant 0 : index
    %41 = vector.load %arg12[%c0_30, %c0_31, %c1, %c0_32] : memref<1x18x18x4xbf16, #tpu.memory_space<vmem>>, vector<1x16x16x4xbf16>
    %42 = vector.shape_cast %41 : vector<1x16x16x4xbf16> to vector<256x4xbf16>
    %c1_33 = arith.constant 1 : index
    %c0_34 = arith.constant 0 : index
    %c0_35 = arith.constant 0 : index
    %43 = vector.load %arg6[%c1_33, %c0_34, %c0_35] : memref<9x4x4xbf16, #tpu.memory_space<vmem>>, vector<1x4x4xbf16>
    %44 = vector.shape_cast %43 : vector<1x4x4xbf16> to vector<4x4xbf16>
    %cst_36 = arith.constant dense<0.000000e+00> : vector<256x4xf32>
    %45 = tpu.matmul %42, %44, %cst_36 {dimension_numbers = #tpu.dot_dimension_numbers<[1], [0], [0], [1], [0, 0, 1, 1], [], []>} : vector<256x4xbf16>, vector<4x4xbf16>, vector<256x4xf32> -> vector<256x4xf32>
    %46 = arith.addf %40, %45 : vector<256x4xf32>
    %c0_37 = arith.constant 0 : index
    %c0_38 = arith.constant 0 : index
    %c2 = arith.constant 2 : index
    %c0_39 = arith.constant 0 : index
    %47 = vector.load %arg12[%c0_37, %c0_38, %c2, %c0_39] : memref<1x18x18x4xbf16, #tpu.memory_space<vmem>>, vector<1x16x16x4xbf16>
    %48 = vector.shape_cast %47 : vector<1x16x16x4xbf16> to vector<256x4xbf16>
    %c2_40 = arith.constant 2 : index
    %c0_41 = arith.constant 0 : index
    %c0_42 = arith.constant 0 : index
    %49 = vector.load %arg6[%c2_40, %c0_41, %c0_42] : memref<9x4x4xbf16, #tpu.memory_space<vmem>>, vector<1x4x4xbf16>
    %50 = vector.shape_cast %49 : vector<1x4x4xbf16> to vector<4x4xbf16>
    %cst_43 = arith.constant dense<0.000000e+00> : vector<256x4xf32>
    %51 = tpu.matmul %48, %50, %cst_43 {dimension_numbers = #tpu.dot_dimension_numbers<[1], [0], [0], [1], [0, 0, 1, 1], [], []>} : vector<256x4xbf16>, vector<4x4xbf16>, vector<256x4xf32> -> vector<256x4xf32>
    %52 = arith.addf %46, %51 : vector<256x4xf32>
    %c0_44 = arith.constant 0 : index
    %c1_45 = arith.constant 1 : index
    %c0_46 = arith.constant 0 : index
    %c0_47 = arith.constant 0 : index
    %53 = vector.load %arg12[%c0_44, %c1_45, %c0_46, %c0_47] : memref<1x18x18x4xbf16, #tpu.memory_space<vmem>>, vector<1x16x16x4xbf16>
    %54 = vector.shape_cast %53 : vector<1x16x16x4xbf16> to vector<256x4xbf16>
    %c3 = arith.constant 3 : index
    %c0_48 = arith.constant 0 : index
    %c0_49 = arith.constant 0 : index
    %55 = vector.load %arg6[%c3, %c0_48, %c0_49] : memref<9x4x4xbf16, #tpu.memory_space<vmem>>, vector<1x4x4xbf16>
    %56 = vector.shape_cast %55 : vector<1x4x4xbf16> to vector<4x4xbf16>
    %cst_50 = arith.constant dense<0.000000e+00> : vector<256x4xf32>
    %57 = tpu.matmul %54, %56, %cst_50 {dimension_numbers = #tpu.dot_dimension_numbers<[1], [0], [0], [1], [0, 0, 1, 1], [], []>} : vector<256x4xbf16>, vector<4x4xbf16>, vector<256x4xf32> -> vector<256x4xf32>
    %58 = arith.addf %52, %57 : vector<256x4xf32>
    %c0_51 = arith.constant 0 : index
    %c1_52 = arith.constant 1 : index
    %c1_53 = arith.constant 1 : index
    %c0_54 = arith.constant 0 : index
    %59 = vector.load %arg12[%c0_51, %c1_52, %c1_53, %c0_54] : memref<1x18x18x4xbf16, #tpu.memory_space<vmem>>, vector<1x16x16x4xbf16>
    %60 = vector.shape_cast %59 : vector<1x16x16x4xbf16> to vector<256x4xbf16>
    %c4 = arith.constant 4 : index
    %c0_55 = arith.constant 0 : index
    %c0_56 = arith.constant 0 : index
    %61 = vector.load %arg6[%c4, %c0_55, %c0_56] : memref<9x4x4xbf16, #tpu.memory_space<vmem>>, vector<1x4x4xbf16>
    %62 = vector.shape_cast %61 : vector<1x4x4xbf16> to vector<4x4xbf16>
    %cst_57 = arith.constant dense<0.000000e+00> : vector<256x4xf32>
    %63 = tpu.matmul %60, %62, %cst_57 {dimension_numbers = #tpu.dot_dimension_numbers<[1], [0], [0], [1], [0, 0, 1, 1], [], []>} : vector<256x4xbf16>, vector<4x4xbf16>, vector<256x4xf32> -> vector<256x4xf32>
    %64 = arith.addf %58, %63 : vector<256x4xf32>
    %c0_58 = arith.constant 0 : index
    %c1_59 = arith.constant 1 : index
    %c2_60 = arith.constant 2 : index
    %c0_61 = arith.constant 0 : index
    %65 = vector.load %arg12[%c0_58, %c1_59, %c2_60, %c0_61] : memref<1x18x18x4xbf16, #tpu.memory_space<vmem>>, vector<1x16x16x4xbf16>
    %66 = vector.shape_cast %65 : vector<1x16x16x4xbf16> to vector<256x4xbf16>
    %c5 = arith.constant 5 : index
    %c0_62 = arith.constant 0 : index
    %c0_63 = arith.constant 0 : index
    %67 = vector.load %arg6[%c5, %c0_62, %c0_63] : memref<9x4x4xbf16, #tpu.memory_space<vmem>>, vector<1x4x4xbf16>
    %68 = vector.shape_cast %67 : vector<1x4x4xbf16> to vector<4x4xbf16>
    %cst_64 = arith.constant dense<0.000000e+00> : vector<256x4xf32>
    %69 = tpu.matmul %66, %68, %cst_64 {dimension_numbers = #tpu.dot_dimension_numbers<[1], [0], [0], [1], [0, 0, 1, 1], [], []>} : vector<256x4xbf16>, vector<4x4xbf16>, vector<256x4xf32> -> vector<256x4xf32>
    %70 = arith.addf %64, %69 : vector<256x4xf32>
    %c0_65 = arith.constant 0 : index
    %c2_66 = arith.constant 2 : index
    %c0_67 = arith.constant 0 : index
    %c0_68 = arith.constant 0 : index
    %71 = vector.load %arg12[%c0_65, %c2_66, %c0_67, %c0_68] : memref<1x18x18x4xbf16, #tpu.memory_space<vmem>>, vector<1x16x16x4xbf16>
    %72 = vector.shape_cast %71 : vector<1x16x16x4xbf16> to vector<256x4xbf16>
    %c6 = arith.constant 6 : index
    %c0_69 = arith.constant 0 : index
    %c0_70 = arith.constant 0 : index
    %73 = vector.load %arg6[%c6, %c0_69, %c0_70] : memref<9x4x4xbf16, #tpu.memory_space<vmem>>, vector<1x4x4xbf16>
    %74 = vector.shape_cast %73 : vector<1x4x4xbf16> to vector<4x4xbf16>
    %cst_71 = arith.constant dense<0.000000e+00> : vector<256x4xf32>
    %75 = tpu.matmul %72, %74, %cst_71 {dimension_numbers = #tpu.dot_dimension_numbers<[1], [0], [0], [1], [0, 0, 1, 1], [], []>} : vector<256x4xbf16>, vector<4x4xbf16>, vector<256x4xf32> -> vector<256x4xf32>
    %76 = arith.addf %70, %75 : vector<256x4xf32>
    %c0_72 = arith.constant 0 : index
    %c2_73 = arith.constant 2 : index
    %c1_74 = arith.constant 1 : index
    %c0_75 = arith.constant 0 : index
    %77 = vector.load %arg12[%c0_72, %c2_73, %c1_74, %c0_75] : memref<1x18x18x4xbf16, #tpu.memory_space<vmem>>, vector<1x16x16x4xbf16>
    %78 = vector.shape_cast %77 : vector<1x16x16x4xbf16> to vector<256x4xbf16>
    %c7 = arith.constant 7 : index
    %c0_76 = arith.constant 0 : index
    %c0_77 = arith.constant 0 : index
    %79 = vector.load %arg6[%c7, %c0_76, %c0_77] : memref<9x4x4xbf16, #tpu.memory_space<vmem>>, vector<1x4x4xbf16>
    %80 = vector.shape_cast %79 : vector<1x4x4xbf16> to vector<4x4xbf16>
    %cst_78 = arith.constant dense<0.000000e+00> : vector<256x4xf32>
    %81 = tpu.matmul %78, %80, %cst_78 {dimension_numbers = #tpu.dot_dimension_numbers<[1], [0], [0], [1], [0, 0, 1, 1], [], []>} : vector<256x4xbf16>, vector<4x4xbf16>, vector<256x4xf32> -> vector<256x4xf32>
    %82 = arith.addf %76, %81 : vector<256x4xf32>
    %c0_79 = arith.constant 0 : index
    %c2_80 = arith.constant 2 : index
    %c2_81 = arith.constant 2 : index
    %c0_82 = arith.constant 0 : index
    %83 = vector.load %arg12[%c0_79, %c2_80, %c2_81, %c0_82] : memref<1x18x18x4xbf16, #tpu.memory_space<vmem>>, vector<1x16x16x4xbf16>
    %84 = vector.shape_cast %83 : vector<1x16x16x4xbf16> to vector<256x4xbf16>
    %c8 = arith.constant 8 : index
    %c0_83 = arith.constant 0 : index
    %c0_84 = arith.constant 0 : index
    %85 = vector.load %arg6[%c8, %c0_83, %c0_84] : memref<9x4x4xbf16, #tpu.memory_space<vmem>>, vector<1x4x4xbf16>
    %86 = vector.shape_cast %85 : vector<1x4x4xbf16> to vector<4x4xbf16>
    %cst_85 = arith.constant dense<0.000000e+00> : vector<256x4xf32>
    %87 = tpu.matmul %84, %86, %cst_85 {dimension_numbers = #tpu.dot_dimension_numbers<[1], [0], [0], [1], [0, 0, 1, 1], [], []>} : vector<256x4xbf16>, vector<4x4xbf16>, vector<256x4xf32> -> vector<256x4xf32>
    %88 = arith.addf %82, %87 : vector<256x4xf32>
    %c0_86 = arith.constant 0 : index
    %c0_87 = arith.constant 0 : index
    %89 = vector.load %arg7[%c0_86, %c0_87] : memref<1x4xf32, #tpu.memory_space<vmem>>, vector<1x4xf32>
    %90 = vector.broadcast %89 : vector<1x4xf32> to vector<256x4xf32>
    %91 = arith.addf %88, %90 : vector<256x4xf32>
    %cst_88 = arith.constant 0.000000e+00 : f32
    %92 = vector.broadcast %cst_88 : f32 to vector<256x4xf32>
    %93 = arith.subf %92, %91 : vector<256x4xf32>
    %94 = math.exp %93 : vector<256x4xf32>
    %cst_89 = arith.constant 1.000000e+00 : f32
    %95 = vector.broadcast %cst_89 : f32 to vector<256x4xf32>
    %96 = arith.addf %95, %94 : vector<256x4xf32>
    %97 = tpu.reciprocal %96 {approx = true} : vector<256x4xf32> -> vector<256x4xf32>
    %98 = arith.mulf %91, %97 : vector<256x4xf32>
    %99 = arith.truncf %98 : vector<256x4xf32> to vector<256x4xbf16>
    %c0_90 = arith.constant 0 : index
    %c0_91 = arith.constant 0 : index
    %100 = vector.load %arg8[%c0_90, %c0_91] : memref<8x128xbf16, #tpu.memory_space<vmem>>, vector<8x128xbf16>
    %cst_92 = arith.constant dense<0.000000e+00> : vector<256x128xf32>
    %101 = tpu.matmul %14, %100, %cst_92 {dimension_numbers = #tpu.dot_dimension_numbers<[1], [0], [0], [1], [0, 0, 1, 1], [], []>} : vector<256x8xbf16>, vector<8x128xbf16>, vector<256x128xf32> -> vector<256x128xf32>
    %c0_93 = arith.constant 0 : index
    %c0_94 = arith.constant 0 : index
    %102 = vector.load %arg9[%c0_93, %c0_94] : memref<4x128xbf16, #tpu.memory_space<vmem>>, vector<4x128xbf16>
    %cst_95 = arith.constant dense<0.000000e+00> : vector<256x128xf32>
    %103 = tpu.matmul %99, %102, %cst_95 {dimension_numbers = #tpu.dot_dimension_numbers<[1], [0], [0], [1], [0, 0, 1, 1], [], []>} : vector<256x4xbf16>, vector<4x128xbf16>, vector<256x128xf32> -> vector<256x128xf32>
    %104 = arith.addf %101, %103 : vector<256x128xf32>
    %c0_96 = arith.constant 0 : index
    %c0_97 = arith.constant 0 : index
    %105 = vector.load %arg10[%c0_96, %c0_97] : memref<1x128xf32, #tpu.memory_space<vmem>>, vector<1x128xf32>
    %106 = vector.broadcast %105 : vector<1x128xf32> to vector<256x128xf32>
    %107 = arith.addf %104, %106 : vector<256x128xf32>
    %cst_98 = arith.constant 0.000000e+00 : f32
    %108 = vector.broadcast %cst_98 : f32 to vector<256x128xf32>
    %109 = arith.subf %108, %107 : vector<256x128xf32>
    %110 = math.exp %109 : vector<256x128xf32>
    %cst_99 = arith.constant 1.000000e+00 : f32
    %111 = vector.broadcast %cst_99 : f32 to vector<256x128xf32>
    %112 = arith.addf %111, %110 : vector<256x128xf32>
    %113 = tpu.reciprocal %112 {approx = true} : vector<256x128xf32> -> vector<256x128xf32>
    %114 = arith.mulf %107, %113 : vector<256x128xf32>
    %115 = arith.truncf %114 : vector<256x128xf32> to vector<256x128xbf16>
    %c0_100 = arith.constant 0 : index
    %c0_101 = arith.constant 0 : index
    %116 = vector.load %arg11[%c0_100, %c0_101] : memref<256x128xbf16, #tpu.memory_space<vmem>>, vector<256x128xbf16>
    tpu.vector_store %arg11[%c0_100, %c0_101], %115 {strides = array<i32>} : memref<256x128xbf16, #tpu.memory_space<vmem>>, vector<256x128xbf16>,
    return
  }
  func.func @transform_0(%arg0: i32) -> (i32, i32, i32) {
    %c0_i32 = arith.constant 0 : i32
    %c0_i32_0 = arith.constant 0 : i32
    %c0_i32_1 = arith.constant 0 : i32
    return %arg0, %c0_i32, %c0_i32_0 : i32, i32, i32
  }
  func.func @transform_1(%arg0: i32) -> (i32, i32) {
    %c0_i32 = arith.constant 0 : i32
    %c0_i32_0 = arith.constant 0 : i32
    %c0_i32_1 = arith.constant 0 : i32
    return %c0_i32, %c0_i32_0 : i32, i32
  }
  func.func @transform_2(%arg0: i32) -> (i32, i32) {
    %c0_i32 = arith.constant 0 : i32
    %c0_i32_0 = arith.constant 0 : i32
    %c0_i32_1 = arith.constant 0 : i32
    return %c0_i32, %c0_i32_0 : i32, i32
  }
  func.func @transform_3(%arg0: i32) -> (i32, i32) {
    %c0_i32 = arith.constant 0 : i32
    %c0_i32_0 = arith.constant 0 : i32
    %c0_i32_1 = arith.constant 0 : i32
    return %c0_i32, %c0_i32_0 : i32, i32
  }
  func.func @transform_4(%arg0: i32) -> (i32, i32) {
    %c0_i32 = arith.constant 0 : i32
    %c0_i32_0 = arith.constant 0 : i32
    %c0_i32_1 = arith.constant 0 : i32
    return %c0_i32, %c0_i32_0 : i32, i32
  }
  func.func @transform_5(%arg0: i32) -> (i32, i32, i32) {
    %c0_i32 = arith.constant 0 : i32
    %c0_i32_0 = arith.constant 0 : i32
    %c0_i32_1 = arith.constant 0 : i32
    %c0_i32_2 = arith.constant 0 : i32
    return %c0_i32, %c0_i32_0, %c0_i32_1 : i32, i32, i32
  }
  func.func @transform_6(%arg0: i32) -> (i32, i32) {
    %c0_i32 = arith.constant 0 : i32
    %c0_i32_0 = arith.constant 0 : i32
    %c0_i32_1 = arith.constant 0 : i32
    return %c0_i32, %c0_i32_0 : i32, i32
  }
  func.func @transform_7(%arg0: i32) -> (i32, i32) {
    %c0_i32 = arith.constant 0 : i32
    %c0_i32_0 = arith.constant 0 : i32
    %c0_i32_1 = arith.constant 0 : i32
    return %c0_i32, %c0_i32_0 : i32, i32
  }
  func.func @transform_8(%arg0: i32) -> (i32, i32) {
    %c0_i32 = arith.constant 0 : i32
    %c0_i32_0 = arith.constant 0 : i32
    %c0_i32_1 = arith.constant 0 : i32
    return %c0_i32, %c0_i32_0 : i32, i32
  }
  func.func @transform_9(%arg0: i32) -> (i32, i32) {
    %c0_i32 = arith.constant 0 : i32
    %c0_i32_0 = arith.constant 0 : i32
    %c0_i32_1 = arith.constant 0 : i32
    return %c0_i32, %c0_i32_0 : i32, i32
  }
  func.func @transform_10(%arg0: i32) -> (i32, i32) {
    %c0_i32 = arith.constant 0 : i32
    %c0_i32_0 = arith.constant 0 : i32
    return %arg0, %c0_i32 : i32, i32
  }
}

</mosaic_0001>

<bundles_post_ra>
// kernel: tpu_custom_call.1
= control target key start
LH: loop header
LB: loop body
LE: loop exit
PB: predicated region body
PF: predicated region fallthrough
CT: control target
= control target key end

     0   :  { %15 = vsyncpa [#allocation4], 0  ;;  %s12833_s0 = inlined_call_operand.vmem [shape: bf16[2,256,8], index: 0, kind: input, shape index: {}]   ;;  %s12834_s1 = inlined_call_operand.vmem [shape: bf16[8,8], index: 1, kind: input, shape index: {}]   ;;  %s12835_s2 = inlined_call_operand.vmem [shape: f32[1,8], index: 2, kind: input, shape index: {}]   ;;  %s12836_s3 = inlined_call_operand.vmem [shape: bf16[8,4], index: 3, kind: input, shape index: {}]   ;;  %s12837_s4 = inlined_call_operand.vmem [shape: f32[1,4], index: 4, kind: input, shape index: {}]   ;;  %s12838_s5 = inlined_call_operand.vmem [shape: bf16[9,4,4], index: 5, kind: input, shape index: {}]   ;;  %s12839_s6 = inlined_call_operand.vmem [shape: f32[1,4], index: 6, kind: input, shape index: {}]   ;;  %s12840_s7 = inlined_call_operand.vmem [shape: bf16[8,128], index: 7, kind: input, shape index: {}]   ;;  %s12841_s8 = inlined_call_operand.vmem [shape: bf16[4,128], index: 8, kind: input, shape index: {}]   ;;  %s12842_s9 = inlined_call_operand.vmem [shape: f32[1,128], index: 9, kind: input, shape index: {}]   ;;  %s12843_s10 = inlined_call_operand.hbm [shape: bf16[512,128], index: 10, kind: output, shape index: {}]  }
   0x1   :  { %17 = vsyncpa [#allocation4 + $0x1], 0  ;;  %s9474_s13 = smov 0   ;;  %s9476_s14 = smov 0  }
   0x2   :  { %s9478_s15 = smov 0   ;;  %s9480_s16 = smov 0  }
   0x3 LB: > { %s9495_s17 = sadd.s32 4294967295, %s9413_s16   ;;  %s7399_s18 = sadd.s32 4294967294, %s9413_s16   ;;  %s9413_s16 = sphi %s9480_s16, %s13027_s16   ;;  %s9409_s15 = sphi %s9478_s15, %s13026_s15   ;;  %s9405_s14 = sphi %s9476_s14, %s13025_s14   ;;  %s9401_s13 = sphi %s9474_s13, %s13024_s13  }
   0x4   : > { %s9499_s19 = sadd.s32 1, %s9413_s16   ;;  %s245_s20 = sadd.s32 1, %s9409_s15 }
   0x5   : > { %s242_s21 = ssub.s32 %s9413_s16, %s9499_s19  ;;  %p255_p0 = scmp.ne.s32.totalorder %s9409_s15, %s9405_s14 }
   0x6   : > { %p243_p1 = scmp.eq.s32.totalorder %s242_s21, 0  ;;  %p256_p2 = scmp.eq.s32.totalorder %s9495_s17, 1 }
   0x7   : > { %p261_p3 = scmp.ne.s32.totalorder %s9405_s14, %s9401_s13  ;;  %p262_p4 = scmp.eq.s32.totalorder %s7399_s18, 1 }
   0x8   : > { %s9510_s22 = scalar_select %p243_p1, %s9409_s15, %s245_s20  }
   0x9   : > { %p9512_p5 = por %p256_p2, %p255_p0  ;;  %p9516_p6 = por %p262_p4, %p261_p3 }
   0xa   : > { %p7402_p7 = scmp.ge.s32.totalorder %s9413_s16, 1  ;;  %p315_p8 = scmp.lt.s32.totalorder %s9413_s16, 3 }
   0xc   : > { %p316_p9 = pnand %p7402_p7, %p315_p8 }
   0xe   : > { %319 = sbr.rel (%p316_p9) target bundleno = 1421 (0x58d), region = 60 }
  0x13   : > { %v392_v0 = vld [vmem:[%s12834_s1] sm:$0xf]  ;;  %vm529_vm0 = vcmask 1043456   ;;  %p353_p10 = scmp.lt.s32.totalorder %s9495_s17, 1  ;;  %vm480_vm1 = vcmask 64512   ;;  %vm1692_vm2 = vcmask 27648  }
  0x14   : > { %8715 = vmatprep.subr.msk.bf16.mxu0 %vm529_vm0, %v392_v0  ;;  %8716 = vmatprep.subr.msk.bf16.mxu1 %vm529_vm0, %v392_v0  ;;  %v531_v1 = vsel %vm529_vm0, %v392_v0, 0  ;;  %v902_v18 = vld [vmem:[%s12836_s3] sm:$0xf]  ;;  %vm1695_vm3 = vcmask 24576   ;;  %vm2283_vm4 = vcmask 1041408   ;;  %vm2234_vm5 = vcmask 31744  }
  0x15   : > { %8272 = vmatpush3.bf16.msra.mxu0 %v531_v1  ;;  %8714 = vmatpush3.bf16.msra.mxu1 %v531_v1  ;;  %s354_s27 = scalar_select %p353_p10, %s9495_s17, 1  ;;  %v959_v19 = vsel %vm529_vm0, %v902_v18, 0  ;;  %v9575_v20 = vld [vmem:[%s12835_s2] ss:$0 sm:$0xff]  ;;  %vm1797_vm6 = vsmask.f32 3328 }
  0x16   : > { %8717 = vmatprep.subr.msk.bf16.mxu1 %vm529_vm0, %v902_v18  ;;  %vm1798_vm7 = vsmask.f32 7440  ;;  %vm1474_vm9 = vcmask 1040384   ;;  %vm1475_vm10 = vsmask.f32 256  ;;  %vm2788_vm12 = vcmask 1042432  }
  0x17   : > { %s7921_s28 = sshll.u32 %s354_s27, 7  ;;  %vm9848_vm8 = vmor %vm1797_vm6, %vm1798_vm7  ;;  %vm2789_vm13 = vcmask 1046532   ;;  %s350_s18 = sand.u32 1, %s9405_s14  }
  0x18   : > { %s9533_s11 = scalar_lea.vmem %s12833_s0, %s7921_s28  ;;  %vm9935_vm11 = vmand %vm1474_vm9, %vm1475_vm10  ;;  %s12660_s20 = sshll.u32 %s350_s18, 7 }
  0x19   : > { %v8771_v2 = vld [vmem:[%s9533_s11] sm:$0xff]   ;;  %v8773_v4 = vld [vmem:[%s9533_s11 + $0x8] sm:$0xff]   ;;  %v8775_v6 = vld [vmem:[%s9533_s11 + $0x10] sm:$0xff]   ;;  %s12684_s21 = scalar_lea.vmem [#allocation3], %s12660_s20  ;;  %s7954_s25 = sshll.u32 %s9495_s17, 11 }
  0x1a   : > { %v8772_v3 = vld [vmem:[%s9533_s11 + $0x40] sm:$0xff]   ;;  %8273 = vmatprep.mubr.msk.bf16.mxu0 %vm480_vm1, %v8771_v2  ;;  %v8774_v5 = vld [vmem:[%s9533_s11 + $0x48] sm:$0xff]   ;;  %v8776_v7 = vld [vmem:[%s9533_s11 + $0x50] sm:$0xff]   ;;  %s7337_s26 = sshll.u32 %s12684_s21, 4  ;;  %s12785_s29 = scalar_lea.hbm %s12843_s10, %s7954_s25  ;;  %s12787_s26 = int_to_ptr.vmem [resolvable:$true] %s7337_s26 }
  0x1b   : > { %8289 = vmatprep.mubr.msk.bf16.mxu1 %vm480_vm1, %v8772_v3  ;;  %8274 = vmatmul.mubr.msk.bf16.vlgmr.msra.gmra.mxu0 %vm480_vm1, %v8773_v4  ;;  %v8777_v8 = vld [vmem:[%s9533_s11 + $0x18] sm:$0xff]   ;;  %v8779_v10 = vld [vmem:[%s9533_s11 + $0x20] sm:$0xff]   ;;  %v8781_v12 = vld [vmem:[%s9533_s11 + $0x28] sm:$0xff]   ;;  %s12793_s17 = scalar_lea.sflag [#allocation4], %s350_s18  ;;  %s9353_s30 = scalar_lea.vmem %s12787_s26, 2048 }
  0x1c   : > { %8290 = vmatmul.mubr.msk.bf16.vlgmr.msra.gmra.mxu1 %vm480_vm1, %v8774_v5  ;;  %8277 = vmatprep.mubr.msk.bf16.mxu0 %vm480_vm1, %v8775_v6  ;;  %v8778_v9 = vld [vmem:[%s9533_s11 + $0x58] sm:$0xff]   ;;  %v8780_v11 = vld [vmem:[%s9533_s11 + $0x60] sm:$0xff]   ;;  %v8782_v13 = vld [vmem:[%s9533_s11 + $0x68] sm:$0xff]   ;;  %p9354_p11 = scmp.ne.s32.totalorder %s12787_s26, %s9353_s30 }
  0x1d   : > { %8293 = vmatprep.mubr.msk.bf16.mxu1 %vm480_vm1, %v8776_v7  ;;  %v8783_v14 = vld [vmem:[%s9533_s11 + $0x30] sm:$0xff]   ;;  %v8785_v16 = vld [vmem:[%s9533_s11 + $0x38] sm:$0xff]   ;;  %8306 = vmatpush3.bf16.msra.mxu1 %v959_v19  ;;  %vm10456_vm14 = vmor %vm2788_vm12, %vm2789_vm13 }
  0x1e   : > { %v8784_v15 = vld [vmem:[%s9533_s11 + $0x70] sm:$0xff]   ;;  %v8786_v17 = vld [vmem:[%s9533_s11 + $0x78] sm:$0xff]   ;;  %p9355_p12 = pnand %p9354_p11, %p9512_p5  ;;  %s9416_s11 = smov [#allocation3]  }
  0x1f   : > { %s9357_s12 = sshll.u32 %s9416_s11, 4  ;;  %s9358_s12 = int_to_ptr.vmem [resolvable:$false] %s9357_s12 }
  0x20   : > { %p9356_p13 = pneg %p9355_p12  ;;  %s9359_s20 = scalar_lea.vmem %s9358_s12, 4096 }
  0x21   : > { %p9360_p0 = scmp.lt.s32.totalorder %s12787_s26, %s9358_s12  ;;  %p9361_p1 = scmp.lt.s32.totalorder %s9359_s20, %s9353_s30 }
  0x23   : > { %8278 = vmatmul.mubr.msk.bf16.gmra.mxu0 %vm480_vm1, %v8777_v8  ;;  %p9362_p2 = por %p9361_p1, %p9360_p0 }
  0x24   : > { %8294 = vmatmul.mubr.msk.bf16.gmra.mxu1 %vm480_vm1, %v8778_v9  ;;  %8281 = vmatprep.mubr.msk.bf16.mxu0 %vm480_vm1, %v8779_v10 }
  0x25   : > { %8297 = vmatprep.mubr.msk.bf16.mxu1 %vm480_vm1, %v8780_v11  ;;  %p9363_p3 = pnand %p9362_p2, %p9356_p13 }
  0x2b   : > { %8282 = vmatmul.mubr.msk.bf16.gmra.mxu0 %vm480_vm1, %v8781_v12 }
  0x2c   : > { %8298 = vmatmul.mubr.msk.bf16.gmra.mxu1 %vm480_vm1, %v8782_v13  ;;  %8285 = vmatprep.mubr.msk.bf16.mxu0 %vm480_vm1, %v8783_v14 }
  0x2d   : > { %8301 = vmatprep.mubr.msk.bf16.mxu1 %vm480_vm1, %v8784_v15 }
  0x33   : > { %8286 = vmatmul.mubr.msk.bf16.gmra.mxu0 %vm480_vm1, %v8785_v16 }
  0x34   : > { %8302 = vmatmul.mubr.msk.bf16.gmra.mxu1 %vm480_vm1, %v8786_v17 }
  0xdb   : > { %v8275_v21 = vpop.f32.mrf.mxu0 }
  0xdc   : > { %v9578_v22 = vadd.f32 %v8275_v21, %v9575_v20  ;;  %v9580_v23 = vpop.f32.mrf.mxu1 }
  0xdd   : > { %v567_v24 = vpop.f32.mrf.mxu0 }
  0xde   : > { %v696_v25 = vsub.f32 0.0, %v9578_v22  ;;  %v9584_v26 = vadd.f32 %v9575_v20, %v567_v24  ;;  %v631_v27 = vpop.f32.mrf.mxu1 }
  0xdf   : > { %v8276_v28 = vpop.f32.mrf.mxu0  ;;  %v9622_v9 = vadd.f32 %v9575_v20, %v631_v27 }
  0xe0   : > { %v730_v29 = vmul.f32 1.442695, %v696_v25  ;;  %v694_v30 = vsub.f32 0.0, %v9584_v26  ;;  %v9588_v31 = vadd.f32 %v8276_v28, %v9575_v20  ;;  %v9590_v32 = vpop.f32.mrf.mxu1 }
  0xe1   : > { %v570_v33 = vpop.f32.mrf.mxu0  ;;  %v710_v17 = vsub.f32 0.0, %v9622_v9 }
  0xe2   : > { %v726_v34 = vmul.f32 1.442695, %v694_v30  ;;  %v697_v35 = vsub.f32 0.0, %v9588_v31  ;;  %v9594_v36 = vadd.f32 %v9575_v20, %v570_v33  ;;  %8835 = vpow2.f32 %v730_v29  ;;  %v634_v37 = vpop.f32.mrf.mxu1 }
  0xe3   : > { %v8279_v38 = vpop.f32.mrf.mxu0  ;;  %v9637_v24 = vadd.f32 %v9575_v20, %v634_v37  ;;  %v9652_v37 = vadd.f32 %v9590_v32, %v9575_v20 }
  0xe4   : > { %8837 = vpow2.f32 %v726_v34  ;;  %v732_v39 = vmul.f32 1.442695, %v697_v35  ;;  %v695_v40 = vsub.f32 0.0, %v9594_v36  ;;  %v9598_v41 = vadd.f32 %v8279_v38, %v9575_v20  ;;  %v9604_v46 = vpop.f32.mrf.mxu1 }
  0xe5   : > { %v583_v42 = vpop.f32.mrf.mxu0  ;;  %v9648_v35 = vadd.f32 %v9580_v23, %v9575_v20 }
  0xe6   : > { %8839 = vpow2.f32 %v732_v39  ;;  %v728_v43 = vmul.f32 1.442695, %v695_v40  ;;  %v700_v44 = vsub.f32 0.0, %v9598_v41  ;;  %v9602_v45 = vadd.f32 %v9575_v20, %v583_v42  ;;  %v9614_v55 = vpop.f32.mrf.mxu1 }
  0xe7   : > { %v8280_v47 = vpop.f32.mrf.mxu0  ;;  %v758_v39 = vmul.f32 1.442695, %v710_v17 }
  0xe8   : > { %8841 = vpow2.f32 %v728_v43  ;;  %v738_v48 = vmul.f32 1.442695, %v700_v44  ;;  %v698_v49 = vsub.f32 0.0, %v9602_v45  ;;  %v9608_v50 = vadd.f32 %v8280_v47, %v9575_v20  ;;  %v9617_v61 = vpop.f32.mrf.mxu1 }
  0xe9   : > { %v586_v51 = vpop.f32.mrf.mxu0  ;;  %v711_v43 = vsub.f32 0.0, %v9637_v24 }
  0xea   : > { %v734_v52 = vmul.f32 1.442695, %v698_v49  ;;  %v701_v53 = vsub.f32 0.0, %v9608_v50  ;;  %v9612_v54 = vadd.f32 %v9575_v20, %v586_v51  ;;  %8843 = vpow2.f32 %v738_v48  ;;  %v9619_v5 = vpop.f32.mrf.mxu1 }
  0xeb   : > { %v8283_v56 = vpop.f32.mrf.mxu0 }
  0xec   : > { %8845 = vpow2.f32 %v734_v52  ;;  %v740_v57 = vmul.f32 1.442695, %v701_v53  ;;  %v699_v58 = vsub.f32 0.0, %v9612_v54  ;;  %v9625_v11 = vadd.f32 %v8283_v56, %v9575_v20  ;;  %v9627_v12 = vpop.f32.mrf.mxu1 }
  0xed   : > { %v599_v59 = vpop.f32.mrf.mxu0  ;;  %v712_v53 = vsub.f32 0.0, %v9648_v35 }
  0xee   : > { %8847 = vpow2.f32 %v740_v57  ;;  %v736_v60 = vmul.f32 1.442695, %v699_v58  ;;  %v9630_v14 = vadd.f32 %v9575_v20, %v599_v59  ;;  %v704_v27 = vsub.f32 0.0, %v9625_v11  ;;  %v9640_v28 = vpop.f32.mrf.mxu1 }
  0xef   : > { %v8284_v62 = vpop.f32.mrf.mxu0  ;;  %v8836_v63 = vpop.eup %8835  ;;  %v713_v59 = vsub.f32 0.0, %v9652_v37 }
  0xf0   : > { %8849 = vpow2.f32 %v736_v60  ;;  %v792_v4 = vadd.f32 1.0, %v8836_v63  ;;  %v9634_v19 = vadd.f32 %v8284_v62, %v9575_v20  ;;  %v702_v30 = vsub.f32 0.0, %v9630_v14  ;;  %v9656_v47 = vpop.f32.mrf.mxu1 }
  0xf1   : > { %v8838_v0 = vpop.eup %8837  ;;  %v602_v1 = vpop.f32.mrf.mxu0  ;;  %v746_v44 = vmul.f32 1.442695, %v704_v27  ;;  %v760_v60 = vmul.f32 1.442695, %v711_v43 }
  0xf2   : > { %v790_v2 = vadd.f32 1.0, %v8838_v0  ;;  %v9644_v33 = vadd.f32 %v9575_v20, %v602_v1  ;;  %v705_v42 = vsub.f32 0.0, %v9634_v19  ;;  %v742_v48 = vmul.f32 1.442695, %v702_v30  ;;  %v666_v62 = vpop.f32.mrf.mxu1 }
  0xf3   : > { %v8840_v3 = vpop.eup %8839  ;;  %v8287_v8 = vpop.f32.mrf.mxu0  ;;  %v764_v30 = vmul.f32 1.442695, %v713_v59 }
  0xf4   : > { %v793_v6 = vadd.f32 1.0, %v8840_v3  ;;  %8851 = vrcp.f32 %v790_v2  ;;  %v9659_v23 = vadd.f32 %v8287_v8, %v9575_v20  ;;  %v703_v32 = vsub.f32 0.0, %v9644_v33  ;;  %v9696_v17 = vpop.f32.mrf.mxu1 }
  0xf5   : > { %v8842_v7 = vpop.eup %8841  ;;  %v615_v16 = vpop.f32.mrf.mxu0  ;;  %v748_v56 = vmul.f32 1.442695, %v705_v42  ;;  %v9682_v8 = vadd.f32 %v9575_v20, %v9614_v55 }
  0xf6   : > { %8853 = vrcp.f32 %v793_v6  ;;  %v791_v10 = vadd.f32 1.0, %v8842_v7  ;;  %v9663_v49 = vadd.f32 %v9575_v20, %v615_v16  ;;  %v708_v63 = vsub.f32 0.0, %v9659_v23 }
  0xf7   : > { %8855 = vrcp.f32 %v792_v4  ;;  %v8844_v13 = vpop.eup %8843  ;;  %v8288_v38 = vpop.f32.mrf.mxu0  ;;  %v744_v1 = vmul.f32 1.442695, %v703_v32  ;;  %v9678_v7 = vadd.f32 %v9604_v46, %v9575_v20  ;;  %v9694_v46 = vadd.f32 %v9617_v61, %v9575_v20 }
  0xf8   : > { %8857 = vrcp.f32 %v791_v10  ;;  %v796_v25 = vadd.f32 1.0, %v8844_v13  ;;  %v9667_v57 = vadd.f32 %v8288_v38, %v9575_v20  ;;  %v706_v2 = vsub.f32 0.0, %v9663_v49  ;;  %v679_v38 = vpop.f32.mrf.mxu1 }
  0xf9   : > { %v8846_v15 = vpop.eup %8845  ;;  %v618_v51 = vpop.f32.mrf.mxu0  ;;  %v9686_v10 = vadd.f32 %v9575_v20, %v9619_v5  ;;  %v754_v55 = vmul.f32 1.442695, %v708_v63 }
  0xfa   : > { %v794_v18 = vadd.f32 1.0, %v8846_v15  ;;  %v9673_v3 = vadd.f32 %v9575_v20, %v618_v51  ;;  %v709_v16 = vsub.f32 0.0, %v9667_v57  ;;  %v750_v5 = vmul.f32 1.442695, %v706_v2 }
  0xfb   : > { %v8848_v21 = vpop.eup %8847 }
  0xfc   : > { %v797_v29 = vadd.f32 1.0, %v8848_v21  ;;  %8859 = vrcp.f32 %v794_v18 }
  0xfd   : > { %v8850_v34 = vpop.eup %8849 }
  0xfe   : > { %8861 = vrcp.f32 %v797_v29  ;;  %v795_v40 = vadd.f32 1.0, %v8850_v34  ;;  %v756_v29 = vmul.f32 1.442695, %v709_v16  ;;  %v714_v34 = vsub.f32 0.0, %v9682_v8 }
  0xff   : > { %8863 = vrcp.f32 %v796_v25  ;;  %v716_v25 = vsub.f32 0.0, %v9678_v7 }
 0x100   : > { %8865 = vrcp.f32 %v795_v40  ;;  %v717_v40 = vsub.f32 0.0, %v9694_v46  ;;  %v766_v59 = vmul.f32 1.442695, %v714_v34 }
 0x101   : > { %v8852_v52 = vpop.eup %8851  ;;  %8867 = vpow2.f32 %v758_v39 }
 0x102   : > { %8869 = vpow2.f32 %v746_v44  ;;  %v854_v13 = vmul.f32 %v8852_v52, %v9584_v26  ;;  %v707_v26 = vsub.f32 0.0, %v9673_v3  ;;  %v770_v44 = vmul.f32 1.442695, %v716_v25 }
 0x103   : > { %v8854_v58 = vpop.eup %8853  ;;  %8871 = vpow2.f32 %v742_v48 }
 0x104   : > { %v8856_v0 = vpop.eup %8855  ;;  %v857_v6 = vmul.f32 %v8854_v58, %v9588_v31  ;;  %8873 = vpow2.f32 %v748_v56  ;;  %v752_v42 = vmul.f32 1.442695, %v707_v26 }
 0x105   : > { %v8858_v4 = vpop.eup %8857  ;;  %v856_v31 = vmul.f32 %v8856_v0, %v9578_v22  ;;  %8875 = vpow2.f32 %v760_v60  ;;  %v715_v22 = vsub.f32 0.0, %v9686_v10  ;;  %v8304_v60 = vpop.f32.mrf.mxu1  ;;  %v772_v0 = vmul.f32 1.442695, %v717_v40 }
 0x106   : > { %v855_v15 = vmul.f32 %v8858_v4, %v9594_v36  ;;  %8877 = vpow2.f32 %v744_v1  ;;  %v762_v36 = vmul.f32 1.442695, %v712_v53  ;;  %v9715_v53 = vadd.f32 %v9575_v20, %v666_v62 }
 0x107   : > { %v9701_v21 = vpack.c.bf16 %v857_v6, %v856_v31  ;;  %8879 = vpow2.f32 %v754_v55  ;;  %v768_v32 = vmul.f32 1.442695, %v715_v22  ;;  %v682_v6 = vpop.f32.mrf.mxu1  ;;  %v9734_v55 = vadd.f32 %v9656_v47, %v9575_v20 }
 0x108   : > { %v9698_v18 = vpack.c.bf16 %v855_v15, %v854_v13  ;;  %8881 = vpow2.f32 %v750_v5  ;;  %v719_v2 = vsub.f32 0.0, %v9715_v53  ;;  %v9741_v22 = vadd.f32 %v9627_v12, %v9575_v20 }
 0x109   : > { %12873 = vst [vmem:[#allocation7_spill] sm:$0xff] %v9701_v21  ;;  %v8860_v27 = vpop.eup %8859  ;;  %8883 = vpow2.f32 %v762_v36  ;;  %v9737_v36 = vadd.f32 %v9575_v20, %v682_v6 }
 0x10a   : > { %12872 = vst [vmem:[#allocation6_spill] sm:$0xff] %v9698_v18  ;;  %8307 = vmatprep.mubr.msk.bf16.mxu1 %vm480_vm1, %v9698_v18  ;;  %v858_v51 = vmul.f32 %v8860_v27, %v9602_v45  ;;  %8885 = vpow2.f32 %v756_v29  ;;  %v776_v26 = vmul.f32 1.442695, %v719_v2  ;;  %v720_v12 = vsub.f32 0.0, %v9741_v22 }
 0x10b   : > { %v8862_v61 = vpop.eup %8861  ;;  %8308 = vmatmul.mubr.msk.bf16.vlgmr.msra.gmra.mxu1 %vm480_vm1, %v9701_v21  ;;  %8887 = vpow2.f32 %v764_v30  ;;  %v721_v30 = vsub.f32 0.0, %v9734_v55  ;;  %v723_v40 = vsub.f32 0.0, %v9737_v36 }
 0x10c   : > { %v8864_v39 = vpop.eup %8863  ;;  %v861_v48 = vmul.f32 %v8862_v61, %v9608_v50  ;;  %v9722_v50 = vadd.f32 %v9575_v20, %v9640_v28  ;;  %8889 = vpow2.f32 %v752_v42  ;;  %v9744_v61 = vadd.f32 %v9575_v20, %v679_v38 }
 0x10d   : > { %v8866_v43 = vpop.eup %8865  ;;  %v860_v58 = vmul.f32 %v8864_v39, %v9598_v41  ;;  %8891 = vpow2.f32 %v770_v44 }
 0x10e   : > { %v859_v52 = vmul.f32 %v8866_v43, %v9612_v54  ;;  %v8868_v56 = vpop.eup %8867  ;;  %8893 = vpow2.f32 %v768_v32  ;;  %v718_v13 = vsub.f32 0.0, %v9722_v50 }
 0x10f   : > { %v8870_v63 = vpop.eup %8869  ;;  %v9724_v54 = vpack.c.bf16 %v861_v48, %v860_v58  ;;  %8895 = vpow2.f32 %v766_v59  ;;  %v806_v31 = vadd.f32 1.0, %v8868_v56  ;;  %v722_v48 = vsub.f32 0.0, %v9744_v61 }
 0x110   : > { %v9718_v1 = vpack.c.bf16 %v859_v52, %v858_v51  ;;  %v8872_v45 = vpop.eup %8871  ;;  %v800_v4 = vadd.f32 1.0, %v8870_v63  ;;  %8897 = vpow2.f32 %v772_v0  ;;  %v774_v29 = vmul.f32 1.442695, %v718_v13 }
 0x111   : > { %12875 = vst [vmem:[#allocation9_spill] sm:$0xff] %v9724_v54  ;;  %v798_v62 = vadd.f32 1.0, %v8872_v45  ;;  %v8874_v41 = vpop.eup %8873  ;;  %v780_v51 = vmul.f32 1.442695, %v721_v30  ;;  %v9751_v52 = vadd.f32 %v8304_v60, %v9575_v20  ;;  %v784_v59 = vmul.f32 1.442695, %v723_v40 }
 0x112   : > { %12874 = vst [vmem:[#allocation8_spill] sm:$0xff] %v9718_v1  ;;  %8311 = vmatprep.mubr.msk.bf16.mxu1 %vm480_vm1, %v9718_v1  ;;  %v8876_v28 = vpop.eup %8875  ;;  %v801_v15 = vadd.f32 1.0, %v8874_v41  ;;  %v778_v0 = vmul.f32 1.442695, %v720_v12  ;;  %v9755_v45 = vadd.f32 %v9696_v17, %v9575_v20  ;;  %v782_v2 = vmul.f32 1.442695, %v722_v48 }
 0x113   : > { %8312 = vmatmul.mubr.msk.bf16.gmra.mxu1 %vm480_vm1, %v9724_v54  ;;  %v8878_v16 = vpop.eup %8877  ;;  %8899 = vrcp.f32 %v798_v62  ;;  %v807_v25 = vadd.f32 1.0, %v8876_v28  ;;  %v725_v60 = vsub.f32 0.0, %v9751_v52 }
 0x114   : > { %8901 = vrcp.f32 %v801_v15  ;;  %v799_v5 = vadd.f32 1.0, %v8878_v16  ;;  %v8880_v27 = vpop.eup %8879  ;;  %v724_v16 = vsub.f32 0.0, %v9755_v45 }
 0x115   : > { %8903 = vrcp.f32 %v800_v4  ;;  %v8882_v47 = vpop.eup %8881  ;;  %v804_v43 = vadd.f32 1.0, %v8880_v27 }
 0x116   : > { %8905 = vrcp.f32 %v799_v5  ;;  %v8884_v34 = vpop.eup %8883  ;;  %v802_v39 = vadd.f32 1.0, %v8882_v47 }
 0x117   : > { %8907 = vrcp.f32 %v806_v31  ;;  %v8886_v42 = vpop.eup %8885  ;;  %v808_v15 = vadd.f32 1.0, %v8884_v34  ;;  %v786_v34 = vmul.f32 1.442695, %v724_v16 }
 0x118   : > { %8909 = vpow2.f32 %v776_v26  ;;  %v8888_v44 = vpop.eup %8887  ;;  %v805_v38 = vadd.f32 1.0, %v8886_v42  ;;  %v788_v26 = vmul.f32 1.442695, %v725_v60 }
 0x119   : > { %8911 = vrcp.f32 %v807_v25  ;;  %v8890_v32 = vpop.eup %8889  ;;  %v809_v4 = vadd.f32 1.0, %v8888_v44 }
 0x11a   : > { %8913 = vpow2.f32 %v774_v29  ;;  %v8892_v56 = vpop.eup %8891  ;;  %v803_v58 = vadd.f32 1.0, %v8890_v32 }
 0x11b   : > { %8915 = vrcp.f32 %v802_v39  ;;  %v8894_v63 = vpop.eup %8893 }
 0x11c   : > { %8917 = vrcp.f32 %v805_v38  ;;  %v8896_v62 = vpop.eup %8895  ;;  %v811_v28 = vadd.f32 1.0, %v8894_v63 }
 0x11d   : > { %8919 = vrcp.f32 %v804_v43  ;;  %v8898_v41 = vpop.eup %8897  ;;  %v810_v5 = vadd.f32 1.0, %v8896_v62 }
 0x11e   : > { %8921 = vrcp.f32 %v803_v58  ;;  %v813_v12 = vadd.f32 1.0, %v8898_v41 }
 0x11f   : > { %8923 = vpow2.f32 %v780_v51 }
 0x120   : > { %v8900_v6 = vpop.eup %8899  ;;  %8925 = vpow2.f32 %v784_v59 }
 0x121   : > { %v8902_v13 = vpop.eup %8901  ;;  %8927 = vpow2.f32 %v778_v0  ;;  %v862_v27 = vmul.f32 %v8900_v6, %v9630_v14 }
 0x122   : > { %v8904_v31 = vpop.eup %8903  ;;  %8929 = vpow2.f32 %v782_v2  ;;  %v865_v17 = vmul.f32 %v8902_v13, %v9634_v19 }
 0x123   : > { %v8906_v20 = vpop.eup %8905  ;;  %8931 = vrcp.f32 %v809_v4  ;;  %v864_v30 = vmul.f32 %v8904_v31, %v9625_v11 }
 0x124   : > { %v8908_v25 = vpop.eup %8907  ;;  %8933 = vrcp.f32 %v811_v28  ;;  %v863_v29 = vmul.f32 %v8906_v20, %v9644_v33  ;;  %v812_v33 = vadd.f32 1.0, %v8892_v56 }
 0x125   : > { %v8910_v47 = vpop.eup %8909  ;;  %8935 = vrcp.f32 %v808_v15  ;;  %v9765_v43 = vpack.c.bf16 %v865_v17, %v864_v30  ;;  %v870_v2 = vmul.f32 %v8908_v25, %v9622_v9 }
 0x126   : > { %v8912_v39 = vpop.eup %8911  ;;  %8937 = vrcp.f32 %v810_v5  ;;  %v9763_v40 = vpack.c.bf16 %v863_v29, %v862_v27  ;;  %v815_v44 = vadd.f32 1.0, %v8910_v47 }
 0x127   : > { %v8914_v42 = vpop.eup %8913  ;;  %12877 = vst [vmem:[#allocation11_spill] sm:$0xff] %v9765_v43  ;;  %8939 = vpow2.f32 %v788_v26  ;;  %v871_v58 = vmul.f32 %v8912_v39, %v9637_v24 }
 0x128   : > { %12876 = vst [vmem:[#allocation10_spill] sm:$0xff] %v9763_v40  ;;  %v8916_v19 = vpop.eup %8915  ;;  %8315 = vmatprep.mubr.msk.bf16.mxu1 %vm480_vm1, %v9763_v40  ;;  %8941 = vpow2.f32 %v786_v34  ;;  %v814_v48 = vadd.f32 1.0, %v8914_v42 }
 0x129   : > { %v8918_v14 = vpop.eup %8917  ;;  %8316 = vmatmul.mubr.msk.bf16.gmra.mxu1 %vm480_vm1, %v9765_v43  ;;  %8943 = vrcp.f32 %v813_v12  ;;  %v866_v59 = vmul.f32 %v8916_v19, %v9663_v49  ;;  %v9781_v6 = vpack.c.bf16 %v871_v58, %v870_v2 }
 0x12a   : > { %v8920_v11 = vpop.eup %8919  ;;  %v869_v32 = vmul.f32 %v8918_v14, %v9667_v57  ;;  %8945 = vrcp.f32 %v815_v44 }
 0x12b   : > { %v8922_v38 = vpop.eup %8921  ;;  %8947 = vrcp.f32 %v812_v33  ;;  %v868_v56 = vmul.f32 %v8920_v11, %v9659_v23  ;;  %12880 = vst [vmem:[#allocation14_spill] sm:$0xff] %v9781_v6 }
 0x12c   : > { %v8924_v51 = vpop.eup %8923  ;;  %v867_v63 = vmul.f32 %v8922_v38, %v9673_v3  ;;  %8949 = vrcp.f32 %v814_v48 }
 0x12d   : > { %v8926_v0 = vpop.eup %8925  ;;  %v817_v57 = vadd.f32 1.0, %v8924_v51  ;;  %v9779_v60 = vpack.c.bf16 %v869_v32, %v868_v56 }
 0x12e   : > { %v8928_v62 = vpop.eup %8927  ;;  %v9777_v41 = vpack.c.bf16 %v867_v63, %v866_v59  ;;  %v819_v49 = vadd.f32 1.0, %v8926_v0  ;;  %v1780_v59 = vld [vmem:[%s12838_s5] sm:$0x3] }
 0x12f   : > { %v8930_v4 = vpop.eup %8929  ;;  %12879 = vst [vmem:[#allocation13_spill] sm:$0xff] %v9779_v60  ;;  %v816_v28 = vadd.f32 1.0, %v8928_v62  ;;  %8951 = vrcp.f32 %v817_v57  ;;  %8719 = vmatprep.subr.msk.bf16.mxu1 %vm2283_vm4, %v1780_v59  ;;  %v2577_v63 = vsel %vm2283_vm4, %v1780_v59, 0 }
 0x130   : > { %12878 = vst [vmem:[#allocation12_spill] sm:$0xff] %v9777_v41  ;;  %v8932_v24 = vpop.eup %8931  ;;  %8319 = vmatprep.mubr.msk.bf16.mxu1 %vm480_vm1, %v9777_v41  ;;  %v818_v23 = vadd.f32 1.0, %v8930_v4  ;;  %8953 = vrcp.f32 %v819_v49  ;;  %8374 = vmatpush3.bf16.msra.mxu1 %v2577_v63 }
 0x131   : > { %v8934_v3 = vpop.eup %8933  ;;  %8320 = vmatmul.mubr.msk.bf16.gmra.mxu1 %vm480_vm1, %v9779_v60  ;;  %v873_v15 = vmul.f32 %v8932_v24, %v9652_v37  ;;  %8955 = vrcp.f32 %v816_v28 }
 0x132   : > { %v8936_v9 = vpop.eup %8935  ;;  %8323 = vmatprep.mubr.msk.bf16.mxu1 %vm480_vm1, %v9781_v6  ;;  %v875_v31 = vmul.f32 %v8934_v3, %v9686_v10  ;;  %8957 = vrcp.f32 %v818_v23 }
 0x133   : > { %v8938_v13 = vpop.eup %8937  ;;  %v872_v5 = vmul.f32 %v8936_v9, %v9648_v35 }
 0x134   : > { %v8940_v16 = vpop.eup %8939  ;;  %v874_v17 = vmul.f32 %v8938_v13, %v9682_v8 }
 0x135   : > { %v8942_v20 = vpop.eup %8941  ;;  %v9793_v26 = vpack.c.bf16 %v873_v15, %v872_v5  ;;  %v821_v25 = vadd.f32 1.0, %v8940_v16 }
 0x136   : > { %v8944_v27 = vpop.eup %8943  ;;  %v9795_v29 = vpack.c.bf16 %v875_v31, %v874_v17  ;;  %v820_v37 = vadd.f32 1.0, %v8942_v20 }
 0x137   : > { %12881 = vst [vmem:[#allocation15_spill] sm:$0xff] %v9793_v26  ;;  %v8946_v47 = vpop.eup %8945  ;;  %v877_v30 = vmul.f32 %v8944_v27, %v9694_v46  ;;  %8959 = vrcp.f32 %v821_v25 }
 0x138   : > { %12882 = vst [vmem:[#allocation16_spill] sm:$0xff] %v9795_v29  ;;  %v8948_v10 = vpop.eup %8947  ;;  %v879_v8 = vmul.f32 %v8946_v47, %v9715_v53  ;;  %8961 = vrcp.f32 %v820_v37  ;;  %v9860_v37 = vld [vmem:[%s12837_s4] ss:$0 sm:$0xff] }
 0x139   : > { %8324 = vmatmul.mubr.msk.bf16.gmra.mxu1 %vm480_vm1, %v9793_v26  ;;  %v8950_v35 = vpop.eup %8949  ;;  %v876_v34 = vmul.f32 %v8948_v10, %v9678_v7 }
 0x13a   : > { %8327 = vmatprep.mubr.msk.bf16.mxu1 %vm480_vm1, %v9795_v29  ;;  %v878_v39 = vmul.f32 %v8950_v35, %v9722_v50 }
 0x13b   : > { %v9805_v42 = vpack.c.bf16 %v877_v30, %v876_v34 }
 0x13c   : > { %v8952_v12 = vpop.eup %8951  ;;  %v9807_v19 = vpack.c.bf16 %v879_v8, %v878_v39 }
 0x13d   : > { %12883 = vst [vmem:[#allocation17_spill] sm:$0xff] %v9805_v42  ;;  %v8954_v44 = vpop.eup %8953  ;;  %v881_v53 = vmul.f32 %v8952_v12, %v9734_v55 }
 0x13e   : > { %12884 = vst [vmem:[#allocation18_spill] sm:$0xff] %v9807_v19  ;;  %v8956_v14 = vpop.eup %8955  ;;  %v883_v7 = vmul.f32 %v8954_v44, %v9737_v36 }
 0x13f   : > { %v8958_v46 = vpop.eup %8957  ;;  %v880_v50 = vmul.f32 %v8956_v14, %v9741_v22  ;;  %v9415_v22 = vmov 0  }
 0x140   : > { %v882_v33 = vmul.f32 %v8958_v46, %v9744_v61  ;;  %v7456_v61 = vcombine.low %v9415_v22, %v9415_v22  ;;  %v7457_v58 = vcombine.high %v9415_v22, %v9415_v22 }
 0x141   : > { %8328 = vmatmul.mubr.msk.bf16.gmra.mxu1 %vm480_vm1, %v9805_v42  ;;  %v9817_v11 = vpack.c.bf16 %v881_v53, %v880_v50 }
 0x142   : > { %8331 = vmatprep.mubr.msk.bf16.mxu1 %vm480_vm1, %v9807_v19  ;;  %v9819_v38 = vpack.c.bf16 %v883_v7, %v882_v33  ;;  %1693 = vst.msk [vmem:[#allocation2] sm:$0xf] %vm1692_vm2, %v7456_v61  ;;  %1694 = vst.msk [vmem:[#allocation2 + $0x4] sm:$0xf] %vm1692_vm2, %v7457_v58 }
 0x143   : > { %12885 = vst [vmem:[#allocation19_spill] sm:$0xff] %v9817_v11  ;;  %1696 = vst.msk [vmem:[#allocation2 + $0x8] sm:$0x1] %vm1695_vm3, %v7456_v61 }
 0x144   : > { %v8960_v48 = vpop.eup %8959  ;;  %12886 = vst [vmem:[#allocation20_spill] sm:$0xff] %v9819_v38  ;;  %1745 = vst.msk [vmem:[#allocation2 + $0xcc] sm:$0xf] %vm1692_vm2, %v7456_v61 }
 0x145   : > { %v8962_v32 = vpop.eup %8961  ;;  %v885_v55 = vmul.f32 %v8960_v48, %v9751_v52  ;;  %1746 = vst.msk [vmem:[#allocation2 + $0xd0] sm:$0xf] %vm1692_vm2, %v7457_v58  ;;  %v7506_v52 = vld [vmem:[%s12838_s5 + $0x2] sm:$0x3] }
 0x146   : > { %v884_v36 = vmul.f32 %v8962_v32, %v9755_v45  ;;  %1747 = vst.msk [vmem:[#allocation2 + $0xd4] sm:$0x1] %vm1695_vm3, %v7456_v61  ;;  %8718 = vmatprep.subr.msk.bf16.mxu0 %vm2283_vm4, %v7506_v52  ;;  %v2285_v45 = vsel %vm2283_vm4, %v7506_v52, 0 }
 0x147   : > { %8340 = vmatpush3.bf16.msra.mxu0 %v2285_v45 }
 0x148   : > { %v9827_v51 = vpack.c.bf16 %v885_v55, %v884_v36 }
 0x149   : > { %8332 = vmatmul.mubr.msk.bf16.gmra.mxu1 %vm480_vm1, %v9817_v11  ;;  %v1748_v0 = vld [vmem:[#allocation2] sm:$0xf]  ;;  %v1749_v56 = vld [vmem:[#allocation2 + $0x4] sm:$0xf] }
 0x14a   : > { %8335 = vmatprep.mubr.msk.bf16.mxu1 %vm480_vm1, %v9819_v38  ;;  %12887 = vst [vmem:[#allocation21_spill] sm:$0xff] %v9827_v51  ;;  %v1801_v62 = vshrl.u32 %v1748_v0, 16  ;;  %v1804_v2 = vshll.u32 %v1748_v0, 16  ;;  %v1814_v4 = vshrl.u32 %v1749_v56, 16  ;;  %v7539_v57 = vcombine.low %v1748_v0, %v1749_v56  ;;  %v1781_v23 = vld [vmem:[#allocation2 + $0x8] sm:$0x1] }
 0x14b   : > { %v1810_v3 = vshll.u32 %v1749_v56, 16  ;;  %v1820_v16 = vshll.u32 %v1781_v23, 16 }
 0x14c   : > { %v1803_v24 = vrot.slane %v1801_v62, 4  ;;  %v1806_v49 = vrot.slane %v1804_v2, 5  ;;  %v1816_v9 = vrot.slane %v1814_v4, 4 }
 0x14d   : > { %v1812_v28 = vrot.slane %v1810_v3, 5  ;;  %v1822_v17 = vrot.slane %v1820_v16, 5  ;;  %v9897_v3 = vld [vmem:[%s12838_s5 + $0x4] sm:$0x3] }
 0x14e   : > { %v1807_v13 = vor.u32 %v1806_v49, %v1803_v24  ;;  %8720 = vmatprep.subr.msk.bf16.mxu0 %vm2283_vm4, %v9897_v3 }
 0x14f   : > { %v1817_v15 = vor.u32 %v1816_v9, %v1812_v28 }
 0x150   : > { %v1808_v5 = vrot.slane %v1807_v13, 4 }
 0x151   : > { %8336 = vmatmul.mubr.msk.bf16.gmra.mxu1 %vm480_vm1, %v9827_v51  ;;  %v1818_v20 = vrot.slane %v1817_v15, 4 }
 0x152   : > { %8375 = vmatprep.mubr.msk.bf16.mxu1 %vm2234_vm5, %v7539_v57  ;;  %v1813_v25 = vsel %vm9848_vm8, %v1808_v5, %v1812_v28 }
 0x153   : > { %v1823_v27 = vsel %vm9848_vm8, %v1818_v20, %v1822_v17 }
 0x154   : > { %v7507_v47 = vcombine.low %v1813_v25, %v1823_v27 }
 0x156   : > { %8341 = vmatprep.mubr.msk.bf16.mxu0 %vm2234_vm5, %v7507_v47 }
 0x1cb   : > { %v8309_v10 = vpop.f32.mrf.mxu1 }
 0x1cc   : > { %v9863_v35 = vadd.f32 %v8309_v10, %v9860_v37 }
 0x1cd   : > { %v995_v30 = vpop.f32.mrf.mxu1 }
 0x1ce   : > { %v1124_v8 = vsub.f32 0.0, %v9863_v35  ;;  %v9867_v34 = vadd.f32 %v9860_v37, %v995_v30 }
 0x1cf   : > { %v8310_v39 = vpop.f32.mrf.mxu1 }
 0x1d0   : > { %v1158_v12 = vmul.f32 1.442695, %v1124_v8  ;;  %v1122_v44 = vsub.f32 0.0, %v9867_v34  ;;  %v9871_v14 = vadd.f32 %v8310_v39, %v9860_v37 }
 0x1d1   : > { %v998_v46 = vpop.f32.mrf.mxu1 }
 0x1d2   : > { %8963 = vpow2.f32 %v1158_v12  ;;  %v1154_v53 = vmul.f32 1.442695, %v1122_v44  ;;  %v1125_v7 = vsub.f32 0.0, %v9871_v14  ;;  %v9875_v50 = vadd.f32 %v9860_v37, %v998_v46 }
 0x1d3   : > { %v8313_v33 = vpop.f32.mrf.mxu1 }
 0x1d4   : > { %8965 = vpow2.f32 %v1154_v53  ;;  %v1160_v48 = vmul.f32 1.442695, %v1125_v7  ;;  %v1123_v32 = vsub.f32 0.0, %v9875_v50  ;;  %v9879_v55 = vadd.f32 %v8313_v33, %v9860_v37 }
 0x1d5   : > { %v1011_v36 = vpop.f32.mrf.mxu1 }
 0x1d6   : > { %8967 = vpow2.f32 %v1160_v48  ;;  %v1156_v22 = vmul.f32 1.442695, %v1123_v32  ;;  %v1128_v61 = vsub.f32 0.0, %v9879_v55  ;;  %v9883_v58 = vadd.f32 %v9860_v37, %v1011_v36 }
 0x1d7   : > { %v8314_v52 = vpop.f32.mrf.mxu1 }
 0x1d8   : > { %8969 = vpow2.f32 %v1156_v22  ;;  %v1166_v45 = vmul.f32 1.442695, %v1128_v61  ;;  %v1126_v59 = vsub.f32 0.0, %v9883_v58  ;;  %v9887_v63 = vadd.f32 %v8314_v52, %v9860_v37 }
 0x1d9   : > { %v1014_v0 = vpop.f32.mrf.mxu1 }
 0x1da   : > { %8971 = vpow2.f32 %v1166_v45  ;;  %v1162_v56 = vmul.f32 1.442695, %v1126_v59  ;;  %v1129_v62 = vsub.f32 0.0, %v9887_v63  ;;  %v9891_v2 = vadd.f32 %v9860_v37, %v1014_v0 }
 0x1dc   : > { %8973 = vpow2.f32 %v1162_v56  ;;  %v1168_v4 = vmul.f32 1.442695, %v1129_v62  ;;  %v1127_v57 = vsub.f32 0.0, %v9891_v2 }
 0x1de   : > { %8975 = vpow2.f32 %v1168_v4  ;;  %v1164_v24 = vmul.f32 1.442695, %v1127_v57 }
 0x1df   : > { %v8964_v49 = vpop.eup %8963 }
 0x1e0   : > { %v1220_v28 = vadd.f32 1.0, %v8964_v49  ;;  %8977 = vpow2.f32 %v1164_v24 }
 0x1e1   : > { %v8966_v9 = vpop.eup %8965 }
 0x1e2   : > { %v1218_v23 = vadd.f32 1.0, %v8966_v9  ;;  %8979 = vrcp.f32 %v1220_v28 }
 0x1e3   : > { %v8968_v13 = vpop.eup %8967 }
 0x1e4   : > { %v1221_v15 = vadd.f32 1.0, %v8968_v13  ;;  %8981 = vrcp.f32 %v1218_v23 }
 0x1e5   : > { %v8970_v16 = vpop.eup %8969 }
 0x1e6   : > { %8983 = vrcp.f32 %v1221_v15  ;;  %v1219_v5 = vadd.f32 1.0, %v8970_v16 }
 0x1e7   : > { %v8972_v20 = vpop.eup %8971 }
 0x1e8   : > { %8985 = vrcp.f32 %v1219_v5  ;;  %v1224_v17 = vadd.f32 1.0, %v8972_v20 }
 0x1e9   : > { %v8974_v25 = vpop.eup %8973  ;;  %v8317_v10 = vpop.f32.mrf.mxu1 }
 0x1ea   : > { %8987 = vrcp.f32 %v1224_v17  ;;  %v1222_v27 = vadd.f32 1.0, %v8974_v25  ;;  %v9902_v8 = vadd.f32 %v8317_v10, %v9860_v37  ;;  %v9930_v17 = vsel %vm2283_vm4, %v9897_v3, 0 }
 0x1eb   : > { %v8976_v47 = vpop.eup %8975  ;;  %v1027_v12 = vpop.f32.mrf.mxu1 }
 0x1ec   : > { %8989 = vrcp.f32 %v1222_v27  ;;  %v1225_v30 = vadd.f32 1.0, %v8976_v47  ;;  %v1132_v46 = vsub.f32 0.0, %v9902_v8  ;;  %v9906_v53 = vadd.f32 %v9860_v37, %v1027_v12 }
 0x1ed   : > { %v8978_v39 = vpop.eup %8977  ;;  %v8318_v7 = vpop.f32.mrf.mxu1 }
 0x1ee   : > { %8991 = vrcp.f32 %v1225_v30  ;;  %v1223_v44 = vadd.f32 1.0, %v8978_v39  ;;  %v1174_v48 = vmul.f32 1.442695, %v1132_v46  ;;  %v1130_v32 = vsub.f32 0.0, %v9906_v53 }
 0x1ef   : > { %v8980_v33 = vpop.eup %8979  ;;  %v9910_v36 = vadd.f32 %v8318_v7, %v9860_v37  ;;  %v1030_v22 = vpop.f32.mrf.mxu1 }
 0x1f0   : > { %8993 = vrcp.f32 %v1223_v44  ;;  %v1170_v52 = vmul.f32 1.442695, %v1130_v32  ;;  %v9913_v45 = vadd.f32 %v9860_v37, %v1030_v22  ;;  %v1284_v0 = vmul.f32 %v8980_v33, %v9863_v35 }
 0x1f1   : > { %v8982_v61 = vpop.eup %8981  ;;  %8995 = vpow2.f32 %v1174_v48  ;;  %v1133_v56 = vsub.f32 0.0, %v9910_v36  ;;  %v8321_v62 = vpop.f32.mrf.mxu1 }
 0x1f2   : > { %8997 = vpow2.f32 %v1170_v52  ;;  %v1131_v57 = vsub.f32 0.0, %v9913_v45  ;;  %v9920_v24 = vadd.f32 %v8321_v62, %v9860_v37  ;;  %v1282_v28 = vmul.f32 %v8982_v61, %v9867_v34 }
 0x1f3   : > { %v8984_v59 = vpop.eup %8983  ;;  %v1176_v9 = vmul.f32 1.442695, %v1133_v56  ;;  %v1043_v23 = vpop.f32.mrf.mxu1 }
 0x1f4   : > { %v1285_v4 = vmul.f32 %v8984_v59, %v9871_v14  ;;  %v1172_v15 = vmul.f32 1.442695, %v1131_v57  ;;  %v1136_v16 = vsub.f32 0.0, %v9920_v24  ;;  %v9926_v5 = vadd.f32 %v9860_v37, %v1043_v23 }
 0x1f5   : > { %v8986_v49 = vpop.eup %8985  ;;  %8999 = vpow2.f32 %v1176_v9  ;;  %v8322_v20 = vpop.f32.mrf.mxu1 }
 0x1f6   : > { %v1315_v13 = vpack.c.bf16 %v1285_v4, %v1284_v0  ;;  %v1283_v35 = vmul.f32 %v8986_v49, %v9875_v50  ;;  %9001 = vpow2.f32 %v1172_v15  ;;  %v1182_v30 = vmul.f32 1.442695, %v1136_v16 }
 0x1f7   : > { %v8988_v14 = vpop.eup %8987  ;;  %v1134_v39 = vsub.f32 0.0, %v9926_v5  ;;  %v9941_v12 = vadd.f32 %v8322_v20, %v9860_v37  ;;  %v1046_v3 = vpop.f32.mrf.mxu1 }
 0x1f8   : > { %v1338_v34 = vshrl.u32 %v1315_v13, 16  ;;  %v1341_v25 = vshll.u32 %v1315_v13, 16  ;;  %v1314_v27 = vpack.c.bf16 %v1283_v35, %v1282_v28  ;;  %v1288_v47 = vmul.f32 %v8988_v14, %v9879_v55 }
 0x1f9   : > { %v8990_v10 = vpop.eup %8989  ;;  %9003 = vpow2.f32 %v1182_v30  ;;  %v1178_v48 = vmul.f32 1.442695, %v1134_v39  ;;  %v1137_v32 = vsub.f32 0.0, %v9941_v12  ;;  %v9946_v22 = vadd.f32 %v9860_v37, %v1046_v3  ;;  %v8325_v61 = vpop.f32.mrf.mxu1 }
 0x1fa   : > { %v1340_v44 = vrot.slane %v1338_v34, 7  ;;  %v1331_v46 = vshrl.u32 %v1314_v27, 16  ;;  %v1334_v7 = vshll.u32 %v1314_v27, 16  ;;  %v1286_v55 = vmul.f32 %v8990_v10, %v9883_v58 }
 0x1fb   : > { %v8992_v33 = vpop.eup %8991  ;;  %9005 = vpow2.f32 %v1178_v48  ;;  %v1184_v58 = vmul.f32 1.442695, %v1137_v32  ;;  %v1135_v57 = vsub.f32 0.0, %v9946_v22  ;;  %v1059_v49 = vpop.f32.mrf.mxu1  ;;  %v9966_v32 = vadd.f32 %v8325_v61, %v9860_v37 }
 0x1fc   : > { %v1343_v52 = vor.u32 %v1341_v25, %v1340_v44  ;;  %v1494_v59 = vsel %vm9935_vm11, %v1340_v44, 0  ;;  %v1333_v0 = vrot.slane %v1331_v46, 7  ;;  %v1289_v56 = vmul.f32 %v8992_v33, %v9887_v63 }
 0x1fd   : > { %v8994_v62 = vpop.eup %8993  ;;  %v7463_v4 = vcombine.low %v1494_v59, %v1494_v59  ;;  %v8326_v20 = vpop.f32.mrf.mxu1  ;;  %9007 = vpow2.f32 %v1184_v58 }
 0x1fe   : > { %v1478_v28 = vsel %vm9935_vm11, 0, %v1343_v52  ;;  %v1336_v9 = vor.u32 %v1334_v7, %v1333_v0  ;;  %v1493_v23 = vsel %vm9935_vm11, %v1333_v0, 0  ;;  %v1317_v13 = vpack.c.bf16 %v1289_v56, %v1288_v47  ;;  %v8996_v35 = vpop.eup %8995 }
 0x1ff   : > { %v7461_v15 = vcombine.low %v1478_v28, %v1478_v28  ;;  %v7462_v16 = vcombine.high %v1478_v28, %v1478_v28  ;;  %1702 = vst.msk [vmem:[#allocation2 + $0x20] sm:$0x1] %vm1695_vm3, %v7463_v4  ;;  %v7460_v63 = vcombine.low %v1493_v23, %v1493_v23  ;;  %v1287_v14 = vmul.f32 %v8994_v62, %v9891_v2  ;;  %v8998_v30 = vpop.eup %8997  ;;  %v1062_v44 = vpop.f32.mrf.mxu1 }
 0x200   : > { %v1477_v34 = vsel %vm9935_vm11, 0, %v1336_v9  ;;  %v1352_v25 = vshrl.u32 %v1317_v13, 16  ;;  %v1355_v27 = vshll.u32 %v1317_v13, 16  ;;  %v1228_v10 = vadd.f32 1.0, %v8996_v35 }
 0x201   : > { %1700 = vst.msk [vmem:[#allocation2 + $0x18] sm:$0xf] %vm1692_vm2, %v7461_v15  ;;  %1701 = vst.msk [vmem:[#allocation2 + $0x1c] sm:$0xf] %vm1692_vm2, %v7462_v16  ;;  %v7458_v47 = vcombine.low %v1477_v34, %v1477_v34  ;;  %v7459_v39 = vcombine.high %v1477_v34, %v1477_v34  ;;  %v1316_v3 = vpack.c.bf16 %v1287_v14, %v1286_v55  ;;  %v1226_v46 = vadd.f32 1.0, %v8998_v30  ;;  %v8329_v59 = vpop.f32.mrf.mxu1 }
 0x202   : > { %1699 = vst.msk [vmem:[#allocation2 + $0x14] sm:$0x1] %vm1695_vm3, %v7460_v63  ;;  %v1354_v2 = vrot.slane %v1352_v25, 7  ;;  %9009 = vrcp.f32 %v1228_v10  ;;  %v1180_v7 = vmul.f32 1.442695, %v1135_v57  ;;  %v9969_v52 = vadd.f32 %v9860_v37, %v1059_v49  ;;  %v9000_v55 = vpop.eup %8999 }
 0x203   : > { %1697 = vst.msk [vmem:[#allocation2 + $0xc] sm:$0xf] %vm1692_vm2, %v7458_v47  ;;  %1698 = vst.msk [vmem:[#allocation2 + $0x10] sm:$0xf] %vm1692_vm2, %v7459_v39  ;;  %v1345_v33 = vshrl.u32 %v1316_v3, 16  ;;  %v1348_v48 = vshll.u32 %v1316_v3, 16  ;;  %9011 = vrcp.f32 %v1226_v46  ;;  %v9974_v62 = vadd.f32 %v8326_v20, %v9860_v37  ;;  %v1075_v28 = vpop.f32.mrf.mxu1  ;;  %v9002_v61 = vpop.eup %9001 }
 0x204   : > { %v1357_v0 = vor.u32 %v1355_v27, %v1354_v2  ;;  %v1496_v56 = vsel %vm9935_vm11, %v1354_v2, 0  ;;  %v1229_v57 = vadd.f32 1.0, %v9000_v55  ;;  %9013 = vpow2.f32 %v1180_v7 }
 0x205   : > { %v7469_v4 = vcombine.low %v1496_v56, %v1496_v56  ;;  %v1347_v58 = vrot.slane %v1345_v33, 7  ;;  %v1140_v9 = vsub.f32 0.0, %v9966_v32  ;;  %v1138_v23 = vsub.f32 0.0, %v9969_v52  ;;  %v8330_v14 = vpop.f32.mrf.mxu1 }
 0x206   : > { %v1480_v49 = vsel %vm9935_vm11, 0, %v1357_v0  ;;  %v1141_v13 = vsub.f32 0.0, %v9974_v62  ;;  %v9004_v20 = vpop.eup %9003  ;;  %9015 = vrcp.f32 %v1229_v57  ;;  %v1227_v25 = vadd.f32 1.0, %v9002_v61 }
 0x207   : > { %v7467_v35 = vcombine.low %v1480_v49, %v1480_v49  ;;  %v7468_v15 = vcombine.high %v1480_v49, %v1480_v49  ;;  %1708 = vst.msk [vmem:[#allocation2 + $0x38] sm:$0x1] %vm1695_vm3, %v7469_v4  ;;  %v1350_v16 = vor.u32 %v1348_v48, %v1347_v58  ;;  %v1495_v63 = vsel %vm9935_vm11, %v1347_v58, 0  ;;  %v1078_v3 = vpop.f32.mrf.mxu1  ;;  %v7620_v49 = vld [vmem:[%s12838_s5 + $0x6] sm:$0x3] }
 0x208   : > { %v7466_v34 = vcombine.low %v1495_v63, %v1495_v63  ;;  %v1190_v27 = vmul.f32 1.442695, %v1140_v9  ;;  %v1232_v30 = vadd.f32 1.0, %v9004_v20  ;;  %v1186_v47 = vmul.f32 1.442695, %v1138_v23  ;;  %v9006_v2 = vpop.eup %9005  ;;  %8721 = vmatprep.subr.msk.bf16.mxu1 %vm2283_vm4, %v7620_v49  ;;  %v8804_v60 = vld [vmem:[#allocation2 + $0x18] sm:$0xff]  }
 0x209   : > { %1706 = vst.msk [vmem:[#allocation2 + $0x30] sm:$0xf] %vm1692_vm2, %v7467_v35  ;;  %1707 = vst.msk [vmem:[#allocation2 + $0x34] sm:$0xf] %vm1692_vm2, %v7468_v15  ;;  %v1479_v10 = vsel %vm9935_vm11, 0, %v1350_v16  ;;  %9017 = vrcp.f32 %v1227_v25  ;;  %v9990_v33 = vadd.f32 %v9860_v37, %v1062_v44  ;;  %v1230_v48 = vadd.f32 1.0, %v9006_v2  ;;  %v8333_v56 = vpop.f32.mrf.mxu1 }
 0x20a   : > { %v1192_v39 = vmul.f32 1.442695, %v1141_v13  ;;  %v7464_v46 = vcombine.low %v1479_v10, %v1479_v10  ;;  %v7465_v7 = vcombine.high %v1479_v10, %v1479_v10  ;;  %1705 = vst.msk [vmem:[#allocation2 + $0x2c] sm:$0x1] %vm1695_vm3, %v7466_v34  ;;  %9019 = vrcp.f32 %v1232_v30  ;;  %v9008_v9 = vpop.eup %9007  ;;  %v10017_v15 = vld [vmem:[#allocation2 + $0xc] sm:$0xf] }
 0x20b   : > { %v9993_v55 = vadd.f32 %v8329_v59, %v9860_v37  ;;  %v9996_v0 = vadd.f32 %v9860_v37, %v1075_v28  ;;  %9021 = vpow2.f32 %v1190_v27  ;;  %v1139_v4 = vsub.f32 0.0, %v9990_v33  ;;  %v1091_v61 = vpop.f32.mrf.mxu1 }
 0x20c   : > { %1703 = vst.msk [vmem:[#allocation2 + $0x24] sm:$0xf] %vm1692_vm2, %v7464_v46  ;;  %1704 = vst.msk [vmem:[#allocation2 + $0x28] sm:$0xf] %vm1692_vm2, %v7465_v7  ;;  %v10002_v58 = vadd.f32 %v8330_v14, %v9860_v37  ;;  %v10005_v44 = vadd.f32 %v9860_v37, %v1078_v3  ;;  %9023 = vrcp.f32 %v1230_v48  ;;  %v10010_v28 = vadd.f32 %v8333_v56, %v9860_v37 }
 0x20d   : > { %v1144_v59 = vsub.f32 0.0, %v9993_v55  ;;  %v1142_v57 = vsub.f32 0.0, %v9996_v0  ;;  %9025 = vpow2.f32 %v1186_v47  ;;  %v1188_v23 = vmul.f32 1.442695, %v1139_v4  ;;  %v8334_v34 = vpop.f32.mrf.mxu1 }
 0x20e   : > { %v1145_v13 = vsub.f32 0.0, %v10002_v58  ;;  %v1143_v35 = vsub.f32 0.0, %v10005_v44  ;;  %v1233_v63 = vadd.f32 1.0, %v9008_v9  ;;  %9027 = vpow2.f32 %v1192_v39 }
 0x20f   : > { %v9010_v16 = vpop.eup %9009  ;;  %v1198_v14 = vmul.f32 1.442695, %v1144_v59  ;;  %v1194_v20 = vmul.f32 1.442695, %v1142_v57  ;;  %9029 = vpow2.f32 %v1188_v23  ;;  %v1148_v47 = vsub.f32 0.0, %v10010_v28  ;;  %v1094_v46 = vpop.f32.mrf.mxu1 }
 0x210   : > { %v1292_v25 = vmul.f32 %v9010_v16, %v9902_v8  ;;  %v1200_v27 = vmul.f32 1.442695, %v1145_v13  ;;  %v1196_v10 = vmul.f32 1.442695, %v1143_v35  ;;  %v9012_v30 = vpop.eup %9011  ;;  %9031 = vrcp.f32 %v1233_v63 }
 0x211   : > { %v10023_v3 = vadd.f32 %v9860_v37, %v1091_v61  ;;  %v10026_v2 = vadd.f32 %v8334_v34, %v9860_v37  ;;  %v9014_v39 = vpop.eup %9013  ;;  %v1290_v7 = vmul.f32 %v9012_v30, %v9906_v53  ;;  %9033 = vpow2.f32 %v1198_v14  ;;  %v8337_v57 = vpop.f32.mrf.mxu1 }
 0x212   : > { %v10030_v8 = vadd.f32 %v9860_v37, %v1094_v46  ;;  %v1825_v48 = vshrl.u32 %v10017_v15, 16  ;;  %v1231_v56 = vadd.f32 1.0, %v9014_v39  ;;  %9035 = vpow2.f32 %v1194_v20 }
 0x213   : > { %v1206_v4 = vmul.f32 1.442695, %v1148_v47  ;;  %v1146_v59 = vsub.f32 0.0, %v10023_v3  ;;  %9037 = vpow2.f32 %v1200_v27  ;;  %v1149_v61 = vsub.f32 0.0, %v10026_v2  ;;  %v9016_v53 = vpop.eup %9015  ;;  %v1107_v13 = vpop.f32.mrf.mxu1 }
 0x214   : > { %v1147_v49 = vsub.f32 0.0, %v10030_v8  ;;  %v10037_v9 = vadd.f32 %v8337_v57, %v9860_v37  ;;  %9039 = vrcp.f32 %v1231_v56  ;;  %v10039_v35 = vrot.slane %v1825_v48, 4 }
 0x215   : > { %v1202_v23 = vmul.f32 1.442695, %v1146_v59  ;;  %v1828_v16 = vshll.u32 %v10017_v15, 16  ;;  %v1293_v63 = vmul.f32 %v9016_v53, %v9910_v36  ;;  %9041 = vpow2.f32 %v1196_v10  ;;  %v8338_v47 = vpop.f32.mrf.mxu1 }
 0x216   : > { %v1208_v14 = vmul.f32 1.442695, %v1149_v61  ;;  %v1204_v20 = vmul.f32 1.442695, %v1147_v49  ;;  %v9018_v34 = vpop.eup %9017  ;;  %9043 = vpow2.f32 %v1206_v4  ;;  %v1152_v27 = vsub.f32 0.0, %v10037_v9 }
 0x217   : > { %v10045_v30 = vadd.f32 %v9860_v37, %v1107_v13  ;;  %v10047_v46 = vrot.slane %v1828_v16, 5  ;;  %v9020_v39 = vpop.eup %9019  ;;  %v1319_v48 = vpack.c.bf16 %v1293_v63, %v1292_v25  ;;  %v1291_v56 = vmul.f32 %v9018_v34, %v9913_v45 }
 0x218   : > { %9045 = vpow2.f32 %v1202_v23  ;;  %v10051_v36 = vadd.f32 %v8338_v47, %v9860_v37  ;;  %v9022_v10 = vpop.eup %9021  ;;  %v1296_v59 = vmul.f32 %v9020_v39, %v9920_v24  ;;  %v1214_v4 = vmul.f32 1.442695, %v1152_v27  ;;  %v1110_v27 = vpop.f32.mrf.mxu1 }
 0x219   : > { %9047 = vpow2.f32 %v1208_v14  ;;  %v1150_v57 = vsub.f32 0.0, %v10045_v30  ;;  %v9024_v61 = vpop.eup %9023  ;;  %v1366_v49 = vshrl.u32 %v1319_v48, 16  ;;  %v1369_v53 = vshll.u32 %v1319_v48, 16 }
 0x21a   : > { %v1318_v13 = vpack.c.bf16 %v1291_v56, %v1290_v7  ;;  %v1236_v16 = vadd.f32 1.0, %v9022_v10  ;;  %v9026_v51 = vpop.eup %9025  ;;  %v10056_v25 = vmul.f32 %v9024_v61, %v9926_v5  ;;  %9049 = vpow2.f32 %v1204_v20 }
 0x21b   : > { %v10058_v45 = vmul.f32 1.442695, %v1150_v57  ;;  %v1153_v23 = vsub.f32 0.0, %v10051_v36  ;;  %v9028_v63 = vpop.eup %9027  ;;  %v1368_v24 = vrot.slane %v1366_v49, 7  ;;  %v1234_v39 = vadd.f32 1.0, %v9026_v51 }
 0x21c   : > { %v1359_v14 = vshrl.u32 %v1318_v13, 16  ;;  %v1362_v34 = vshll.u32 %v1318_v13, 16  ;;  %9051 = vrcp.f32 %v1236_v16  ;;  %v9030_v47 = vpop.eup %9029  ;;  %v1237_v48 = vadd.f32 1.0, %v9028_v63 }
 0x21d   : > { %9053 = vpow2.f32 %v1214_v4  ;;  %v10061_v7 = vmul.f32 1.442695, %v1153_v23  ;;  %v9032_v56 = vpop.eup %9031  ;;  %v1371_v5 = vor.u32 %v1369_v53, %v1368_v24  ;;  %v1498_v20 = vsel %vm9935_vm11, %v1368_v24, 0 }
 0x21e   : > { %v1361_v10 = vrot.slane %v1359_v14, 7  ;;  %v1235_v57 = vadd.f32 1.0, %v9030_v47  ;;  %v9034_v61 = vpop.eup %9033  ;;  %v7475_v38 = vcombine.low %v1498_v20, %v1498_v20  ;;  %v1297_v49 = vmul.f32 %v9032_v56, %v9941_v12  ;;  %v10079_v20 = vld [vmem:[#allocation2 + $0x10] sm:$0xf] }
 0x21f   : > { %9055 = vrcp.f32 %v1234_v39  ;;  %v10067_v13 = vadd.f32 %v9860_v37, %v1110_v27  ;;  %v9036_v51 = vpop.eup %9035  ;;  %v1482_v4 = vsel %vm9935_vm11, 0, %v1371_v5  ;;  %v1240_v27 = vadd.f32 1.0, %v9034_v61 }
 0x220   : > { %v1364_v16 = vor.u32 %v1362_v34, %v1361_v10  ;;  %v1497_v53 = vsel %vm9935_vm11, %v1361_v10, 0  ;;  %9057 = vrcp.f32 %v1237_v48  ;;  %v9038_v23 = vpop.eup %9037  ;;  %v7473_v63 = vcombine.low %v1482_v4, %v1482_v4  ;;  %1714 = vst.msk [vmem:[#allocation2 + $0x50] sm:$0x1] %vm1695_vm3, %v7475_v38 }
 0x221   : > { %v7474_v24 = vcombine.high %v1482_v4, %v1482_v4  ;;  %v7472_v14 = vcombine.low %v1497_v53, %v1497_v53  ;;  %v1321_v12 = vpack.c.bf16 %v1297_v49, %v1296_v59  ;;  %v9040_v47 = vpop.eup %9039  ;;  %9059 = vrcp.f32 %v1235_v57 }
 0x222   : > { %v1481_v37 = vsel %vm9935_vm11, 0, %v1364_v16  ;;  %v1238_v39 = vadd.f32 1.0, %v9036_v51  ;;  %v9042_v56 = vpop.eup %9041  ;;  %1712 = vst.msk [vmem:[#allocation2 + $0x48] sm:$0xf] %vm1692_vm2, %v7473_v63  ;;  %v1295_v10 = vmul.f32 %v9040_v47, %v9946_v22  ;;  %9061 = vrcp.f32 %v1240_v27 }
 0x223   : > { %1713 = vst.msk [vmem:[#allocation2 + $0x4c] sm:$0xf] %vm1692_vm2, %v7474_v24  ;;  %v7470_v34 = vcombine.low %v1481_v37, %v1481_v37  ;;  %v7471_v48 = vcombine.high %v1481_v37, %v1481_v37  ;;  %v1380_v5 = vshrl.u32 %v1321_v12, 16  ;;  %v1383_v38 = vshll.u32 %v1321_v12, 16  ;;  %v9044_v59 = vpop.eup %9043 }
 0x224   : > { %1711 = vst.msk [vmem:[#allocation2 + $0x44] sm:$0x1] %vm1695_vm3, %v7472_v14  ;;  %v1241_v57 = vadd.f32 1.0, %v9038_v23  ;;  %v1239_v61 = vadd.f32 1.0, %v9042_v56  ;;  %9063 = vrcp.f32 %v1238_v39  ;;  %v1244_v4 = vadd.f32 1.0, %v9044_v59 }
 0x225   : > { %v9046_v49 = vpop.eup %9045  ;;  %1709 = vst.msk [vmem:[#allocation2 + $0x3c] sm:$0xf] %vm1692_vm2, %v7470_v34  ;;  %1710 = vst.msk [vmem:[#allocation2 + $0x40] sm:$0xf] %vm1692_vm2, %v7471_v48  ;;  %v1382_v51 = vrot.slane %v1380_v5, 7  ;;  %v1151_v16 = vsub.f32 0.0, %v10067_v13  ;;  %v1320_v63 = vpack.c.bf16 %v1295_v10, %v10056_v25 }
 0x226   : > { %v9048_v53 = vpop.eup %9047  ;;  %9065 = vrcp.f32 %v1241_v57  ;;  %v1242_v24 = vadd.f32 1.0, %v9046_v49  ;;  %v1838_v22 = vshrl.u32 %v10079_v20, 16  ;;  %v1752_v56 = vld [vmem:[#allocation2 + $0x18] sm:$0xf] }
 0x227   : > { %v1385_v14 = vor.u32 %v1383_v38, %v1382_v51  ;;  %v1500_v23 = vsel %vm9935_vm11, %v1382_v51, 0  ;;  %9067 = vrcp.f32 %v1239_v61  ;;  %v1245_v12 = vadd.f32 1.0, %v9048_v53  ;;  %v9050_v47 = vpop.eup %9049 }
 0x228   : > { %v7481_v37 = vcombine.low %v1500_v23, %v1500_v23  ;;  %v1373_v27 = vshrl.u32 %v1320_v63, 16  ;;  %v1376_v39 = vshll.u32 %v1320_v63, 16  ;;  %9069 = vrcp.f32 %v1244_v4 }
 0x229   : > { %v9052_v34 = vpop.eup %9051  ;;  %v1484_v25 = vsel %vm9935_vm11, 0, %v1385_v14  ;;  %9071 = vrcp.f32 %v1242_v24  ;;  %v1243_v48 = vadd.f32 1.0, %v9050_v47  ;;  %v1212_v5 = vmul.f32 1.442695, %v1151_v16  ;;  %v10099_v24 = vld [vmem:[#allocation2 + $0x1c] sm:$0xf] }
 0x22a   : > { %v9054_v59 = vpop.eup %9053  ;;  %v7479_v38 = vcombine.low %v1484_v25, %v1484_v25  ;;  %v7480_v10 = vcombine.high %v1484_v25, %v1484_v25  ;;  %1720 = vst.msk [vmem:[#allocation2 + $0x68] sm:$0x1] %vm1695_vm3, %v7481_v37  ;;  %v1375_v57 = vrot.slane %v1373_v27, 7  ;;  %v1300_v61 = vmul.f32 %v9052_v34, %v9966_v32  ;;  %v1754_v32 = vld [vmem:[#allocation2 + $0x24] sm:$0xf]  ;;  %v8823_v54 = vld [vmem:[#allocation2 + $0x48] sm:$0xff]  }
 0x22b   : > { %9073 = vrcp.f32 %v1245_v12  ;;  %v1248_v49 = vadd.f32 1.0, %v9054_v59  ;;  %v7540_v51 = vcombine.low %v10017_v15, %v10079_v20  ;;  %v1849_v4 = vshrl.u32 %v1752_v56, 16  ;;  %v10111_v34 = vld [vmem:[#allocation2 + $0x28] sm:$0xf] }
 0x22c   : > { %v9056_v53 = vpop.eup %9055  ;;  %1718 = vst.msk [vmem:[#allocation2 + $0x60] sm:$0xf] %vm1692_vm2, %v7479_v38  ;;  %1719 = vst.msk [vmem:[#allocation2 + $0x64] sm:$0xf] %vm1692_vm2, %v7480_v10  ;;  %v1378_v16 = vor.u32 %v1376_v39, %v1375_v57  ;;  %v1499_v63 = vsel %vm9935_vm11, %v1375_v57, 0  ;;  %9075 = vrcp.f32 %v1243_v48  ;;  %v1852_v14 = vshll.u32 %v1752_v56, 16 }
 0x22d   : > { %v9058_v23 = vpop.eup %9057  ;;  %v7478_v12 = vcombine.low %v1499_v63, %v1499_v63  ;;  %v1298_v47 = vmul.f32 %v9056_v53, %v9969_v52  ;;  %9077 = vrcp.f32 %v1248_v49  ;;  %8376 = vmatmul.mubr.msk.bf16.vlgmr.msra.gmra.mxu1 %vm2234_vm5, %v7540_v51  ;;  %v10103_v15 = vrot.slane %v1849_v4, 4 }
 0x22e   : > { %v1483_v37 = vsel %vm9935_vm11, 0, %v1378_v16  ;;  %v1301_v27 = vmul.f32 %v9058_v23, %v9974_v62  ;;  %9079 = vpow2.f32 %v10058_v45  ;;  %v10109_v39 = vrot.slane %v1852_v14, 5  ;;  %v9060_v25 = vpop.eup %9059 }
 0x22f   : > { %v7476_v48 = vcombine.low %v1483_v37, %v1483_v37  ;;  %v7477_v59 = vcombine.high %v1483_v37, %v1483_v37  ;;  %1717 = vst.msk [vmem:[#allocation2 + $0x5c] sm:$0x1] %vm1695_vm3, %v7478_v12  ;;  %9081 = vpow2.f32 %v10061_v7  ;;  %v1862_v52 = vshrl.u32 %v10099_v24, 16  ;;  %v9062_v45 = vpop.eup %9061 }
 0x230   : > { %v1323_v38 = vpack.c.bf16 %v1301_v27, %v1300_v61  ;;  %v1299_v10 = vmul.f32 %v9060_v25, %v9990_v33  ;;  %9083 = vpow2.f32 %v1212_v5  ;;  %v7541_v62 = vcombine.low %v1752_v56, %v10099_v24 }
 0x231   : > { %1715 = vst.msk [vmem:[#allocation2 + $0x54] sm:$0xf] %vm1692_vm2, %v7476_v48  ;;  %1716 = vst.msk [vmem:[#allocation2 + $0x58] sm:$0xf] %vm1692_vm2, %v7477_v59  ;;  %v1873_v57 = vshrl.u32 %v1754_v32, 16  ;;  %v1876_v49 = vshll.u32 %v1754_v32, 16  ;;  %v7542_v4 = vcombine.low %v1754_v32, %v10111_v34  ;;  %v9064_v7 = vpop.eup %9063  ;;  %v1304_v33 = vmul.f32 %v9062_v45, %v9993_v55 }
 0x232   : > { %v1886_v51 = vshrl.u32 %v10111_v34, 16  ;;  %v1394_v53 = vshrl.u32 %v1323_v38, 16  ;;  %v1397_v16 = vshll.u32 %v1323_v38, 16  ;;  %v1322_v61 = vpack.c.bf16 %v1299_v10, %v1298_v47  ;;  %8379 = vmatprep.mubr.msk.bf16.mxu1 %vm2234_vm5, %v7541_v62 }
 0x233   : > { %v9066_v56 = vpop.eup %9065  ;;  %v1302_v5 = vmul.f32 %v9064_v7, %v9996_v0  ;;  %v10125_v63 = vrot.slane %v1873_v57, 4  ;;  %v10127_v14 = vrot.slane %v1876_v49, 5  ;;  %v1831_v23 = vor.u32 %v10047_v46, %v10039_v35 }
 0x234   : > { %v9068_v12 = vpop.eup %9067  ;;  %v1396_v32 = vrot.slane %v1394_v53, 7  ;;  %v1387_v37 = vshrl.u32 %v1322_v61, 16  ;;  %v1390_v27 = vshll.u32 %v1322_v61, 16  ;;  %v1305_v47 = vmul.f32 %v9066_v56, %v10002_v58 }
 0x235   : > { %v9070_v25 = vpop.eup %9069  ;;  %v1303_v55 = vmul.f32 %v9068_v12, %v10005_v44  ;;  %8380 = vmatmul.mubr.msk.bf16.gmra.mxu1 %vm2234_vm5, %v7542_v4  ;;  %v10134_v48 = vrot.slane %v1831_v23, 4  ;;  %v1834_v0 = vshll.u32 %v10079_v20, 16  ;;  %v10139_v59 = vrot.slane %v1838_v22, 4 }
 0x236   : > { %v9072_v35 = vpop.eup %9071  ;;  %v1399_v46 = vor.u32 %v1397_v16, %v1396_v32  ;;  %v1502_v38 = vsel %vm9935_vm11, %v1396_v32, 0  ;;  %v1389_v10 = vrot.slane %v1387_v37, 7  ;;  %v1325_v58 = vpack.c.bf16 %v1305_v47, %v1304_v33 }
 0x237   : > { %v7487_v62 = vcombine.low %v1502_v38, %v1502_v38  ;;  %v1324_v45 = vpack.c.bf16 %v1303_v55, %v1302_v5  ;;  %v1308_v44 = vmul.f32 %v9070_v25, %v10010_v28  ;;  %v1306_v57 = vmul.f32 %v9072_v35, %v10023_v3 }
 0x238   : > { %v9074_v49 = vpop.eup %9073  ;;  %v1486_v4 = vsel %vm9935_vm11, 0, %v1399_v46  ;;  %v1392_v7 = vor.u32 %v1390_v27, %v1389_v10  ;;  %v1501_v22 = vsel %vm9935_vm11, %v1389_v10, 0  ;;  %v1408_v53 = vshrl.u32 %v1325_v58, 16  ;;  %v8824_v18 = vld [vmem:[#allocation2 + $0x54] sm:$0xff]  }
 0x239   : > { %v9076_v16 = vpop.eup %9075  ;;  %v7485_v61 = vcombine.low %v1486_v4, %v1486_v4  ;;  %v7486_v56 = vcombine.high %v1486_v4, %v1486_v4  ;;  %1726 = vst.msk [vmem:[#allocation2 + $0x80] sm:$0x1] %vm1695_vm3, %v7487_v62  ;;  %v7484_v33 = vcombine.low %v1501_v22, %v1501_v22  ;;  %v1411_v5 = vshll.u32 %v1325_v58, 16 }
 0x23a   : > { %v9078_v23 = vpop.eup %9077  ;;  %v1485_v28 = vsel %vm9935_vm11, 0, %v1392_v7  ;;  %v1410_v3 = vrot.slane %v1408_v53, 7  ;;  %v1401_v12 = vshrl.u32 %v1324_v45, 16  ;;  %v1404_v32 = vshll.u32 %v1324_v45, 16 }
 0x23b   : > { %v9080_v37 = vpop.eup %9079  ;;  %1724 = vst.msk [vmem:[#allocation2 + $0x78] sm:$0xf] %vm1692_vm2, %v7485_v61  ;;  %1725 = vst.msk [vmem:[#allocation2 + $0x7c] sm:$0xf] %vm1692_vm2, %v7486_v56  ;;  %v7482_v27 = vcombine.low %v1485_v28, %v1485_v28  ;;  %v7483_v47 = vcombine.high %v1485_v28, %v1485_v28  ;;  %v1309_v25 = vmul.f32 %v9074_v49, %v10026_v2  ;;  %v1756_v28 = vld [vmem:[#allocation2 + $0x30] sm:$0xf] }
 0x23c   : > { %1723 = vst.msk [vmem:[#allocation2 + $0x74] sm:$0x1] %vm1695_vm3, %v7484_v33  ;;  %v1307_v55 = vmul.f32 %v9076_v16, %v10030_v8  ;;  %v9082_v35 = vpop.eup %9081  ;;  %v1413_v46 = vor.u32 %v1411_v5, %v1410_v3  ;;  %v1504_v38 = vsel %vm9935_vm11, %v1410_v3, 0  ;;  %v1403_v10 = vrot.slane %v1401_v12, 7  ;;  %v10169_v33 = vld [vmem:[#allocation2 + $0x14] sm:$0x1] }
 0x23d   : > { %v10160_v58 = vmul.f32 %v9078_v23, %v10037_v9  ;;  %v9084_v62 = vpop.eup %9083  ;;  %1721 = vst.msk [vmem:[#allocation2 + $0x6c] sm:$0xf] %vm1692_vm2, %v7482_v27  ;;  %1722 = vst.msk [vmem:[#allocation2 + $0x70] sm:$0xf] %vm1692_vm2, %v7483_v47  ;;  %v7493_v45 = vcombine.low %v1504_v38, %v1504_v38  ;;  %v1327_v4 = vpack.c.bf16 %v1309_v25, %v1308_v44  ;;  %v1246_v2 = vadd.f32 1.0, %v9080_v37 }
 0x23e   : > { %v1326_v7 = vpack.c.bf16 %v1307_v55, %v1306_v57  ;;  %v1488_v8 = vsel %vm9935_vm11, 0, %v1413_v46  ;;  %v1406_v49 = vor.u32 %v1404_v32, %v1403_v10  ;;  %v1503_v22 = vsel %vm9935_vm11, %v1403_v10, 0 }
 0x23f   : > { %v1249_v53 = vadd.f32 1.0, %v9082_v35  ;;  %v7491_v16 = vcombine.low %v1488_v8, %v1488_v8  ;;  %v7492_v9 = vcombine.high %v1488_v8, %v1488_v8  ;;  %1732 = vst.msk [vmem:[#allocation2 + $0x98] sm:$0x1] %vm1695_vm3, %v7493_v45  ;;  %v7490_v61 = vcombine.low %v1503_v22, %v1503_v22 }
 0x240   : > { %v1422_v56 = vshrl.u32 %v1327_v4, 16  ;;  %v1487_v44 = vsel %vm9935_vm11, 0, %v1406_v49  ;;  %v1425_v57 = vshll.u32 %v1327_v4, 16  ;;  %v1415_v5 = vshrl.u32 %v1326_v7, 16 }
 0x241   : > { %v1418_v23 = vshll.u32 %v1326_v7, 16  ;;  %1730 = vst.msk [vmem:[#allocation2 + $0x90] sm:$0xf] %vm1692_vm2, %v7491_v16  ;;  %1731 = vst.msk [vmem:[#allocation2 + $0x94] sm:$0xf] %vm1692_vm2, %v7492_v9  ;;  %v7488_v3 = vcombine.low %v1487_v44, %v1487_v44  ;;  %v7489_v12 = vcombine.high %v1487_v44, %v1487_v44  ;;  %9085 = vrcp.f32 %v1246_v2 }
 0x242   : > { %1729 = vst.msk [vmem:[#allocation2 + $0x8c] sm:$0x1] %vm1695_vm3, %v7490_v61  ;;  %v1424_v32 = vrot.slane %v1422_v56, 7  ;;  %v1417_v37 = vrot.slane %v1415_v5, 7  ;;  %9087 = vrcp.f32 %v1249_v53  ;;  %v1247_v27 = vadd.f32 1.0, %v9084_v62 }
 0x243   : > { %v1836_v47 = vrot.slane %v1834_v0, 5  ;;  %1727 = vst.msk [vmem:[#allocation2 + $0x84] sm:$0xf] %vm1692_vm2, %v7488_v3  ;;  %1728 = vst.msk [vmem:[#allocation2 + $0x88] sm:$0xf] %vm1692_vm2, %v7489_v12  ;;  %v1844_v35 = vshll.u32 %v10169_v33, 16  ;;  %v1855_v5 = vor.u32 %v10109_v39, %v10103_v15 }
 0x244   : > { %v1427_v25 = vor.u32 %v1425_v57, %v1424_v32  ;;  %v1506_v55 = vsel %vm9935_vm11, %v1424_v32, 0  ;;  %v1897_v46 = vshrl.u32 %v1756_v28, 16  ;;  %v1420_v10 = vor.u32 %v1418_v23, %v1417_v37  ;;  %v10185_v62 = vld [vmem:[#allocation2 + $0x20] sm:$0x1]  ;;  %v10193_v2 = vld [vmem:[#allocation2 + $0x34] sm:$0xf] }
 0x245   : > { %v7499_v38 = vcombine.low %v1506_v55, %v1506_v55  ;;  %v1505_v45 = vsel %vm9935_vm11, %v1417_v37, 0  ;;  %9089 = vrcp.f32 %v1247_v27  ;;  %v1837_v4 = vsel %vm9848_vm8, %v10134_v48, %v1836_v47  ;;  %v1758_v16 = vld [vmem:[#allocation2 + $0x3c] sm:$0xf]  ;;  %v10207_v23 = vld [vmem:[#allocation2 + $0x40] sm:$0xf] }
 0x246   : > { %v1490_v20 = vsel %vm9935_vm11, 0, %v1427_v25  ;;  %v7496_v0 = vcombine.low %v1505_v45, %v1505_v45  ;;  %v1841_v7 = vor.u32 %v10139_v59, %v1836_v47  ;;  %v1489_v22 = vsel %vm9935_vm11, 0, %v1420_v10  ;;  %v10222_v15 = vld [vmem:[%s12838_s5 + $0x8] sm:$0x3] }
 0x247   : > { %v7497_v8 = vcombine.low %v1490_v20, %v1490_v20  ;;  %v7498_v49 = vcombine.high %v1490_v20, %v1490_v20  ;;  %1738 = vst.msk [vmem:[#allocation2 + $0xb0] sm:$0x1] %vm1695_vm3, %v7499_v38  ;;  %v1846_v53 = vrot.slane %v1844_v35, 5  ;;  %v7494_v9 = vcombine.low %v1489_v22, %v1489_v22  ;;  %v1760_v55 = vld [vmem:[#allocation2 + $0x48] sm:$0xf] }
 0x248   : > { %v7495_v61 = vcombine.high %v1489_v22, %v1489_v22  ;;  %1735 = vst.msk [vmem:[#allocation2 + $0xa4] sm:$0x1] %vm1695_vm3, %v7496_v0  ;;  %v1842_v56 = vrot.slane %v1841_v7, 4  ;;  %v10199_v44 = vrot.slane %v1897_v46, 4  ;;  %v1900_v48 = vshll.u32 %v1756_v28, 16 }
 0x249   : > { %1736 = vst.msk [vmem:[#allocation2 + $0xa8] sm:$0xf] %vm1692_vm2, %v7497_v8  ;;  %1737 = vst.msk [vmem:[#allocation2 + $0xac] sm:$0xf] %vm1692_vm2, %v7498_v49  ;;  %v1910_v59 = vshrl.u32 %v10193_v2, 16  ;;  %v7543_v57 = vcombine.low %v1756_v28, %v10193_v2  ;;  %v1858_v12 = vshll.u32 %v10099_v24, 16  ;;  %v7544_v45 = vcombine.low %v1758_v16, %v10207_v23 }
 0x24a   : > { %1733 = vst.msk [vmem:[#allocation2 + $0x9c] sm:$0xf] %vm1692_vm2, %v7494_v9  ;;  %1734 = vst.msk [vmem:[#allocation2 + $0xa0] sm:$0xf] %vm1692_vm2, %v7495_v61  ;;  %v1847_v3 = vsel %vm9848_vm8, %v1842_v56, %v1846_v53  ;;  %v1864_v32 = vrot.slane %v1862_v52, 4  ;;  %v1868_v37 = vshll.u32 %v10185_v62, 16  ;;  %v1879_v20 = vor.u32 %v10127_v14, %v10125_v63 }
 0x24b   : > { %v10217_v28 = vld [vmem:[#allocation2 + $0x2c] sm:$0x1]  ;;  %v7508_v39 = vcombine.low %v1837_v4, %v1847_v3  ;;  %v1902_v27 = vrot.slane %v1900_v48, 5  ;;  %8383 = vmatprep.mubr.msk.bf16.mxu1 %vm2234_vm5, %v7543_v57  ;;  %v1856_v47 = vrot.slane %v1855_v5, 4  ;;  %v1921_v25 = vshrl.u32 %v1758_v16, 16 }
 0x24c   : > { %v1860_v35 = vrot.slane %v1858_v12, 5  ;;  %v1870_v46 = vrot.slane %v1868_v37, 5  ;;  %v1924_v24 = vshll.u32 %v1758_v16, 16  ;;  %v1934_v52 = vshrl.u32 %v10207_v23, 16  ;;  %v10226_v38 = vld [vmem:[#allocation2 + $0x4c] sm:$0xf]  ;;  %8384 = vmatmul.mubr.msk.bf16.gmra.mxu1 %vm2234_vm5, %v7544_v45 }
 0x24d   : > { %8342 = vmatmul.mubr.msk.bf16.vlgmr.msra.gmra.mxu0 %vm2234_vm5, %v7508_v39  ;;  %v10229_v10 = vrot.slane %v1921_v25, 4  ;;  %v1882_v0 = vshll.u32 %v10111_v34, 16  ;;  %v1888_v49 = vrot.slane %v1886_v51, 4  ;;  %v1880_v53 = vrot.slane %v1879_v20, 4  ;;  %v10251_v3 = vld [vmem:[#allocation2 + $0x38] sm:$0x1] }
 0x24e   : > { %8408 = vmatpush3.bf16.msra.mxu0 %v9930_v17  ;;  %v1861_v4 = vsel %vm9848_vm8, %v1856_v47, %v1860_v35  ;;  %v1865_v7 = vor.u32 %v1864_v32, %v1860_v35  ;;  %v10238_v8 = vrot.slane %v1924_v24, 5  ;;  %v9086_v22 = vpop.eup %9085  ;;  %v1892_v63 = vshll.u32 %v10217_v28, 16  ;;  %v1762_v24 = vld [vmem:[#allocation2 + $0x54] sm:$0xf] }
 0x24f   : > { %v1884_v16 = vrot.slane %v1882_v0, 5  ;;  %v1945_v14 = vshrl.u32 %v1760_v55, 16  ;;  %8722 = vmatprep.subr.msk.bf16.mxu0 %vm2283_vm4, %v10222_v15  ;;  %v9088_v17 = vpop.eup %9087  ;;  %v1310_v9 = vmul.f32 %v9086_v22, %v10045_v30  ;;  %v1948_v56 = vshll.u32 %v1760_v55, 16 }
 0x250   : > { %v1866_v61 = vrot.slane %v1865_v7, 4  ;;  %v1958_v48 = vshrl.u32 %v10226_v38, 16  ;;  %v1313_v34 = vmul.f32 %v9088_v17, %v10051_v36  ;;  %v1894_v5 = vrot.slane %v1892_v63, 5 }
 0x251   : > { %v1885_v51 = vsel %vm9848_vm8, %v1880_v53, %v1884_v16  ;;  %v1889_v57 = vor.u32 %v1888_v49, %v1884_v16  ;;  %v10255_v37 = vrot.slane %v1945_v14, 4  ;;  %v10257_v30 = vrot.slane %v1948_v56, 5 }
 0x252   : > { %v9090_v12 = vpop.eup %9089  ;;  %v1871_v32 = vsel %vm9848_vm8, %v1866_v61, %v1870_v46  ;;  %v7545_v39 = vcombine.low %v1760_v55, %v10226_v38  ;;  %v1329_v47 = vpack.c.bf16 %v1313_v34, %v10160_v58  ;;  %v1903_v45 = vor.u32 %v1902_v27, %v10199_v44  ;;  %v10269_v58 = vld [vmem:[#allocation2 + $0x58] sm:$0xf] }
 0x253   : > { %v1311_v36 = vmul.f32 %v9090_v12, %v10067_v13  ;;  %v7509_v25 = vcombine.low %v1861_v4, %v1871_v32  ;;  %v1890_v35 = vrot.slane %v1889_v57, 4  ;;  %v1906_v20 = vshll.u32 %v10193_v2, 16 }
 0x254   : > { %8387 = vmatprep.mubr.msk.bf16.mxu1 %vm2234_vm5, %v7545_v39  ;;  %v1912_v46 = vrot.slane %v1910_v59, 4  ;;  %v1916_v0 = vshll.u32 %v10251_v3, 16  ;;  %v1436_v7 = vshrl.u32 %v1329_v47, 16  ;;  %v1439_v49 = vshll.u32 %v1329_v47, 16 }
 0x255   : > { %v1328_v22 = vpack.c.bf16 %v1311_v36, %v1310_v9  ;;  %8345 = vmatprep.mubr.msk.bf16.mxu0 %vm2234_vm5, %v7509_v25  ;;  %v1895_v13 = vsel %vm9848_vm8, %v1890_v35, %v1894_v5  ;;  %v1904_v4 = vrot.slane %v1903_v45, 4  ;;  %v1908_v53 = vrot.slane %v1906_v20, 5  ;;  %v10286_v35 = vld [vmem:[#allocation2 + $0x44] sm:$0x1] }
 0x256   : > { %v7510_v55 = vcombine.low %v1885_v51, %v1895_v13  ;;  %v1918_v16 = vrot.slane %v1916_v0, 5  ;;  %v1438_v44 = vrot.slane %v1436_v7, 7  ;;  %v1969_v59 = vshrl.u32 %v1762_v24, 16  ;;  %v1764_v7 = vld [vmem:[#allocation2 + $0x60] sm:$0xf] }
 0x257   : > { %v1429_v27 = vshrl.u32 %v1328_v22, 16  ;;  %v1432_v63 = vshll.u32 %v1328_v22, 16  ;;  %v1909_v14 = vsel %vm9848_vm8, %v1904_v4, %v1908_v53  ;;  %v1913_v17 = vor.u32 %v1912_v46, %v1908_v53 }
 0x258   : > { %8346 = vmatmul.mubr.msk.bf16.gmra.mxu0 %vm2234_vm5, %v7510_v55  ;;  %v1972_v9 = vshll.u32 %v1762_v24, 16  ;;  %v1982_v61 = vshrl.u32 %v10269_v58, 16  ;;  %v1441_v56 = vor.u32 %v1439_v49, %v1438_v44  ;;  %v1508_v34 = vsel %vm9935_vm11, %v1438_v44, 0  ;;  %v10294_v49 = vld [vmem:[#allocation2 + $0x64] sm:$0xf] }
 0x259   : > { %v1431_v51 = vrot.slane %v1429_v27, 7  ;;  %v10277_v57 = vrot.slane %v1969_v59, 4  ;;  %v7505_v5 = vcombine.low %v1508_v34, %v1508_v34  ;;  %v1914_v12 = vrot.slane %v1913_v17, 4  ;;  %v10307_v59 = vld [vmem:[#allocation2 + $0x50] sm:$0x1] }
 0x25a   : > { %v10279_v32 = vrot.slane %v1972_v9, 5  ;;  %v7546_v39 = vcombine.low %v1762_v24, %v10269_v58  ;;  %v1492_v47 = vsel %vm9935_vm11, 0, %v1441_v56  ;;  %v1927_v45 = vor.u32 %v10238_v8, %v10229_v10  ;;  %v1766_v56 = vld [vmem:[#allocation2 + $0x6c] sm:$0xf]  ;;  %v10315_v34 = vld [vmem:[#allocation2 + $0x70] sm:$0xf] }
 0x25b   : > { %v1434_v36 = vor.u32 %v1432_v63, %v1431_v51  ;;  %v1507_v25 = vsel %vm9935_vm11, %v1431_v51, 0  ;;  %v7503_v20 = vcombine.low %v1492_v47, %v1492_v47  ;;  %v7504_v46 = vcombine.high %v1492_v47, %v1492_v47  ;;  %1744 = vst.msk [vmem:[#allocation2 + $0xc8] sm:$0x1] %vm1695_vm3, %v7505_v5 }
 0x25c   : > { %v7502_v0 = vcombine.low %v1507_v25, %v1507_v25  ;;  %v1919_v24 = vsel %vm9848_vm8, %v1914_v12, %v1918_v16  ;;  %8388 = vmatmul.mubr.msk.bf16.gmra.mxu1 %vm2234_vm5, %v7546_v39  ;;  %v1928_v55 = vrot.slane %v1927_v45, 4  ;;  %v1930_v10 = vshll.u32 %v10207_v23, 16 }
 0x25d   : > { %v1491_v22 = vsel %vm9935_vm11, 0, %v1434_v36  ;;  %v7511_v13 = vcombine.low %v1909_v14, %v1919_v24  ;;  %1742 = vst.msk [vmem:[#allocation2 + $0xc0] sm:$0xf] %vm1692_vm2, %v7503_v20  ;;  %1743 = vst.msk [vmem:[#allocation2 + $0xc4] sm:$0xf] %vm1692_vm2, %v7504_v46  ;;  %v1936_v53 = vrot.slane %v1934_v52, 4  ;;  %v7547_v17 = vcombine.low %v1764_v7, %v10294_v49 }
 0x25e   : > { %v7500_v8 = vcombine.low %v1491_v22, %v1491_v22  ;;  %v7501_v4 = vcombine.high %v1491_v22, %v1491_v22  ;;  %1741 = vst.msk [vmem:[#allocation2 + $0xbc] sm:$0x1] %vm1695_vm3, %v7502_v0  ;;  %v1940_v16 = vshll.u32 %v10286_v35, 16  ;;  %v1932_v50 = vrot.slane %v1930_v10, 5 }
 0x25f   : > { %8349 = vmatprep.mubr.msk.bf16.mxu0 %vm2234_vm5, %v7511_v13  ;;  %v1993_v44 = vshrl.u32 %v1764_v7, 16  ;;  %v1996_v27 = vshll.u32 %v1764_v7, 16  ;;  %v2006_v63 = vshrl.u32 %v10294_v49, 16  ;;  %v1951_v52 = vor.u32 %v10257_v30, %v10255_v37  ;;  %8391 = vmatprep.mubr.msk.bf16.mxu1 %vm2234_vm5, %v7547_v17  ;;  %v10327_v13 = vld [vmem:[#allocation2 + $0x5c] sm:$0x1] }
 0x260   : > { %1739 = vst.msk [vmem:[#allocation2 + $0xb4] sm:$0xf] %vm1692_vm2, %v7500_v8  ;;  %1740 = vst.msk [vmem:[#allocation2 + $0xb8] sm:$0xf] %vm1692_vm2, %v7501_v4  ;;  %v1942_v14 = vrot.slane %v1940_v16, 5  ;;  %v1954_v9 = vshll.u32 %v10226_v38, 16  ;;  %v1933_v51 = vsel %vm9848_vm8, %v1928_v55, %v1932_v50  ;;  %v1937_v5 = vor.u32 %v1936_v53, %v1932_v50 }
 0x261   : > { %v1995_v12 = vrot.slane %v1993_v44, 4  ;;  %v1998_v39 = vrot.slane %v1996_v27, 5  ;;  %v1952_v47 = vrot.slane %v1951_v52, 4  ;;  %v1960_v25 = vrot.slane %v1958_v48, 4  ;;  %v1768_v55 = vld [vmem:[#allocation2 + $0x78] sm:$0xf] }
 0x262   : > { %v1956_v36 = vrot.slane %v1954_v9, 5  ;;  %v1964_v37 = vshll.u32 %v10307_v59, 16  ;;  %v1938_v30 = vrot.slane %v1937_v5, 4  ;;  %v2017_v45 = vshrl.u32 %v1766_v56, 16  ;;  %v10333_v53 = vld [vmem:[#allocation2 + $0x7c] sm:$0xf] }
 0x263   : > { %v2020_v20 = vshll.u32 %v1766_v56, 16  ;;  %v2030_v46 = vshrl.u32 %v10315_v34, 16  ;;  %v7548_v22 = vcombine.low %v1766_v56, %v10315_v34  ;;  %v1975_v4 = vor.u32 %v10279_v32, %v10277_v57  ;;  %v10339_v17 = vld [vmem:[#allocation2 + $0x68] sm:$0x1]  ;;  %v1770_v5 = vld [vmem:[#allocation2 + $0x84] sm:$0xf] }
 0x264   : > { %v1957_v0 = vsel %vm9848_vm8, %v1952_v47, %v1956_v36  ;;  %v1961_v24 = vor.u32 %v1960_v25, %v1956_v36  ;;  %v1966_v7 = vrot.slane %v1964_v37, 5  ;;  %v1943_v48 = vsel %vm9848_vm8, %v1938_v30, %v1942_v14  ;;  %v10347_v36 = vld [vmem:[#allocation2 + $0x88] sm:$0xf] }
 0x265   : > { %v2019_v10 = vrot.slane %v2017_v45, 4  ;;  %v2022_v8 = vrot.slane %v2020_v20, 5  ;;  %v7512_v16 = vcombine.low %v1933_v51, %v1943_v48  ;;  %8392 = vmatmul.mubr.msk.bf16.gmra.mxu1 %vm2234_vm5, %v7548_v22  ;;  %v1978_v44 = vshll.u32 %v10269_v58, 16 }
 0x266   : > { %v1962_v50 = vrot.slane %v1961_v24, 4  ;;  %v1984_v27 = vrot.slane %v1982_v61, 4  ;;  %v1976_v52 = vrot.slane %v1975_v4, 4  ;;  %v1988_v14 = vshll.u32 %v10327_v13, 16 }
 0x267   : > { %v2041_v9 = vshrl.u32 %v1768_v55, 16  ;;  %v2044_v56 = vshll.u32 %v1768_v55, 16  ;;  %8350 = vmatmul.mubr.msk.bf16.gmra.mxu0 %vm2234_vm5, %v7512_v16  ;;  %v1980_v32 = vrot.slane %v1978_v44, 5  ;;  %v2054_v51 = vshrl.u32 %v10333_v53, 16 }
 0x268   : > { %v1967_v57 = vsel %vm9848_vm8, %v1962_v50, %v1966_v7  ;;  %v7549_v47 = vcombine.low %v1768_v55, %v10333_v53  ;;  %v1990_v25 = vrot.slane %v1988_v14, 5  ;;  %v1999_v24 = vor.u32 %v1998_v39, %v1995_v12  ;;  %v10356_v14 = vld [vmem:[#allocation2 + $0x74] sm:$0x1]  ;;  %v1772_v39 = vld [vmem:[#allocation2 + $0x90] sm:$0xf] }
 0x269   : > { %v7513_v61 = vcombine.low %v1957_v0, %v1967_v57  ;;  %v2043_v37 = vrot.slane %v2041_v9, 4  ;;  %v2046_v30 = vrot.slane %v2044_v56, 5  ;;  %v1981_v45 = vsel %vm9848_vm8, %v1976_v52, %v1980_v32 }
 0x26a   : > { %v1985_v20 = vor.u32 %v1984_v27, %v1980_v32  ;;  %8395 = vmatprep.mubr.msk.bf16.mxu1 %vm2234_vm5, %v7549_v47  ;;  %v2002_v7 = vshll.u32 %v10294_v49, 16  ;;  %v2008_v22 = vrot.slane %v2006_v63, 4  ;;  %v2012_v55 = vshll.u32 %v10339_v17, 16  ;;  %v10363_v47 = vld [vmem:[#allocation2 + $0x94] sm:$0xf] }
 0x26b   : > { %8353 = vmatprep.mubr.msk.bf16.mxu0 %vm2234_vm5, %v7513_v61  ;;  %v2065_v48 = vshrl.u32 %v1770_v5, 16  ;;  %v2068_v4 = vshll.u32 %v1770_v5, 16  ;;  %v2000_v16 = vrot.slane %v1999_v24, 4  ;;  %v2078_v44 = vshrl.u32 %v10347_v36, 16 }
 0x26c   : > { %v1986_v0 = vrot.slane %v1985_v20, 4  ;;  %v2004_v50 = vrot.slane %v2002_v7, 5  ;;  %v2014_v27 = vrot.slane %v2012_v55, 5  ;;  %v7550_v12 = vcombine.low %v1770_v5, %v10347_v36 }
 0x26d   : > { %v2067_v52 = vrot.slane %v2065_v48, 4  ;;  %v2070_v9 = vrot.slane %v2068_v4, 5  ;;  %v2023_v32 = vor.u32 %v2022_v8, %v2019_v10  ;;  %v2026_v20 = vshll.u32 %v10315_v34, 16 }
 0x26e   : > { %v1991_v63 = vsel %vm9848_vm8, %v1986_v0, %v1990_v25  ;;  %v2005_v56 = vsel %vm9848_vm8, %v2000_v16, %v2004_v50  ;;  %v2009_v57 = vor.u32 %v2008_v22, %v2004_v50  ;;  %8396 = vmatmul.mubr.msk.bf16.gmra.mxu1 %vm2234_vm5, %v7550_v12  ;;  %v2032_v24 = vrot.slane %v2030_v46, 4  ;;  %v10368_v25 = vld [vmem:[#allocation2 + $0x80] sm:$0x1]  ;;  %v1774_v0 = vld [vmem:[#allocation2 + $0x9c] sm:$0xf] }
 0x26f   : > { %v7514_v61 = vcombine.low %v1981_v45, %v1991_v63  ;;  %v2036_v7 = vshll.u32 %v10356_v14, 16  ;;  %v2024_v55 = vrot.slane %v2023_v32, 4  ;;  %v2089_v48 = vshrl.u32 %v1772_v39, 16  ;;  %v10375_v63 = vld [vmem:[#allocation2 + $0xa0] sm:$0xf] }
 0x270   : > { %v2010_v5 = vrot.slane %v2009_v57, 4  ;;  %v2092_v4 = vshll.u32 %v1772_v39, 16  ;;  %v2028_v22 = vrot.slane %v2026_v20, 5  ;;  %v2102_v8 = vshrl.u32 %v10363_v47, 16 }
 0x271   : > { %8354 = vmatmul.mubr.msk.bf16.gmra.mxu0 %vm2234_vm5, %v7514_v61  ;;  %v2038_v10 = vrot.slane %v2036_v7, 5  ;;  %v7551_v45 = vcombine.low %v1772_v39, %v10363_v47  ;;  %v2091_v16 = vrot.slane %v2089_v48, 4  ;;  %v2047_v12 = vor.u32 %v2046_v30, %v2043_v37 }
 0x272   : > { %v2015_v46 = vsel %vm9848_vm8, %v2010_v5, %v2014_v27  ;;  %v2094_v50 = vrot.slane %v2092_v4, 5  ;;  %v2029_v32 = vsel %vm9848_vm8, %v2024_v55, %v2028_v22  ;;  %v2033_v61 = vor.u32 %v2032_v24, %v2028_v22  ;;  %v10385_v55 = vld [vmem:[#allocation2 + $0x8c] sm:$0x1]  ;;  %v1776_v22 = vld [vmem:[#allocation2 + $0xa8] sm:$0xf] }
 0x273   : > { %v7515_v57 = vcombine.low %v2005_v56, %v2015_v46  ;;  %8399 = vmatprep.mubr.msk.bf16.mxu1 %vm2234_vm5, %v7551_v45  ;;  %v2050_v20 = vshll.u32 %v10333_v53, 16  ;;  %v2048_v7 = vrot.slane %v2047_v12, 4  ;;  %v2056_v39 = vrot.slane %v2054_v51, 4 }
 0x274   : > { %v2060_v11 = vshll.u32 %v10368_v25, 16  ;;  %v2113_v19 = vshrl.u32 %v1774_v0, 16  ;;  %v2034_v27 = vrot.slane %v2033_v61, 4  ;;  %v2116_v30 = vshll.u32 %v1774_v0, 16 }
 0x275   : > { %8357 = vmatprep.mubr.msk.bf16.mxu0 %vm2234_vm5, %v7515_v57  ;;  %v2052_v37 = vrot.slane %v2050_v20, 5  ;;  %v2126_v56 = vshrl.u32 %v10375_v63, 16  ;;  %v7552_v24 = vcombine.low %v1774_v0, %v10375_v63  ;;  %v2071_v4 = vor.u32 %v2070_v9, %v2067_v52  ;;  %v10391_v57 = vld [vmem:[#allocation2 + $0xac] sm:$0xf] }
 0x276   : > { %v2062_v5 = vrot.slane %v2060_v11, 5  ;;  %v2115_v48 = vrot.slane %v2113_v19, 4  ;;  %v2039_v51 = vsel %vm9848_vm8, %v2034_v27, %v2038_v10  ;;  %v2118_v12 = vrot.slane %v2116_v30, 5  ;;  %v10399_v27 = vld [vmem:[#allocation2 + $0x98] sm:$0x1] }
 0x277   : > { %v2053_v45 = vsel %vm9848_vm8, %v2048_v7, %v2052_v37  ;;  %v2057_v46 = vor.u32 %v2056_v39, %v2052_v37  ;;  %v7516_v61 = vcombine.low %v2029_v32, %v2039_v51  ;;  %8400 = vmatmul.mubr.msk.bf16.gmra.mxu1 %vm2234_vm5, %v7552_v24  ;;  %v2072_v19 = vrot.slane %v2071_v4, 4  ;;  %v1778_v37 = vld [vmem:[#allocation2 + $0xb4] sm:$0xf]  ;;  %v10403_v51 = vld [vmem:[#allocation2 + $0xb8] sm:$0xf] }
 0x278   : > { %v2074_v11 = vshll.u32 %v10347_v36, 16  ;;  %v2080_v0 = vrot.slane %v2078_v44, 4  ;;  %v2084_v52 = vshll.u32 %v10385_v55, 16  ;;  %v2137_v9 = vshrl.u32 %v1776_v22, 16 }
 0x279   : > { %v2058_v20 = vrot.slane %v2057_v46, 4  ;;  %v2140_v42 = vshll.u32 %v1776_v22, 16  ;;  %8358 = vmatmul.mubr.msk.bf16.gmra.mxu0 %vm2234_vm5, %v7516_v61  ;;  %v2150_v7 = vshrl.u32 %v10391_v57, 16  ;;  %v7553_v39 = vcombine.low %v1776_v22, %v10391_v57 }
 0x27a   : > { %v2076_v10 = vrot.slane %v2074_v11, 5  ;;  %v2095_v32 = vor.u32 %v2094_v50, %v2091_v16  ;;  %v2086_v44 = vrot.slane %v2084_v52, 5  ;;  %v2139_v24 = vrot.slane %v2137_v9, 4  ;;  %v10413_v52 = vld [vmem:[#allocation2 + $0xa4] sm:$0x1] }
 0x27b   : > { %v2063_v30 = vsel %vm9848_vm8, %v2058_v20, %v2062_v5  ;;  %v2142_v4 = vrot.slane %v2140_v42, 5  ;;  %8403 = vmatprep.mubr.msk.bf16.mxu1 %vm2234_vm5, %v7553_v39  ;;  %v2098_v29 = vshll.u32 %v10363_v47, 16  ;;  %v2104_v16 = vrot.slane %v2102_v8, 4  ;;  %v8803_v8 = vld [vmem:[#allocation2 + $0xc] sm:$0xff]  }
 0x27c   : > { %v7517_v46 = vcombine.low %v2053_v45, %v2063_v30  ;;  %v2077_v61 = vsel %vm9848_vm8, %v2072_v19, %v2076_v10  ;;  %v2081_v11 = vor.u32 %v2080_v0, %v2076_v10  ;;  %v2096_v22 = vrot.slane %v2095_v32, 4 }
 0x27d   : > { %v2108_v50 = vshll.u32 %v10399_v27, 16  ;;  %v2161_v26 = vshrl.u32 %v1778_v37, 16  ;;  %v2164_v42 = vshll.u32 %v1778_v37, 16  ;;  %v2174_v20 = vshrl.u32 %v10403_v51, 16 }
 0x27e   : > { %8361 = vmatprep.mubr.msk.bf16.mxu0 %vm2234_vm5, %v7517_v46  ;;  %v2082_v5 = vrot.slane %v2081_v11, 4  ;;  %v7554_v45 = vcombine.low %v1778_v37, %v10403_v51  ;;  %v2100_v19 = vrot.slane %v2098_v29, 5  ;;  %v2119_v10 = vor.u32 %v2118_v12, %v2115_v48  ;;  %v10419_v11 = vld [vmem:[#allocation2 + $0xb0] sm:$0x1] }
 0x27f   : > { %v2110_v0 = vrot.slane %v2108_v50, 5  ;;  %v2163_v9 = vrot.slane %v2161_v26, 4  ;;  %v2166_v32 = vrot.slane %v2164_v42, 5  ;;  %v2122_v30 = vshll.u32 %v10375_v63, 16 }
 0x280   : > { %v2087_v39 = vsel %vm9848_vm8, %v2082_v5, %v2086_v44  ;;  %8404 = vmatmul.mubr.msk.bf16.gmra.mxu1 %vm2234_vm5, %v7554_v45  ;;  %v2128_v46 = vrot.slane %v2126_v56, 4  ;;  %v2101_v6 = vsel %vm9848_vm8, %v2096_v22, %v2100_v19  ;;  %v2105_v29 = vor.u32 %v2104_v16, %v2100_v19  ;;  %v10429_v56 = vld [vmem:[%s12838_s5 + $0xa] sm:$0x3]  ;;  %v9347_v16 = vld [vmem:[%s12838_s5 + $0x6] sm:$0x3] }
 0x281   : > { %v7518_v37 = vcombine.low %v2077_v61, %v2087_v39  ;;  %v2120_v50 = vrot.slane %v2119_v10, 4  ;;  %8443 = vmatprep.mubr.msk.bf16.mxu1 %vm2234_vm5, %v8803_v8  ;;  %v2124_v26 = vrot.slane %v2122_v30, 5  ;;  %v2132_v48 = vshll.u32 %v10413_v52, 16 }
 0x282   : > { %v2143_v12 = vor.u32 %v2142_v4, %v2139_v24  ;;  %v2146_v44 = vshll.u32 %v10391_v57, 16  ;;  %v2106_v61 = vrot.slane %v2105_v29, 4  ;;  %v2152_v5 = vrot.slane %v2150_v7, 4  ;;  %v10437_v24 = vld [vmem:[#allocation2 + $0xbc] sm:$0x1] }
 0x283   : > { %8362 = vmatmul.mubr.msk.bf16.gmra.mxu0 %vm2234_vm5, %v7518_v37  ;;  %v2156_v22 = vshll.u32 %v10419_v11, 16  ;;  %v3361_v42 = vsel %vm2283_vm4, %v9347_v16, 0  ;;  %v2740_v4 = vld [vmem:[#allocation2] sm:$0xe]  ;;  %v2125_v45 = vsel %vm9848_vm8, %v2120_v50, %v2124_v26  ;;  %v2129_v19 = vor.u32 %v2128_v46, %v2124_v26  ;;  %v8805_v50 = vld [vmem:[#allocation2 + $0x24] sm:$0xff]  }
 0x284   : > { %v2134_v10 = vrot.slane %v2132_v48, 5  ;;  %v2144_v8 = vrot.slane %v2143_v12, 4  ;;  %8442 = vmatpush3.bf16.msra.mxu1 %v3361_v42  ;;  %v2111_v7 = vsel %vm9848_vm8, %v2106_v61, %v2110_v0  ;;  %v2148_v39 = vrot.slane %v2146_v44, 5  ;;  %v9348_v12 = vld [vmem:[#allocation2 + $0x4] sm:$0xf] }
 0x285   : > { %v2158_v30 = vrot.slane %v2156_v22, 5  ;;  %v2167_v37 = vor.u32 %v2166_v32, %v2163_v9  ;;  %8723 = vmatprep.subr.msk.bf16.mxu1 %vm2283_vm4, %v10429_v56  ;;  %v7519_v29 = vcombine.low %v2101_v6, %v2111_v7  ;;  %v2130_v16 = vrot.slane %v2129_v19, 4  ;;  %v9349_v19 = vld [vmem:[#allocation2 + $0x8] sm:$0x1] }
 0x286   : > { %v2170_v41 = vshll.u32 %v10403_v51, 16  ;;  %v2176_v43 = vrot.slane %v2174_v20, 4  ;;  %v2149_v46 = vsel %vm9848_vm8, %v2144_v8, %v2148_v39  ;;  %v2153_v26 = vor.u32 %v2152_v5, %v2148_v39  ;;  %v2741_v20 = vld [vmem:[#allocation2 + $0xc] sm:$0xe]  ;;  %v2742_v8 = vld [vmem:[#allocation2 + $0x18] sm:$0xe] }
 0x287   : > { %v2168_v48 = vrot.slane %v2167_v37, 4  ;;  %v2180_v0 = vshll.u32 %v10437_v24, 16  ;;  %8365 = vmatprep.mubr.msk.bf16.mxu0 %vm2234_vm5, %v7519_v29  ;;  %v2135_v9 = vsel %vm9848_vm8, %v2130_v16, %v2134_v10  ;;  %v7571_v32 = vrot.slane %v2740_v4, 9  ;;  %v9350_v37 = vld [vmem:[#allocation2 + $0x10] sm:$0xf] }
 0x288   : > { %8444 = vmatmul.mubr.msk.bf16.vlgmr.msra.gmra.mxu1 %vm2234_vm5, %v8804_v60  ;;  %v2172_v6 = vrot.slane %v2170_v41, 5  ;;  %v2793_v44 = vrot.slane %v9348_v12, 5  ;;  %v7520_v61 = vcombine.low %v2125_v45, %v2135_v9  ;;  %v2154_v22 = vrot.slane %v2153_v26, 4 }
 0x289   : > { %v2182_v42 = vrot.slane %v2180_v0, 5  ;;  %8447 = vmatprep.mubr.msk.bf16.mxu1 %vm2234_vm5, %v8805_v50  ;;  %v2796_v10 = vrot.slane %v9349_v19, 5  ;;  %v7572_v39 = vrot.slane %v2741_v20, 9  ;;  %v2800_v29 = vrot.slane %v9350_v37, 5  ;;  %v2743_v50 = vld [vmem:[#allocation2 + $0x24] sm:$0xe] }
 0x28a   : > { %v2173_v41 = vsel %vm9848_vm8, %v2168_v48, %v2172_v6  ;;  %v2177_v60 = vor.u32 %v2176_v43, %v2172_v6  ;;  %v2794_v4 = vsel %vm10456_vm14, %v7571_v32, %v2793_v44  ;;  %v2795_v45 = vrot.slane %v2793_v44, 4  ;;  %v8806_v48 = vld [vmem:[#allocation2 + $0x30] sm:$0xff]   ;;  %v9351_v20 = vld [vmem:[#allocation2 + $0x1c] sm:$0xf] }
 0x28b   : > { %8366 = vmatmul.mubr.msk.bf16.gmra.mxu0 %vm2234_vm5, %v7520_v61  ;;  %v2159_v7 = vsel %vm9848_vm8, %v2154_v22, %v2158_v30  ;;  %v2803_v16 = vrot.slane %v10169_v33, 5  ;;  %v10472_v9 = vsel %vm2283_vm4, %v10222_v15, 0  ;;  %v2744_v6 = vld [vmem:[#allocation2 + $0x30] sm:$0xe]  ;;  %v10476_v30 = vsel %vm10456_vm14, %v7572_v39, %v2800_v29  ;;  %v2745_v19 = vld [vmem:[#allocation2 + $0x3c] sm:$0xe] }
 0x28c   : > { %v7521_v26 = vcombine.low %v2149_v46, %v2159_v7  ;;  %v2178_v0 = vrot.slane %v2177_v60, 4  ;;  %v2797_v43 = vsel %vm10456_vm14, %v2795_v45, %v2796_v10  ;;  %v2802_v12 = vrot.slane %v2800_v29, 4  ;;  %v8807_v46 = vld [vmem:[#allocation2 + $0x3c] sm:$0xff]  }
 0x28d   : > { %v7588_v32 = vcombine.low %v2794_v4, %v2797_v43  ;;  %v7573_v44 = vrot.slane %v2742_v8, 9  ;;  %v2807_v61 = vrot.slane %v9351_v20, 5  ;;  %v2810_v22 = vrot.slane %v10185_v62, 5  ;;  %v9352_v4 = vld [vmem:[#allocation2 + $0x28] sm:$0xf] }
 0x28e   : > { %8369 = vmatprep.mubr.msk.bf16.mxu0 %vm2234_vm5, %v7521_v26  ;;  %v2183_v33 = vsel %vm9848_vm8, %v2178_v0, %v2182_v42  ;;  %v7574_v15 = vrot.slane %v2743_v50, 9  ;;  %v10484_v60 = vsel %vm10456_vm14, %v2802_v12, %v2803_v16  ;;  %v2814_v45 = vrot.slane %v9352_v4, 5  ;;  %v2746_v16 = vld [vmem:[#allocation2 + $0x48] sm:$0xe]  ;;  %v2749_v4 = vld [vmem:[#allocation2 + $0x6c] sm:$0xe] }
 0x28f   : > { %v7522_v10 = vcombine.low %v2173_v41, %v2183_v33  ;;  %v2817_v8 = vrot.slane %v10217_v28, 5  ;;  %v7589_v42 = vcombine.low %v10476_v30, %v10484_v60  ;;  %v10492_v7 = vsel %vm10456_vm14, %v7573_v44, %v2807_v61  ;;  %v2748_v33 = vld [vmem:[#allocation2 + $0x60] sm:$0xe] }
 0x290   : > { %8448 = vmatmul.mubr.msk.bf16.gmra.mxu1 %vm2234_vm5, %v8806_v48  ;;  %v2809_v62 = vrot.slane %v2807_v61, 4  ;;  %v7575_v39 = vrot.slane %v2744_v6, 9  ;;  %v10497_v41 = vsel %vm10456_vm14, %v7574_v15, %v2814_v45  ;;  %v2816_v37 = vrot.slane %v2814_v45, 4  ;;  %v2747_v48 = vld [vmem:[#allocation2 + $0x54] sm:$0xe] }
 0x291   : > { %8451 = vmatprep.mubr.msk.bf16.mxu1 %vm2234_vm5, %v8807_v46  ;;  %v2821_v28 = vrot.slane %v10193_v2, 5  ;;  %v2824_v29 = vrot.slane %v10251_v3, 5  ;;  %v7576_v26 = vrot.slane %v2745_v19, 9  ;;  %v2828_v0 = vrot.slane %v10207_v23, 5  ;;  %v8809_v45 = vld [vmem:[#allocation2 + $0x54] sm:$0xff]  }
 0x292   : > { %v2811_v50 = vsel %vm10456_vm14, %v2809_v62, %v2810_v22  ;;  %v2831_v43 = vrot.slane %v10286_v35, 5  ;;  %v10509_v30 = vsel %vm10456_vm14, %v2816_v37, %v2817_v8  ;;  %v7577_v44 = vrot.slane %v2746_v16, 9  ;;  %v2750_v37 = vld [vmem:[#allocation2 + $0x78] sm:$0xe] }
 0x293   : > { %8370 = vmatmul.mubr.msk.bf16.gmra.mxu0 %vm2234_vm5, %v7522_v10  ;;  %v7590_v6 = vcombine.low %v10492_v7, %v2811_v50  ;;  %v10513_v2 = vsel %vm10456_vm14, %v7575_v39, %v2821_v28  ;;  %v2823_v3 = vrot.slane %v2821_v28, 4  ;;  %v7591_v23 = vcombine.low %v10497_v41, %v10509_v30 }
 0x294   : > { %8409 = vmatprep.mubr.msk.bf16.mxu0 %vm2234_vm5, %v7588_v32  ;;  %v10520_v35 = vsel %vm10456_vm14, %v7576_v26, %v2828_v0  ;;  %v2830_v12 = vrot.slane %v2828_v0, 4  ;;  %v2835_v20 = vrot.slane %v10226_v38, 5  ;;  %v2838_v61 = vrot.slane %v10307_v59, 5  ;;  %v8808_v32 = vld [vmem:[#allocation2 + $0x48] sm:$0xff]   ;;  %v2751_v26 = vld [vmem:[#allocation2 + $0x84] sm:$0xe] }
 0x295   : > { %v10524_v46 = vsel %vm10456_vm14, %v2823_v3, %v2824_v29  ;;  %v7578_v22 = vrot.slane %v2747_v48, 9  ;;  %v2842_v10 = vrot.slane %v10269_v58, 5  ;;  %v2845_v60 = vrot.slane %v10327_v13, 5  ;;  %v10569_v48 = vld [vmem:[%s12838_s5 + $0xc] sm:$0x3] }
 0x296   : > { %v7592_v15 = vcombine.low %v10513_v2, %v10524_v46  ;;  %v10532_v19 = vsel %vm10456_vm14, %v2830_v12, %v2831_v43  ;;  %v10540_v59 = vsel %vm10456_vm14, %v7577_v44, %v2835_v20  ;;  %v2837_v8 = vrot.slane %v2835_v20, 4  ;;  %v2752_v44 = vld [vmem:[#allocation2 + $0x90] sm:$0xe] }
 0x297   : > { %v7593_v38 = vcombine.low %v10520_v35, %v10532_v19  ;;  %v7579_v7 = vrot.slane %v2748_v33, 9  ;;  %v10545_v62 = vsel %vm10456_vm14, %v7578_v22, %v2842_v10  ;;  %v2844_v58 = vrot.slane %v2842_v10, 4  ;;  %v2753_v10 = vld [vmem:[#allocation2 + $0x9c] sm:$0xe] }
 0x298   : > { %8452 = vmatmul.mubr.msk.bf16.gmra.mxu1 %vm2234_vm5, %v8808_v32  ;;  %v2849_v13 = vrot.slane %v10294_v49, 5  ;;  %v2852_v39 = vrot.slane %v10339_v17, 5  ;;  %v10552_v28 = vsel %vm10456_vm14, %v2837_v8, %v2838_v61  ;;  %v7580_v29 = vrot.slane %v2749_v4, 9  ;;  %v10602_v8 = vld [vmem:[#allocation2 + $0x10] sm:$0xf] }
 0x299   : > { %8455 = vmatprep.mubr.msk.bf16.mxu1 %vm2234_vm5, %v8809_v45  ;;  %v2856_v16 = vrot.slane %v10315_v34, 5  ;;  %v2859_v50 = vrot.slane %v10356_v14, 5  ;;  %v7594_v0 = vcombine.low %v10540_v59, %v10552_v28  ;;  %v10560_v49 = vsel %vm10456_vm14, %v2844_v58, %v2845_v60  ;;  %v8810_v60 = vld [vmem:[#allocation2 + $0x60] sm:$0xff]   ;;  %v10742_v59 = vld [vmem:[#allocation2 + $0x38] sm:$0x1]  ;;  %v8814_v28 = vld [vmem:[#allocation2 + $0x90] sm:$0xff]  }
 0x29a   : > { %v10564_v17 = vsel %vm10456_vm14, %v7579_v7, %v2849_v13  ;;  %v2851_v43 = vrot.slane %v2849_v13, 4  ;;  %v7595_v34 = vcombine.low %v10545_v62, %v10560_v49  ;;  %v7581_v12 = vrot.slane %v2750_v37, 9  ;;  %v10604_v7 = vld [vmem:[#allocation2 + $0x14] sm:$0x1]  ;;  %v4282_v37 = vld [vmem:[#allocation2 + $0xc] sm:$0xe] }
 0x29b   : > { %8410 = vmatmul.mubr.msk.bf16.vlgmr.msra.gmra.mxu0 %vm2234_vm5, %v7589_v42  ;;  %v10576_v14 = vsel %vm10456_vm14, %v7580_v29, %v2856_v16  ;;  %v2858_v3 = vrot.slane %v2856_v16, 4  ;;  %v2863_v42 = vrot.slane %v10333_v53, 5  ;;  %v2866_v20 = vrot.slane %v10368_v25, 5 }
 0x29c   : > { %8476 = vmatpush3.bf16.msra.mxu0 %v10472_v9  ;;  %8413 = vmatprep.mubr.msk.bf16.mxu0 %vm2234_vm5, %v7590_v6  ;;  %v10582_v33 = vsel %vm10456_vm14, %v2851_v43, %v2852_v39  ;;  %v7582_v61 = vrot.slane %v2751_v26, 9  ;;  %v2870_v9 = vrot.slane %v10347_v36, 5  ;;  %v2873_v6 = vrot.slane %v10385_v55, 5  ;;  %v8811_v36 = vld [vmem:[#allocation2 + $0x6c] sm:$0xff]   ;;  %v2754_v43 = vld [vmem:[#allocation2 + $0xa8] sm:$0xe] }
 0x29d   : > { %v7596_v22 = vcombine.low %v10564_v17, %v10582_v33  ;;  %v10590_v32 = vsel %vm10456_vm14, %v2858_v3, %v2859_v50  ;;  %8724 = vmatprep.subr.msk.bf16.mxu0 %vm2283_vm4, %v10569_v48  ;;  %v10600_v25 = vsel %vm10456_vm14, %v7581_v12, %v2863_v42  ;;  %v2865_v4 = vrot.slane %v2863_v42, 4 }
 0x29e   : > { %v7597_v53 = vcombine.low %v10576_v14, %v10590_v32  ;;  %v7583_v45 = vrot.slane %v2752_v44, 9  ;;  %v10608_v55 = vsel %vm10456_vm14, %v7582_v61, %v2870_v9  ;;  %v2872_v58 = vrot.slane %v2870_v9, 4  ;;  %v10638_v61 = vld [vmem:[#allocation2 + $0x20] sm:$0x1] }
 0x29f   : > { %v2877_v13 = vrot.slane %v10363_v47, 5  ;;  %v2880_v39 = vrot.slane %v10399_v27, 5  ;;  %v10615_v29 = vsel %vm10456_vm14, %v2865_v4, %v2866_v20  ;;  %v7584_v16 = vrot.slane %v2753_v10, 9  ;;  %v10636_v20 = vld [vmem:[#allocation2 + $0x1c] sm:$0xf] }
 0x2a0   : > { %8456 = vmatmul.mubr.msk.bf16.gmra.mxu1 %vm2234_vm5, %v8810_v60  ;;  %v2884_v50 = vrot.slane %v10375_v63, 5  ;;  %v2887_v26 = vrot.slane %v10413_v52, 5  ;;  %v7598_v47 = vcombine.low %v10600_v25, %v10615_v29  ;;  %v10624_v27 = vsel %vm10456_vm14, %v2872_v58, %v2873_v6  ;;  %v4283_v4 = vld [vmem:[#allocation2 + $0x18] sm:$0xe]  ;;  %v10665_v58 = vld [vmem:[%s12838_s5 + $0xe] sm:$0x3] }
 0x2a1   : > { %8459 = vmatprep.mubr.msk.bf16.mxu1 %vm2234_vm5, %v8811_v36  ;;  %v10628_v3 = vsel %vm10456_vm14, %v7583_v45, %v2877_v13  ;;  %v2879_v12 = vrot.slane %v2877_v13, 4  ;;  %v7686_v42 = vrot.slane %v4282_v37, 9  ;;  %v4348_v6 = vrot.slane %v10602_v8, 5  ;;  %v2755_v36 = vld [vmem:[#allocation2 + $0xb4] sm:$0xe] }
 0x2a2   : > { %v10634_v52 = vsel %vm10456_vm14, %v7584_v16, %v2884_v50  ;;  %v2886_v44 = vrot.slane %v2884_v50, 4  ;;  %v4351_v10 = vrot.slane %v10604_v7, 5  ;;  %v7585_v60 = vrot.slane %v2754_v43, 9  ;;  %v8813_v43 = vld [vmem:[#allocation2 + $0x84] sm:$0xff]  }
 0x2a3   : > { %8414 = vmatmul.mubr.msk.bf16.gmra.mxu0 %vm2234_vm5, %v7591_v23  ;;  %v10646_v9 = vsel %vm10456_vm14, %v2879_v12, %v2880_v39  ;;  %v2891_v23 = vrot.slane %v10391_v57, 5  ;;  %v2894_v45 = vrot.slane %v10419_v11, 5  ;;  %v10671_v46 = vsel %vm10456_vm14, %v7686_v42, %v4348_v6  ;;  %v10675_v57 = vld [vmem:[#allocation2 + $0x2c] sm:$0x1]  ;;  %v8812_v11 = vld [vmem:[#allocation2 + $0x78] sm:$0xff]  }
 0x2a4   : > { %8417 = vmatprep.mubr.msk.bf16.mxu0 %vm2234_vm5, %v7592_v15  ;;  %v10658_v30 = vsel %vm10456_vm14, %v2886_v44, %v2887_v26  ;;  %v4350_v15 = vrot.slane %v4348_v6, 4  ;;  %v4557_v13 = vsel %vm2283_vm4, %v10429_v56, 0  ;;  %v7687_v16 = vrot.slane %v4283_v4, 9  ;;  %v10682_v26 = vld [vmem:[#allocation2 + $0x28] sm:$0xf] }
 0x2a5   : > { %v10679_v39 = vsel %vm10456_vm14, %v7585_v60, %v2891_v23  ;;  %v2893_v37 = vrot.slane %v2891_v23, 4  ;;  %8510 = vmatpush3.bf16.msra.mxu1 %v4557_v13  ;;  %v4355_v50 = vrot.slane %v10636_v20, 5  ;;  %v4358_v56 = vrot.slane %v10638_v61, 5  ;;  %v4284_v6 = vld [vmem:[#allocation2 + $0x24] sm:$0xe] }
 0x2a6   : > { %v10686_v12 = vsel %vm10456_vm14, %v4350_v15, %v4351_v10  ;;  %v7586_v44 = vrot.slane %v2755_v36, 9  ;;  %v2898_v42 = vrot.slane %v10403_v51, 5  ;;  %8725 = vmatprep.subr.msk.bf16.mxu1 %vm2283_vm4, %v10665_v58  ;;  %v3556_v36 = vld [vmem:[#allocation2 + $0xc] sm:$0xf]  ;;  %v3618_v51 = vshrl.u32 %v10602_v8, 16 }
 0x2a7   : > { %v10697_v4 = vsel %vm10456_vm14, %v2893_v37, %v2894_v45  ;;  %v10701_v10 = vsel %vm10456_vm14, %v7687_v16, %v4355_v50  ;;  %v4357_v23 = vrot.slane %v4355_v50, 4  ;;  %v7688_v37 = vrot.slane %v4284_v6, 9  ;;  %v4285_v6 = vld [vmem:[#allocation2 + $0x30] sm:$0xe] }
 0x2a8   : > { %8460 = vmatmul.mubr.msk.bf16.gmra.mxu1 %vm2234_vm5, %v8812_v11  ;;  %v10708_v15 = vsel %vm10456_vm14, %v7586_v44, %v2898_v42  ;;  %v2900_v13 = vrot.slane %v2898_v42, 4  ;;  %v2901_v11 = vrot.slane %v10437_v24, 5  ;;  %v4362_v16 = vrot.slane %v10682_v26, 5  ;;  %v10727_v42 = vld [vmem:[#allocation2 + $0x34] sm:$0xf] }
 0x2a9   : > { %8463 = vmatprep.mubr.msk.bf16.mxu1 %vm2234_vm5, %v8813_v43  ;;  %v10713_v45 = vsel %vm10456_vm14, %v4357_v23, %v4358_v56  ;;  %v4365_v50 = vrot.slane %v10675_v57, 5  ;;  %v3605_v44 = vshrl.u32 %v3556_v36, 16  ;;  %v3608_v56 = vshll.u32 %v3556_v36, 16  ;;  %v8815_v43 = vld [vmem:[#allocation2 + $0x9c] sm:$0xff]  }
 0x2aa   : > { %v10725_v24 = vsel %vm10456_vm14, %v2900_v13, %v2901_v11  ;;  %v10737_v19 = vsel %vm10456_vm14, %v7688_v37, %v4362_v16  ;;  %v3614_v23 = vshll.u32 %v10602_v8, 16  ;;  %v3559_v13 = vld [vmem:[#allocation2 + $0x18] sm:$0xf]  ;;  %v3624_v2 = vshll.u32 %v10604_v7, 16 }
 0x2ab   : > { %8418 = vmatmul.mubr.msk.bf16.gmra.mxu0 %vm2234_vm5, %v7593_v38  ;;  %v4364_v38 = vrot.slane %v4362_v16, 4  ;;  %v3607_v36 = vrot.slane %v3605_v44, 4  ;;  %v3610_v11 = vrot.slane %v3608_v56, 5  ;;  %v7689_v37 = vrot.slane %v4285_v6, 9  ;;  %v10757_v6 = vld [vmem:[#allocation2 + $0x40] sm:$0xf] }
 0x2ac   : > { %8421 = vmatprep.mubr.msk.bf16.mxu0 %vm2234_vm5, %v7594_v0  ;;  %v3616_v35 = vrot.slane %v3614_v23, 5  ;;  %v4369_v16 = vrot.slane %v10727_v42, 5  ;;  %v3620_v41 = vrot.slane %v3618_v51, 4  ;;  %v3626_v8 = vrot.slane %v3624_v2, 5  ;;  %v4286_v2 = vld [vmem:[#allocation2 + $0x3c] sm:$0xe] }
 0x2ad   : > { %v10746_v0 = vsel %vm10456_vm14, %v4364_v38, %v4365_v50  ;;  %v3611_v56 = vor.u32 %v3610_v11, %v3607_v36  ;;  %v4372_v50 = vrot.slane %v10742_v59, 5  ;;  %v3629_v38 = vshrl.u32 %v3559_v13, 16 }
 0x2ae   : > { %v10754_v7 = vsel %vm10456_vm14, %v7689_v37, %v4369_v16  ;;  %v4371_v63 = vrot.slane %v4369_v16, 4  ;;  %v3621_v60 = vor.u32 %v3620_v41, %v3616_v35  ;;  %v3632_v44 = vshll.u32 %v3559_v13, 16  ;;  %v10767_v16 = vld [vmem:[#allocation2 + $0x44] sm:$0x1] }
 0x2af   : > { %v3612_v23 = vrot.slane %v3611_v56, 4  ;;  %v3638_v51 = vshll.u32 %v10636_v20, 16  ;;  %v3631_v11 = vrot.slane %v3629_v38, 4  ;;  %v3648_v37 = vshll.u32 %v10638_v61, 16  ;;  %v3562_v56 = vld [vmem:[#allocation2 + $0x24] sm:$0xf] }
 0x2b0   : > { %8464 = vmatmul.mubr.msk.bf16.gmra.mxu1 %vm2234_vm5, %v8814_v28  ;;  %v10763_v36 = vsel %vm10456_vm14, %v4371_v63, %v4372_v50  ;;  %v3642_v28 = vshrl.u32 %v10636_v20, 16  ;;  %v3634_v13 = vrot.slane %v3632_v44, 5  ;;  %v7690_v62 = vrot.slane %v4286_v2, 9  ;;  %v8816_v38 = vld [vmem:[#allocation2 + $0xa8] sm:$0xff]  }
 0x2b1   : > { %8467 = vmatprep.mubr.msk.bf16.mxu1 %vm2234_vm5, %v8815_v43  ;;  %v3617_v41 = vsel %vm9848_vm8, %v3612_v23, %v3616_v35  ;;  %v3622_v43 = vrot.slane %v3621_v60, 4  ;;  %v7706_v63 = vcombine.low %v10754_v7, %v10763_v36  ;;  %v3640_v20 = vrot.slane %v3638_v51, 5 }
 0x2b2   : > { %v3644_v61 = vrot.slane %v3642_v28, 4  ;;  %v3650_v50 = vrot.slane %v3648_v37, 5  ;;  %v4376_v60 = vrot.slane %v10757_v6, 5  ;;  %v4379_v35 = vrot.slane %v10767_v16, 5  ;;  %v3565_v28 = vld [vmem:[#allocation2 + $0x30] sm:$0xf] }
 0x2b3   : > { %8422 = vmatmul.mubr.msk.bf16.gmra.mxu0 %vm2234_vm5, %v7595_v34  ;;  %v3627_v49 = vsel %vm9848_vm8, %v3622_v43, %v3626_v8  ;;  %v3635_v34 = vor.u32 %v3634_v13, %v3631_v11  ;;  %v10789_v17 = vsel %vm2283_vm4, %v10569_v48, 0  ;;  %v3653_v33 = vshrl.u32 %v3562_v56, 16  ;;  %v4287_v48 = vld [vmem:[#allocation2 + $0x48] sm:$0xe] }
 0x2b4   : > { %8425 = vmatprep.mubr.msk.bf16.mxu0 %vm2234_vm5, %v7596_v22  ;;  %v10785_v44 = vcombine.low %v3617_v41, %v3627_v49  ;;  %v3645_v23 = vor.u32 %v3644_v61, %v3640_v20  ;;  %v8817_v22 = vld [vmem:[#allocation2 + $0xb4] sm:$0xff]   ;;  %v10793_v2 = vsel %vm10456_vm14, %v7690_v62, %v4376_v60  ;;  %v4378_v8 = vrot.slane %v4376_v60, 4  ;;  %v10808_v60 = vld [vmem:[#allocation2 + $0x50] sm:$0x1] }
 0x2b5   : > { %v3636_v51 = vrot.slane %v3635_v34, 4  ;;  %v3656_v11 = vshll.u32 %v3562_v56, 16  ;;  %v3655_v41 = vrot.slane %v3653_v33, 4  ;;  %v3662_v43 = vshll.u32 %v10682_v26, 16  ;;  %v10806_v34 = vld [vmem:[#allocation2 + $0x4c] sm:$0xf] }
 0x2b6   : > { %v3646_v37 = vrot.slane %v3645_v23, 4  ;;  %v3666_v13 = vshrl.u32 %v10682_v26, 16  ;;  %v10803_v62 = vsel %vm10456_vm14, %v4378_v8, %v4379_v35  ;;  %v3672_v49 = vshll.u32 %v10675_v57, 16 }
 0x2b7   : > { %v3641_v61 = vsel %vm9848_vm8, %v3636_v51, %v3640_v20  ;;  %v3658_v56 = vrot.slane %v3656_v11, 5  ;;  %v3664_v23 = vrot.slane %v3662_v43, 5  ;;  %v4383_v51 = vrot.slane %v10806_v34, 5  ;;  %v4288_v43 = vld [vmem:[#allocation2 + $0x54] sm:$0xe] }
 0x2b8   : > { %8468 = vmatmul.mubr.msk.bf16.gmra.mxu1 %vm2234_vm5, %v8816_v38  ;;  %v3651_v26 = vsel %vm9848_vm8, %v3646_v37, %v3650_v50  ;;  %v7707_v38 = vcombine.low %v10793_v2, %v10803_v62  ;;  %v3668_v33 = vrot.slane %v3666_v13, 4  ;;  %v3674_v35 = vrot.slane %v3672_v49, 5  ;;  %v8818_v13 = vld [vmem:[#allocation2 + $0xc0] sm:$0xff]  }
 0x2b9   : > { %8471 = vmatprep.mubr.msk.bf16.mxu1 %vm2234_vm5, %v8817_v22  ;;  %v10818_v20 = vcombine.low %v3641_v61, %v3651_v26  ;;  %v3659_v57 = vor.u32 %v3658_v56, %v3655_v41  ;;  %v7691_v22 = vrot.slane %v4287_v48, 9  ;;  %v4386_v8 = vrot.slane %v10808_v60, 5  ;;  %v10828_v41 = vld [vmem:[#allocation2 + $0x58] sm:$0xf]  ;;  %v10834_v61 = vld [vmem:[#allocation2 + $0x5c] sm:$0x1] }
 0x2ba   : > { %v3669_v50 = vor.u32 %v3668_v33, %v3664_v23  ;;  %v3677_v11 = vshrl.u32 %v3565_v28, 16  ;;  %v3680_v14 = vshll.u32 %v3565_v28, 16  ;;  %v3686_v32 = vshll.u32 %v10727_v42, 16 }
 0x2bb   : > { %8426 = vmatmul.mubr.msk.bf16.gmra.mxu0 %vm2234_vm5, %v7597_v53  ;;  %v3660_v37 = vrot.slane %v3659_v57, 4  ;;  %v3690_v53 = vshrl.u32 %v10727_v42, 16  ;;  %v10832_v25 = vsel %vm10456_vm14, %v7691_v22, %v4383_v51  ;;  %v4385_v29 = vrot.slane %v4383_v51, 4  ;;  %v3568_v42 = vld [vmem:[#allocation2 + $0x3c] sm:$0xf] }
 0x2bc   : > { %8429 = vmatprep.mubr.msk.bf16.mxu0 %vm2234_vm5, %v7598_v47  ;;  %v3670_v48 = vrot.slane %v3669_v50, 4  ;;  %v3679_v47 = vrot.slane %v3677_v11, 4  ;;  %v3682_v56 = vrot.slane %v3680_v14, 5  ;;  %v3688_v49 = vrot.slane %v3686_v32, 5 }
 0x2bd   : > { %v3665_v28 = vsel %vm9848_vm8, %v3660_v37, %v3664_v23  ;;  %v3692_v26 = vrot.slane %v3690_v53, 4  ;;  %v10843_v57 = vsel %vm10456_vm14, %v4385_v29, %v4386_v8  ;;  %v3696_v22 = vshll.u32 %v10742_v59, 16 }
 0x2be   : > { %v3675_v33 = vsel %vm9848_vm8, %v3670_v48, %v3674_v35  ;;  %v7692_v50 = vrot.slane %v4288_v43, 9  ;;  %v12894_v51 = vcombine.low %v10671_v46, %v10686_v12  ;;  %v7708_v11 = vcombine.low %v10832_v25, %v10843_v57  ;;  %v10861_v48 = vld [vmem:[#allocation2 + $0x64] sm:$0xf] }
 0x2bf   : > { %v10850_v23 = vcombine.low %v3665_v28, %v3675_v33  ;;  %v3683_v37 = vor.u32 %v3682_v56, %v3679_v47  ;;  %v3693_v14 = vor.u32 %v3692_v26, %v3688_v49  ;;  %v3698_v35 = vrot.slane %v3696_v22, 5  ;;  %v4289_v56 = vld [vmem:[#allocation2 + $0x60] sm:$0xe] }
 0x2c0   : > { %8472 = vmatmul.mubr.msk.bf16.gmra.mxu1 %vm2234_vm5, %v8818_v13  ;;  %v4390_v32 = vrot.slane %v10828_v41, 5  ;;  %v4393_v8 = vrot.slane %v10834_v61, 5  ;;  %v3701_v53 = vshrl.u32 %v3568_v42, 16  ;;  %v12895_v59 = vcombine.low %v10608_v55, %v10624_v27 }
 0x2c1   : > { %8511 = vmatprep.mubr.msk.bf16.mxu1 %vm2234_vm5, %v12894_v51  ;;  %v3684_v46 = vrot.slane %v3683_v37, 4  ;;  %v3694_v12 = vrot.slane %v3693_v14, 4  ;;  %v3704_v43 = vshll.u32 %v3568_v42, 16  ;;  %v3710_v13 = vshll.u32 %v10757_v6, 16 }
 0x2c2   : > { %v12896_v29 = vcombine.low %v10628_v3, %v10646_v9  ;;  %v10869_v47 = vsel %vm10456_vm14, %v7692_v50, %v4390_v32  ;;  %v4392_v28 = vrot.slane %v4390_v32, 4  ;;  %v3703_v55 = vrot.slane %v3701_v53, 4  ;;  %v10876_v3 = vld [vmem:[#allocation2 + $0x68] sm:$0x1] }
 0x2c3   : > { %8430 = vmatmul.mubr.msk.bf16.gmra.mxu0 %vm2234_vm5, %v12895_v59  ;;  %v3714_v27 = vshrl.u32 %v10757_v6, 16  ;;  %v3689_v26 = vsel %vm9848_vm8, %v3684_v46, %v3688_v49  ;;  %v3699_v42 = vsel %vm9848_vm8, %v3694_v12, %v3698_v35  ;;  %v3706_v33 = vrot.slane %v3704_v43, 5  ;;  %v3571_v9 = vld [vmem:[#allocation2 + $0x48] sm:$0xf] }
 0x2c4   : > { %8433 = vmatprep.mubr.msk.bf16.mxu0 %vm2234_vm5, %v12896_v29  ;;  %v3712_v22 = vrot.slane %v3710_v13, 5  ;;  %v10878_v51 = vcombine.low %v3689_v26, %v3699_v42  ;;  %v10882_v50 = vsel %vm10456_vm14, %v4392_v28, %v4393_v8  ;;  %v3720_v6 = vshll.u32 %v10767_v16, 16  ;;  %v4290_v26 = vld [vmem:[#allocation2 + $0x6c] sm:$0xe] }
 0x2c5   : > { %v3716_v37 = vrot.slane %v3714_v27, 4  ;;  %v7709_v49 = vcombine.low %v10869_v47, %v10882_v50  ;;  %v3707_v14 = vor.u32 %v3706_v33, %v3703_v55  ;;  %v7693_v32 = vrot.slane %v4289_v56, 9 }
 0x2c6   : > { %v4397_v35 = vrot.slane %v10861_v48, 5  ;;  %v12897_v53 = vcombine.low %v10701_v10, %v10713_v45  ;;  %v3722_v46 = vrot.slane %v3720_v6, 5  ;;  %v4400_v8 = vrot.slane %v10876_v3, 5  ;;  %v10901_v10 = vld [vmem:[#allocation2 + $0x70] sm:$0xf] }
 0x2c7   : > { %v3717_v59 = vor.u32 %v3716_v37, %v3712_v22  ;;  %v3725_v12 = vshrl.u32 %v3571_v9, 16  ;;  %v12898_v16 = vcombine.low %v10737_v19, %v10746_v0  ;;  %v3708_v43 = vrot.slane %v3707_v14, 4  ;;  %v10916_v37 = vld [vmem:[#allocation2 + $0x74] sm:$0x1] }
 0x2c8   : > { %8512 = vmatmul.mubr.msk.bf16.vlgmr.msra.gmra.mxu1 %vm2234_vm5, %v12897_v53  ;;  %v10899_v13 = vsel %vm10456_vm14, %v7693_v32, %v4397_v35  ;;  %v4399_v29 = vrot.slane %v4397_v35, 4  ;;  %v3728_v28 = vshll.u32 %v3571_v9, 16  ;;  %v3734_v27 = vshll.u32 %v10806_v34, 16  ;;  %v3574_v6 = vld [vmem:[#allocation2 + $0x54] sm:$0xf] }
 0x2c9   : > { %8515 = vmatprep.mubr.msk.bf16.mxu1 %vm2234_vm5, %v12898_v16  ;;  %v3718_v45 = vrot.slane %v3717_v59, 4  ;;  %v3727_v55 = vrot.slane %v3725_v12, 4  ;;  %v3738_v56 = vshrl.u32 %v10806_v34, 16  ;;  %v12899_v19 = vcombine.low %v10634_v52, %v10658_v30 }
 0x2ca   : > { %v3713_v0 = vsel %vm9848_vm8, %v3708_v43, %v3712_v22  ;;  %v10913_v42 = vsel %vm10456_vm14, %v4399_v29, %v4400_v8  ;;  %v3730_v33 = vrot.slane %v3728_v28, 5  ;;  %v3744_v9 = vshll.u32 %v10808_v60, 16  ;;  %v10932_v29 = vld [vmem:[#allocation2 + $0x7c] sm:$0xf]  ;;  %v4291_v28 = vld [vmem:[#allocation2 + $0x78] sm:$0xe] }
 0x2cb   : > { %8434 = vmatmul.mubr.msk.bf16.gmra.mxu0 %vm2234_vm5, %v12899_v19  ;;  %v12900_v34 = vcombine.low %v10679_v39, %v10697_v4  ;;  %v3723_v52 = vsel %vm9848_vm8, %v3718_v45, %v3722_v46  ;;  %v7710_v30 = vcombine.low %v10899_v13, %v10913_v42  ;;  %v3736_v22 = vrot.slane %v3734_v27, 5  ;;  %v3577_v19 = vld [vmem:[#allocation2 + $0x60] sm:$0xf]  ;;  %v4294_v13 = vld [vmem:[#allocation2 + $0x9c] sm:$0xe] }
 0x2cc   : > { %v3740_v14 = vrot.slane %v3738_v56, 4  ;;  %v10926_v32 = vcombine.low %v3713_v0, %v3723_v52  ;;  %v3731_v35 = vor.u32 %v3730_v33, %v3727_v55  ;;  %v3746_v60 = vrot.slane %v3744_v9, 5  ;;  %v3586_v42 = vld [vmem:[#allocation2 + $0x84] sm:$0xf] }
 0x2cd   : > { %8437 = vmatprep.mubr.msk.bf16.mxu0 %vm2234_vm5, %v12900_v34  ;;  %v7694_v53 = vrot.slane %v4290_v26, 9  ;;  %v4404_v8 = vrot.slane %v10901_v10, 5  ;;  %v4407_v39 = vrot.slane %v10916_v37, 5  ;;  %v3749_v4 = vshrl.u32 %v3574_v6, 16  ;;  %v10942_v26 = vld [vmem:[#allocation2 + $0x80] sm:$0x1] }
 0x2ce   : > { %v3741_v59 = vor.u32 %v3740_v14, %v3736_v22  ;;  %v3732_v12 = vrot.slane %v3731_v35, 4  ;;  %v3752_v16 = vshll.u32 %v3574_v6, 16  ;;  %v3758_v46 = vshll.u32 %v10828_v41, 16 }
 0x2cf   : > { %v3762_v43 = vshrl.u32 %v10828_v41, 16  ;;  %v10940_v55 = vsel %vm10456_vm14, %v7694_v53, %v4404_v8  ;;  %v4406_v27 = vrot.slane %v4404_v8, 4  ;;  %v3751_v56 = vrot.slane %v3749_v4, 4 }
 0x2d0   : > { %8516 = vmatmul.mubr.msk.bf16.gmra.mxu1 %vm2234_vm5, %v7706_v63  ;;  %v3742_v45 = vrot.slane %v3741_v59, 4  ;;  %v3737_v41 = vsel %vm9848_vm8, %v3732_v12, %v3736_v22  ;;  %v3754_v7 = vrot.slane %v3752_v16, 5  ;;  %v3760_v36 = vrot.slane %v3758_v46, 5  ;;  %v10970_v59 = vld [vmem:[#allocation2 + $0x88] sm:$0xf] }
 0x2d1   : > { %8519 = vmatprep.mubr.msk.bf16.mxu1 %vm2234_vm5, %v7707_v38  ;;  %v3764_v63 = vrot.slane %v3762_v43, 4  ;;  %v10954_v33 = vsel %vm10456_vm14, %v4406_v27, %v4407_v39  ;;  %v3768_v9 = vshll.u32 %v10834_v61, 16  ;;  %v7695_v6 = vrot.slane %v4291_v28, 9  ;;  %v4292_v12 = vld [vmem:[#allocation2 + $0x84] sm:$0xe] }
 0x2d2   : > { %v3747_v0 = vsel %vm9848_vm8, %v3742_v45, %v3746_v60  ;;  %v12901_v2 = vcombine.low %v10708_v15, %v10725_v24  ;;  %v7711_v38 = vcombine.low %v10940_v55, %v10954_v33  ;;  %v3755_v34 = vor.u32 %v3754_v7, %v3751_v56  ;;  %v10981_v45 = vld [vmem:[#allocation2 + $0x8c] sm:$0x1] }
 0x2d3   : > { %v10961_v62 = vcombine.low %v3737_v41, %v3747_v0  ;;  %v3765_v52 = vor.u32 %v3764_v63, %v3760_v36  ;;  %v3770_v22 = vrot.slane %v3768_v9, 5  ;;  %v4411_v14 = vrot.slane %v10932_v29, 5  ;;  %v3580_v27 = vld [vmem:[#allocation2 + $0x6c] sm:$0xf] }
 0x2d4   : > { %8438 = vmatmul.mubr.msk.bf16.gmra.mxu0 %vm2234_vm5, %v12901_v2  ;;  %v4414_v61 = vrot.slane %v10942_v26, 5  ;;  %v3773_v35 = vshrl.u32 %v3577_v19, 16  ;;  %v3756_v60 = vrot.slane %v3755_v34, 4  ;;  %v3776_v24 = vshll.u32 %v3577_v19, 16  ;;  %v11013_v2 = vld [vmem:[#allocation2 + $0x94] sm:$0xf] }
 0x2d5   : > { %8477 = vmatprep.mubr.msk.bf16.mxu0 %vm2234_vm5, %v10785_v44  ;;  %v3766_v15 = vrot.slane %v3765_v52, 4  ;;  %v3782_v53 = vshll.u32 %v10861_v48, 16  ;;  %v10974_v8 = vsel %vm10456_vm14, %v7695_v6, %v4411_v14  ;;  %v4413_v39 = vrot.slane %v4411_v14, 4  ;;  %v4293_v14 = vld [vmem:[#allocation2 + $0x90] sm:$0xe] }
 0x2d6   : > { %v3775_v4 = vrot.slane %v3773_v35, 4  ;;  %v3786_v44 = vshrl.u32 %v10861_v48, 16  ;;  %v3761_v16 = vsel %vm9848_vm8, %v3756_v60, %v3760_v36  ;;  %v3778_v43 = vrot.slane %v3776_v24, 5  ;;  %v3583_v24 = vld [vmem:[#allocation2 + $0x78] sm:$0xf] }
 0x2d7   : > { %v3771_v46 = vsel %vm9848_vm8, %v3766_v15, %v3770_v22  ;;  %v3784_v28 = vrot.slane %v3782_v53, 5  ;;  %v10991_v48 = vsel %vm10456_vm14, %v4413_v39, %v4414_v61  ;;  %v3792_v7 = vshll.u32 %v10876_v3, 16  ;;  %v11005_v3 = vld [vmem:[%s12838_s5 + $0x10] sm:$0x3] }
 0x2d8   : > { %8520 = vmatmul.mubr.msk.bf16.gmra.mxu1 %vm2234_vm5, %v7708_v11  ;;  %v10987_v56 = vcombine.low %v3761_v16, %v3771_v46  ;;  %v3788_v41 = vrot.slane %v3786_v44, 4  ;;  %v7712_v36 = vcombine.low %v10974_v8, %v10991_v48  ;;  %v3779_v25 = vor.u32 %v3778_v43, %v3775_v4  ;;  %v11085_v48 = vld [vmem:[#allocation2 + $0xb0] sm:$0x1] }
 0x2d9   : > { %8523 = vmatprep.mubr.msk.bf16.mxu1 %vm2234_vm5, %v7709_v49  ;;  %v7696_v57 = vrot.slane %v4292_v12, 9  ;;  %v4418_v11 = vrot.slane %v10970_v59, 5  ;;  %v3794_v19 = vrot.slane %v3792_v7, 5  ;;  %v4421_v0 = vrot.slane %v10981_v45, 5 }
 0x2da   : > { %v3789_v63 = vor.u32 %v3788_v41, %v3784_v28  ;;  %v3797_v9 = vshrl.u32 %v3580_v27, 16  ;;  %v3780_v47 = vrot.slane %v3779_v25, 4  ;;  %v3800_v6 = vshll.u32 %v3580_v27, 16 }
 0x2db   : > { %v11011_v50 = vsel %vm10456_vm14, %v7696_v57, %v4418_v11  ;;  %v4420_v49 = vrot.slane %v4418_v11, 4  ;;  %v3806_v22 = vshll.u32 %v10901_v10, 16  ;;  %v3816_v15 = vshll.u32 %v10916_v37, 16 }
 0x2dc   : > { %8478 = vmatmul.mubr.msk.bf16.vlgmr.msra.gmra.mxu0 %vm2234_vm5, %v10818_v20  ;;  %v3790_v34 = vrot.slane %v3789_v63, 4  ;;  %v3799_v52 = vrot.slane %v3797_v9, 4  ;;  %v3810_v20 = vshrl.u32 %v10901_v10, 16  ;;  %v3785_v61 = vsel %vm9848_vm8, %v3780_v47, %v3784_v28 }
 0x2dd   : > { %8544 = vmatpush3.bf16.msra.mxu0 %v10789_v17  ;;  %8481 = vmatprep.mubr.msk.bf16.mxu0 %vm2234_vm5, %v10850_v23  ;;  %v4422_v35 = vsel %vm10456_vm14, %v4420_v49, %v4421_v0  ;;  %v3802_v60 = vrot.slane %v3800_v6, 5  ;;  %v11025_v17 = vld [vmem:[#allocation2 + $0x98] sm:$0x1]  ;;  %v3808_v53 = vrot.slane %v3806_v22, 5  ;;  %v3818_v12 = vrot.slane %v3816_v15, 5 }
 0x2de   : > { %8726 = vmatprep.subr.msk.bf16.mxu0 %vm2283_vm4, %v11005_v3  ;;  %v3795_v23 = vsel %vm9848_vm8, %v3790_v34, %v3794_v19  ;;  %v7713_v10 = vcombine.low %v11011_v50, %v4422_v35  ;;  %v3812_v39 = vrot.slane %v3810_v20, 4  ;;  %v7697_v16 = vrot.slane %v4293_v14, 9  ;;  %v11050_v19 = vld [vmem:[#allocation2 + $0xa4] sm:$0x1]  ;;  %v11056_v0 = vld [vmem:[#allocation2 + $0xa0] sm:$0xf] }
 0x2df   : > { %v11032_v4 = vcombine.low %v3785_v61, %v3795_v23  ;;  %v3803_v44 = vor.u32 %v3802_v60, %v3799_v52  ;;  %v4425_v46 = vrot.slane %v11013_v2, 5  ;;  %v4428_v43 = vrot.slane %v11025_v17, 5 }
 0x2e0   : > { %8524 = vmatmul.mubr.msk.bf16.gmra.mxu1 %vm2234_vm5, %v7710_v30  ;;  %v3813_v37 = vor.u32 %v3812_v39, %v3808_v53  ;;  %v3821_v28 = vshrl.u32 %v3583_v24, 16  ;;  %v3824_v41 = vshll.u32 %v3583_v24, 16  ;;  %v3830_v7 = vshll.u32 %v10932_v29, 16  ;;  %v11071_v24 = vld [vmem:[#allocation2 + $0xac] sm:$0xf] }
 0x2e1   : > { %8527 = vmatprep.mubr.msk.bf16.mxu1 %vm2234_vm5, %v7711_v38  ;;  %v3804_v27 = vrot.slane %v3803_v44, 4  ;;  %v3834_v25 = vshrl.u32 %v10932_v29, 16  ;;  %v11048_v57 = vsel %vm10456_vm14, %v7697_v16, %v4425_v46  ;;  %v4427_v11 = vrot.slane %v4425_v46, 4  ;;  %v4295_v44 = vld [vmem:[#allocation2 + $0xa8] sm:$0xe] }
 0x2e2   : > { %v3814_v30 = vrot.slane %v3813_v37, 4  ;;  %v3823_v63 = vrot.slane %v3821_v28, 4  ;;  %v3826_v33 = vrot.slane %v3824_v41, 5  ;;  %v3832_v38 = vrot.slane %v3830_v7, 5 }
 0x2e3   : > { %v3809_v55 = vsel %vm9848_vm8, %v3804_v27, %v3808_v53  ;;  %v3836_v29 = vrot.slane %v3834_v25, 4  ;;  %v4429_v47 = vsel %vm10456_vm14, %v4427_v11, %v4428_v43  ;;  %v3840_v50 = vshll.u32 %v10942_v26, 16 }
 0x2e4   : > { %8482 = vmatmul.mubr.msk.bf16.gmra.mxu0 %vm2234_vm5, %v10878_v51  ;;  %v3819_v9 = vsel %vm9848_vm8, %v3814_v30, %v3818_v12  ;;  %v7698_v51 = vrot.slane %v4294_v13, 9  ;;  %v7714_v6 = vcombine.low %v11048_v57, %v4429_v47  ;;  %v3827_v34 = vor.u32 %v3826_v33, %v3823_v63 }
 0x2e5   : > { %8485 = vmatprep.mubr.msk.bf16.mxu0 %vm2234_vm5, %v10926_v32  ;;  %v11065_v49 = vcombine.low %v3809_v55, %v3819_v9  ;;  %v3837_v52 = vor.u32 %v3836_v29, %v3832_v38  ;;  %v3842_v22 = vrot.slane %v3840_v50, 5  ;;  %v4432_v20 = vrot.slane %v11056_v0, 5  ;;  %v4296_v9 = vld [vmem:[#allocation2 + $0xb4] sm:$0xe] }
 0x2e6   : > { %v4435_v32 = vrot.slane %v11050_v19, 5  ;;  %v3845_v14 = vshrl.u32 %v3586_v42, 16  ;;  %v3828_v61 = vrot.slane %v3827_v34, 4  ;;  %v3848_v60 = vshll.u32 %v3586_v42, 16  ;;  %v11107_v34 = vld [vmem:[#allocation2 + $0xb8] sm:$0xf] }
 0x2e7   : > { %v3838_v35 = vrot.slane %v3837_v52, 4  ;;  %v3854_v15 = vshll.u32 %v10970_v59, 16  ;;  %v4433_v26 = vsel %vm10456_vm14, %v7698_v51, %v4432_v20  ;;  %v4434_v23 = vrot.slane %v4432_v20, 4  ;;  %v11109_v52 = vld [vmem:[#allocation2 + $0xbc] sm:$0x1] }
 0x2e8   : > { %8528 = vmatmul.mubr.msk.bf16.gmra.mxu1 %vm2234_vm5, %v7712_v36  ;;  %v3847_v53 = vrot.slane %v3845_v14, 4  ;;  %v3858_v39 = vshrl.u32 %v10970_v59, 16  ;;  %v3833_v12 = vsel %vm9848_vm8, %v3828_v61, %v3832_v38  ;;  %v3850_v37 = vrot.slane %v3848_v60, 5  ;;  %v3589_v36 = vld [vmem:[#allocation2 + $0x90] sm:$0xf] }
 0x2e9   : > { %8531 = vmatprep.mubr.msk.bf16.mxu1 %vm2234_vm5, %v7713_v10  ;;  %v3843_v16 = vsel %vm9848_vm8, %v3838_v35, %v3842_v22  ;;  %v3856_v8 = vrot.slane %v3854_v15, 5  ;;  %v4436_v43 = vsel %vm10456_vm14, %v4434_v23, %v4435_v32  ;;  %v3864_v28 = vshll.u32 %v10981_v45, 16 }
 0x2ea   : > { %v11087_v46 = vcombine.low %v3833_v12, %v3843_v16  ;;  %v3860_v59 = vrot.slane %v3858_v39, 4  ;;  %v7715_v10 = vcombine.low %v4433_v26, %v4436_v43  ;;  %v3851_v27 = vor.u32 %v3850_v37, %v3847_v53  ;;  %v4297_v16 = vld [vmem:[#allocation2 + $0xc0] sm:$0xe]  ;;  %v3595_v37 = vld [vmem:[#allocation2 + $0xa8] sm:$0xf] }
 0x2eb   : > { %v7699_v41 = vrot.slane %v4295_v44, 9  ;;  %v4439_v7 = vrot.slane %v11071_v24, 5  ;;  %v3866_v13 = vrot.slane %v3864_v28, 5  ;;  %v4442_v42 = vrot.slane %v11085_v48, 5 }
 0x2ec   : > { %8486 = vmatmul.mubr.msk.bf16.gmra.mxu0 %vm2234_vm5, %v10961_v62  ;;  %v3861_v25 = vor.u32 %v3860_v59, %v3856_v8  ;;  %v3869_v30 = vshrl.u32 %v3589_v36, 16  ;;  %v3852_v57 = vrot.slane %v3851_v27, 4  ;;  %v3872_v63 = vshll.u32 %v3589_v36, 16  ;;  %v3592_v62 = vld [vmem:[#allocation2 + $0x9c] sm:$0xf] }
 0x2ed   : > { %8489 = vmatprep.mubr.msk.bf16.mxu0 %vm2234_vm5, %v10987_v56  ;;  %v4440_v45 = vsel %vm10456_vm14, %v7699_v41, %v4439_v7  ;;  %v4441_v11 = vrot.slane %v4439_v7, 4  ;;  %v3878_v38 = vshll.u32 %v11013_v2, 16  ;;  %v3882_v29 = vshrl.u32 %v11013_v2, 16  ;;  %v11111_v22 = vpop.f32.mrf.mxu1  ;;  %v11133_v7 = vld [vmem:[#allocation2 + $0xc4] sm:$0xf] }
 0x2ee   : > { %v3862_v55 = vrot.slane %v3861_v25, 4  ;;  %v3871_v33 = vrot.slane %v3869_v30, 4  ;;  %v3857_v56 = vsel %vm9848_vm8, %v3852_v57, %v3856_v8  ;;  %v3874_v50 = vrot.slane %v3872_v63, 5 }
 0x2ef   : > { %v4443_v47 = vsel %vm10456_vm14, %v4441_v11, %v4442_v42  ;;  %v3888_v51 = vshll.u32 %v11025_v17, 16  ;;  %v3880_v32 = vrot.slane %v3878_v38, 5  ;;  %v3884_v14 = vrot.slane %v3882_v29, 4  ;;  %v11123_v8 = vpop.f32.mrf.mxu1 }
 0x2f0   : > { %8532 = vmatmul.mubr.msk.bf16.gmra.mxu1 %vm2234_vm5, %v7714_v6  ;;  %v3867_v2 = vsel %vm9848_vm8, %v3862_v55, %v3866_v13  ;;  %v7716_v20 = vcombine.low %v4440_v45, %v4443_v47  ;;  %v3875_v35 = vor.u32 %v3874_v50, %v3871_v33  ;;  %v7700_v17 = vrot.slane %v4296_v9, 9 }
 0x2f1   : > { %8535 = vmatprep.mubr.msk.bf16.mxu1 %vm2234_vm5, %v7715_v10  ;;  %v7664_v61 = vcombine.low %v3857_v56, %v3867_v2  ;;  %v3890_v60 = vrot.slane %v3888_v51, 5  ;;  %v3885_v15 = vor.u32 %v3884_v14, %v3880_v32  ;;  %v4446_v26 = vrot.slane %v11107_v34, 5  ;;  %v11140_v63 = vpop.f32.mrf.mxu1 }
 0x2f2   : > { %v4449_v23 = vrot.slane %v11109_v52, 5  ;;  %v3893_v53 = vshrl.u32 %v3592_v62, 16  ;;  %v3876_v6 = vrot.slane %v3875_v35, 4  ;;  %v3896_v39 = vshll.u32 %v3592_v62, 16 }
 0x2f3   : > { %v3902_v44 = vshll.u32 %v11056_v0, 16  ;;  %v3906_v12 = vshrl.u32 %v11056_v0, 16  ;;  %v3886_v36 = vrot.slane %v3885_v15, 4  ;;  %v4447_v43 = vsel %vm10456_vm14, %v7700_v17, %v4446_v26  ;;  %v11156_v17 = vld [vmem:[#allocation2 + $0x1c] sm:$0xf]  ;;  %v11158_v15 = vpop.f32.mrf.mxu1 }
 0x2f4   : > { %8490 = vmatmul.mubr.msk.bf16.gmra.mxu0 %vm2234_vm5, %v11032_v4  ;;  %v4448_v59 = vrot.slane %v4446_v26, 4  ;;  %v3895_v28 = vrot.slane %v3893_v53, 4  ;;  %v11129_v4 = vld [vmem:[#allocation2 + $0xc8] sm:$0x1]  ;;  %v3881_v10 = vsel %vm9848_vm8, %v3876_v6, %v3880_v32  ;;  %v3898_v27 = vrot.slane %v3896_v39, 5 }
 0x2f5   : > { %8493 = vmatprep.mubr.msk.bf16.mxu0 %vm2234_vm5, %v11065_v49  ;;  %v3904_v0 = vrot.slane %v3902_v44, 5  ;;  %v3908_v41 = vrot.slane %v3906_v12, 4  ;;  %v3891_v25 = vsel %vm9848_vm8, %v3886_v36, %v3890_v60  ;;  %v3912_v13 = vshll.u32 %v11050_v19, 16  ;;  %v11164_v53 = vld [vmem:[#allocation2 + $0x20] sm:$0x1] }
 0x2f6   : > { %v4450_v49 = vsel %vm10456_vm14, %v4448_v59, %v4449_v23  ;;  %v7701_v42 = vrot.slane %v4297_v16, 9  ;;  %v7665_v30 = vcombine.low %v3881_v10, %v3891_v25  ;;  %v3899_v45 = vor.u32 %v3898_v27, %v3895_v28  ;;  %v3598_v16 = vld [vmem:[#allocation2 + $0xb4] sm:$0xf] }
 0x2f7   : > { %v7717_v57 = vcombine.low %v4447_v43, %v4450_v49  ;;  %v3909_v11 = vor.u32 %v3908_v41, %v3904_v0  ;;  %v3914_v62 = vrot.slane %v3912_v13, 5  ;;  %v4453_v55 = vrot.slane %v11133_v7, 5 }
 0x2f8   : > { %8536 = vmatmul.mubr.msk.bf16.gmra.mxu1 %vm2234_vm5, %v7716_v20  ;;  %v4456_v33 = vrot.slane %v11129_v4, 5  ;;  %v3917_v38 = vshrl.u32 %v3595_v37, 16  ;;  %v3900_v29 = vrot.slane %v3899_v45, 4  ;;  %v3920_v19 = vshll.u32 %v3595_v37, 16  ;;  %v5111_v20 = vld [vmem:[#allocation2 + $0x18] sm:$0xf] }
 0x2f9   : > { %8539 = vmatprep.mubr.msk.bf16.mxu1 %vm2234_vm5, %v7717_v57  ;;  %v3910_v9 = vrot.slane %v3909_v11, 4  ;;  %v3926_v56 = vshll.u32 %v11071_v24, 16  ;;  %v4454_v47 = vsel %vm10456_vm14, %v7701_v42, %v4453_v55  ;;  %v4455_v50 = vrot.slane %v4453_v55, 4 }
 0x2fa   : > { %v3919_v51 = vrot.slane %v3917_v38, 4  ;;  %v3930_v2 = vshrl.u32 %v11071_v24, 16  ;;  %v3905_v32 = vsel %vm9848_vm8, %v3900_v29, %v3904_v0  ;;  %v3922_v35 = vrot.slane %v3920_v19, 5  ;;  %v11169_v0 = vpop.f32.mrf.mxu1  ;;  %v5114_v38 = vld [vmem:[#allocation2 + $0x24] sm:$0xf] }
 0x2fb   : > { %v3915_v14 = vsel %vm9848_vm8, %v3910_v9, %v3914_v62  ;;  %v3928_v60 = vrot.slane %v3926_v56, 5  ;;  %v4457_v24 = vsel %vm10456_vm14, %v4455_v50, %v4456_v33  ;;  %v5160_v44 = vshrl.u32 %v5111_v20, 16 }
 0x2fc   : > { %8494 = vmatmul.mubr.msk.bf16.gmra.mxu0 %vm2234_vm5, %v11087_v46  ;;  %v7666_v26 = vcombine.low %v3905_v32, %v3915_v14  ;;  %v3932_v23 = vrot.slane %v3930_v2, 4  ;;  %v3936_v46 = vshll.u32 %v11085_v48, 16  ;;  %v7718_v6 = vcombine.low %v4454_v47, %v4457_v24  ;;  %v11179_v47 = vld [vmem:[#allocation2 + $0x28] sm:$0xf]  ;;  %v11181_v50 = vpop.f32.mrf.mxu1 }
 0x2fd   : > { %8497 = vmatprep.mubr.msk.bf16.mxu0 %vm2234_vm5, %v7664_v61  ;;  %v3923_v39 = vor.u32 %v3922_v35, %v3919_v51  ;;  %v5163_v12 = vshll.u32 %v5111_v20, 16  ;;  %v5169_v43 = vshll.u32 %v11156_v17, 16  ;;  %v5173_v61 = vshrl.u32 %v11156_v17, 16 }
 0x2fe   : > { %v3933_v37 = vor.u32 %v3932_v23, %v3928_v60  ;;  %v3938_v36 = vrot.slane %v3936_v46, 5  ;;  %v5162_v28 = vrot.slane %v5160_v44, 4  ;;  %v5179_v27 = vshll.u32 %v11164_v53, 16 }
 0x2ff   : > { %v3924_v59 = vrot.slane %v3923_v39, 4  ;;  %v5165_v10 = vrot.slane %v5163_v12, 5  ;;  %v5171_v41 = vrot.slane %v5169_v43, 5  ;;  %v5175_v25 = vrot.slane %v5173_v61, 4  ;;  %v11194_v12 = vpop.f32.mrf.mxu1 }
 0x300   : > { %8540 = vmatmul.mubr.msk.bf16.gmra.mxu1 %vm2234_vm5, %v7718_v6  ;;  %v3934_v48 = vrot.slane %v3933_v37, 4  ;;  %v3941_v49 = vshrl.u32 %v3598_v16, 16  ;;  %v5181_v57 = vrot.slane %v5179_v27, 5  ;;  %v3944_v45 = vshll.u32 %v3598_v16, 16 }
 0x301   : > { %v3929_v13 = vsel %vm9848_vm8, %v3924_v59, %v3928_v60  ;;  %v5166_v42 = vor.u32 %v5165_v10, %v5162_v28  ;;  %v5176_v62 = vor.u32 %v5175_v25, %v5171_v41  ;;  %v3950_v33 = vshll.u32 %v11107_v34, 16 }
 0x302   : > { %v3939_v11 = vsel %vm9848_vm8, %v3934_v48, %v3938_v36  ;;  %v3943_v55 = vrot.slane %v3941_v49, 4  ;;  %v3946_v19 = vrot.slane %v3944_v45, 5  ;;  %v3954_v56 = vshrl.u32 %v11107_v34, 16  ;;  %v11189_v34 = vld [vmem:[#allocation2 + $0x2c] sm:$0x1] }
 0x303   : > { %v7667_v29 = vcombine.low %v3929_v13, %v3939_v11  ;;  %v5167_v9 = vrot.slane %v5166_v42, 4  ;;  %v5177_v51 = vrot.slane %v5176_v62, 4  ;;  %v3952_v2 = vrot.slane %v3950_v33, 5  ;;  %v5117_v49 = vld [vmem:[#allocation2 + $0x30] sm:$0xf]  ;;  %v11208_v62 = vpop.f32.mrf.mxu1 }
 0x304   : > { %8498 = vmatmul.mubr.msk.bf16.gmra.mxu0 %vm2234_vm5, %v7665_v30  ;;  %v3960_v20 = vshll.u32 %v11109_v52, 16  ;;  %v5642_v32 = vsel %vm2283_vm4, %v10665_v58, 0  ;;  %v3947_v14 = vor.u32 %v3946_v19, %v3943_v55  ;;  %v3956_v35 = vrot.slane %v3954_v56, 4  ;;  %v3601_v52 = vld [vmem:[#allocation2 + $0xc0] sm:$0xf] }
 0x305   : > { %8501 = vmatprep.mubr.msk.bf16.mxu0 %vm2234_vm5, %v7666_v26  ;;  %v5172_v30 = vsel %vm9848_vm8, %v5167_v9, %v5171_v41  ;;  %8578 = vmatpush3.bf16.msra.mxu1 %v5642_v32  ;;  %v5184_v60 = vshrl.u32 %v5114_v38, 16  ;;  %v5182_v24 = vsel %vm9848_vm8, %v5177_v51, %v5181_v57  ;;  %v5187_v23 = vshll.u32 %v5114_v38, 16  ;;  %v11206_v11 = vld [vmem:[#allocation2 + $0x34] sm:$0xf]  ;;  %v11214_v32 = vld [vmem:[#allocation2 + $0x38] sm:$0x1] }
 0x306   : > { %v3962_v26 = vrot.slane %v3960_v20, 5  ;;  %v5193_v46 = vshll.u32 %v11179_v47, 16  ;;  %v7769_v6 = vcombine.low %v5172_v30, %v5182_v24  ;;  %v3948_v39 = vrot.slane %v3947_v14, 4 }
 0x307   : > { %v3957_v58 = vor.u32 %v3956_v35, %v3952_v2  ;;  %v5186_v44 = vrot.slane %v5184_v60, 4  ;;  %v5189_v16 = vrot.slane %v5187_v23, 5  ;;  %v5197_v36 = vshrl.u32 %v11179_v47, 16  ;;  %v5120_v23 = vld [vmem:[#allocation2 + $0x3c] sm:$0xf] }
 0x308   : > { %v5195_v37 = vrot.slane %v5193_v46, 5  ;;  %v5203_v43 = vshll.u32 %v11189_v34, 16  ;;  %8579 = vmatprep.mubr.msk.bf16.mxu1 %vm2234_vm5, %v7769_v6  ;;  %v3953_v61 = vsel %vm9848_vm8, %v3948_v39, %v3952_v2  ;;  %v3965_v28 = vshrl.u32 %v3601_v52, 16 }
 0x309   : > { %v3958_v59 = vrot.slane %v3957_v58, 4  ;;  %v3968_v10 = vshll.u32 %v3601_v52, 16  ;;  %v5190_v27 = vor.u32 %v5189_v16, %v5186_v44  ;;  %v5199_v48 = vrot.slane %v5197_v36, 4  ;;  %v11224_v44 = vld [vmem:[#allocation2 + $0x40] sm:$0xf] }
 0x30a   : > { %v5205_v41 = vrot.slane %v5203_v43, 5  ;;  %v3974_v25 = vshll.u32 %v11133_v7, 16  ;;  %v3967_v42 = vrot.slane %v3965_v28, 4  ;;  %v3978_v45 = vshrl.u32 %v11133_v7, 16 }
 0x30b   : > { %v3963_v13 = vsel %vm9848_vm8, %v3958_v59, %v3962_v26  ;;  %v3970_v57 = vrot.slane %v3968_v10, 5  ;;  %v5191_v33 = vrot.slane %v5190_v27, 4  ;;  %v5200_v38 = vor.u32 %v5199_v48, %v5195_v37  ;;  %v11233_v27 = vld [vmem:[#allocation2 + $0x44] sm:$0x1] }
 0x30c   : > { %8502 = vmatmul.mubr.msk.bf16.gmra.mxu0 %vm2234_vm5, %v7667_v29  ;;  %v7668_v55 = vcombine.low %v3953_v61, %v3963_v13  ;;  %v3976_v9 = vrot.slane %v3974_v25, 5  ;;  %v3980_v56 = vrot.slane %v3978_v45, 4  ;;  %v3984_v51 = vshll.u32 %v11129_v4, 16  ;;  %v11219_v4 = vpop.f32.mrf.mxu1 }
 0x30d   : > { %v3971_v19 = vor.u32 %v3970_v57, %v3967_v42  ;;  %v5208_v29 = vshrl.u32 %v5117_v49, 16  ;;  %v8343_v2 = vpop.f32.mrf.mxu0  ;;  %v5196_v20 = vsel %vm9848_vm8, %v5191_v33, %v5195_v37  ;;  %v5201_v7 = vrot.slane %v5200_v38, 4  ;;  %v5123_v57 = vld [vmem:[#allocation2 + $0x48] sm:$0xf]  ;;  %v8819_v38 = vld [vmem:[#allocation2 + $0x18] sm:$0xff]  }
 0x30e   : > { %8505 = vmatprep.mubr.msk.bf16.mxu0 %vm2234_vm5, %v7668_v55  ;;  %v5211_v30 = vshll.u32 %v5117_v49, 16  ;;  %v5217_v14 = vshll.u32 %v11206_v11, 16  ;;  %v3981_v60 = vor.u32 %v3980_v56, %v3976_v9  ;;  %v3986_v24 = vrot.slane %v3984_v51, 5  ;;  %v11231_v59 = vpop.f32.mrf.mxu1 }
 0x30f   : > { %v3972_v35 = vrot.slane %v3971_v19, 4  ;;  %v5210_v26 = vrot.slane %v5208_v29, 4  ;;  %v11217_v46 = vpop.f32.mrf.mxu0  ;;  %v5206_v52 = vsel %vm9848_vm8, %v5201_v7, %v5205_v41  ;;  %v5221_v58 = vshrl.u32 %v11206_v11, 16 }
 0x310   : > { %v5213_v6 = vrot.slane %v5211_v30, 5  ;;  %v5219_v39 = vrot.slane %v5217_v14, 5  ;;  %v7770_v16 = vcombine.low %v5196_v20, %v5206_v52  ;;  %v3982_v36 = vrot.slane %v3981_v60, 4  ;;  %v11242_v56 = vpop.f32.mrf.mxu1  ;;  %v11245_v30 = vld [vmem:[#allocation2 + $0x4c] sm:$0xf] }
 0x311   : > { %v3977_v37 = vsel %vm9848_vm8, %v3972_v35, %v3976_v9  ;;  %v5227_v43 = vshll.u32 %v11214_v32, 16  ;;  %v11229_v61 = vpop.f32.mrf.mxu0  ;;  %v5223_v10 = vrot.slane %v5221_v58, 4  ;;  %v5232_v48 = vshrl.u32 %v5120_v23, 16 }
 0x312   : > { %v5214_v28 = vor.u32 %v5213_v6, %v5210_v26  ;;  %v5235_v41 = vshll.u32 %v5120_v23, 16  ;;  %8580 = vmatmul.mubr.msk.bf16.vlgmr.msra.gmra.mxu1 %vm2234_vm5, %v7770_v16  ;;  %v3987_v25 = vsel %vm9848_vm8, %v3982_v36, %v3986_v24  ;;  %v5241_v13 = vshll.u32 %v11224_v44, 16  ;;  %v11254_v6 = vld [vmem:[#allocation2 + $0x50] sm:$0x1] }
 0x313   : > { %v5229_v49 = vrot.slane %v5227_v43, 5  ;;  %v5245_v42 = vshrl.u32 %v11224_v44, 16  ;;  %v7669_v45 = vcombine.low %v3977_v37, %v3987_v25  ;;  %v5224_v33 = vor.u32 %v5223_v10, %v5219_v39  ;;  %v11240_v19 = vpop.f32.mrf.mxu0 }
 0x314   : > { %v5215_v55 = vrot.slane %v5214_v28, 4  ;;  %v5234_v9 = vrot.slane %v5232_v48, 4  ;;  %v5237_v51 = vrot.slane %v5235_v41, 5  ;;  %v5243_v29 = vrot.slane %v5241_v13, 5 }
 0x315   : > { %v5247_v20 = vrot.slane %v5245_v42, 4  ;;  %v5251_v7 = vshll.u32 %v11233_v27, 16  ;;  %8506 = vmatmul.mubr.msk.bf16.gmra.mxu0 %vm2234_vm5, %v7669_v45  ;;  %v5225_v35 = vrot.slane %v5224_v33, 4  ;;  %v11251_v60 = vadd.f32 %v11111_v22, %v8343_v2  ;;  %v11260_v22 = vpop.f32.mrf.mxu1  ;;  %v5126_v42 = vld [vmem:[#allocation2 + $0x54] sm:$0xf] }
 0x316   : > { %v5220_v14 = vsel %vm9848_vm8, %v5215_v55, %v5219_v39  ;;  %v5256_v24 = vshrl.u32 %v5123_v57, 16  ;;  %8545 = vmatprep.mubr.msk.bf16.mxu0 %vm2234_vm5, %v8819_v38  ;;  %v5238_v26 = vor.u32 %v5237_v51, %v5234_v9  ;;  %v5259_v58 = vshll.u32 %v5123_v57, 16  ;;  %v11272_v38 = vld [vmem:[#allocation2 + $0x58] sm:$0xf]  ;;  %v11274_v9 = vld [vmem:[#allocation2 + $0x5c] sm:$0x1] }
 0x317   : > { %v5248_v23 = vor.u32 %v5247_v20, %v5243_v29  ;;  %v5253_v52 = vrot.slane %v5251_v7, 5  ;;  %v5230_v16 = vsel %vm9848_vm8, %v5225_v35, %v5229_v49  ;;  %v5265_v36 = vshll.u32 %v11245_v30, 16  ;;  %v8820_v20 = vld [vmem:[#allocation2 + $0x24] sm:$0xff]   ;;  %v8821_v35 = vld [vmem:[#allocation2 + $0x30] sm:$0xff]  }
 0x318   : > { %v5258_v37 = vrot.slane %v5256_v24, 4  ;;  %v5269_v39 = vshrl.u32 %v11245_v30, 16  ;;  %v8347_v43 = vpop.f32.mrf.mxu0  ;;  %v7771_v2 = vcombine.low %v5220_v14, %v5230_v16  ;;  %v5239_v28 = vrot.slane %v5238_v26, 4  ;;  %v5129_v16 = vld [vmem:[#allocation2 + $0x60] sm:$0xf] }
 0x319   : > { %v5249_v10 = vrot.slane %v5248_v23, 4  ;;  %v5261_v48 = vrot.slane %v5259_v58, 5  ;;  %v5267_v41 = vrot.slane %v5265_v36, 5  ;;  %v5275_v13 = vshll.u32 %v11254_v6, 16 }
 0x31a   : > { %v5271_v25 = vrot.slane %v5269_v39, 4  ;;  %v2337_v57 = vpop.f32.mrf.mxu0  ;;  %8583 = vmatprep.mubr.msk.bf16.mxu1 %vm2234_vm5, %v7771_v2  ;;  %v5244_v49 = vsel %vm9848_vm8, %v5239_v28, %v5243_v29  ;;  %v11270_v33 = vadd.f32 %v11123_v8, %v11217_v46  ;;  %v6112_v14 = vsel %vm2283_vm4, %v11005_v3, 0 }
 0x31b   : > { %v5254_v45 = vsel %vm9848_vm8, %v5249_v10, %v5253_v52  ;;  %v5262_v55 = vor.u32 %v5261_v48, %v5258_v37  ;;  %v11280_v29 = vadd.f32 %v11140_v63, %v11229_v61  ;;  %v5277_v8 = vrot.slane %v5275_v13, 5  ;;  %v11287_v52 = vld [vmem:[%s12840_s7] sm:$0xf]  ;;  %v11302_v48 = vld [vmem:[#allocation2 + $0x64] sm:$0xf] }
 0x31c   : > { %v7772_v51 = vcombine.low %v5244_v49, %v5254_v45  ;;  %v5272_v7 = vor.u32 %v5271_v25, %v5267_v41  ;;  %v11282_v24 = vpop.f32.mrf.mxu1  ;;  %v5280_v46 = vshrl.u32 %v5126_v42, 16  ;;  %v5283_v23 = vshll.u32 %v5126_v42, 16  ;;  %12902 = vst [vmem:[#allocation22_spill] sm:$0xff] %v11287_v52  ;;  %v8348_v37 = vpop.f32.mrf.mxu0  ;;  %v11304_v25 = vld [vmem:[#allocation2 + $0x68] sm:$0x1] }
 0x31d   : > { %v5263_v26 = vrot.slane %v5262_v55, 4  ;;  %8546 = vmatmul.mubr.msk.bf16.vlgmr.msra.gmra.mxu0 %vm2234_vm5, %v8820_v20  ;;  %v5289_v58 = vshll.u32 %v11272_v38, 16  ;;  %v5293_v63 = vshrl.u32 %v11272_v38, 16  ;;  %v5299_v61 = vshll.u32 %v11274_v9, 16 }
 0x31e   : > { %8584 = vmatmul.mubr.msk.bf16.gmra.mxu1 %vm2234_vm5, %v7772_v51  ;;  %v5273_v3 = vrot.slane %v5272_v7, 4  ;;  %v11294_v36 = vpop.f32.mrf.mxu1  ;;  %8612 = vmatpush3.bf16.msra.mxu0 %v6112_v14  ;;  %v5282_v2 = vrot.slane %v5280_v46, 4  ;;  %v5285_v28 = vrot.slane %v5283_v23, 5  ;;  %v11300_v10 = vadd.f32 %v11169_v0, %v8347_v43  ;;  %v8822_v23 = vld [vmem:[#allocation2 + $0x3c] sm:$0xff]  }
 0x31f   : > { %v5268_v39 = vsel %vm9848_vm8, %v5263_v26, %v5267_v41  ;;  %8549 = vmatprep.mubr.msk.bf16.mxu0 %vm2234_vm5, %v8821_v35  ;;  %v5291_v42 = vrot.slane %v5289_v58, 5  ;;  %v5295_v49 = vrot.slane %v5293_v63, 4  ;;  %v5301_v45 = vrot.slane %v5299_v61, 5  ;;  %8728 = vmatprep.subr.msk.bf16.mxu0 %vm529_vm0, %v11287_v52  ;;  %v2340_v26 = vpop.f32.mrf.mxu0  ;;  %v5132_v61 = vld [vmem:[#allocation2 + $0x6c] sm:$0xf] }
 0x320   : > { %v5278_v13 = vsel %vm9848_vm8, %v5273_v3, %v5277_v8  ;;  %v11308_v55 = vpop.f32.mrf.mxu1  ;;  %v5286_v51 = vor.u32 %v5285_v28, %v5282_v2  ;;  %v5304_v20 = vshrl.u32 %v5129_v16, 16  ;;  %v5307_v0 = vshll.u32 %v5129_v16, 16 }
 0x321   : > { %v7773_v41 = vcombine.low %v5268_v39, %v5278_v13  ;;  %v5296_v43 = vor.u32 %v5295_v49, %v5291_v42  ;;  %v5313_v7 = vshll.u32 %v11302_v48, 16  ;;  %v5317_v14 = vshrl.u32 %v11302_v48, 16  ;;  %v11321_v13 = vld [vmem:[#allocation2 + $0x70] sm:$0xf] }
 0x322   : > { %v5323_v35 = vshll.u32 %v11304_v25, 16  ;;  %v11315_v8 = vpop.f32.mrf.mxu1  ;;  %v5287_v46 = vrot.slane %v5286_v51, 4  ;;  %v5306_v3 = vrot.slane %v5304_v20, 4  ;;  %v5309_v58 = vrot.slane %v5307_v0, 5 }
 0x323   : > { %8587 = vmatprep.mubr.msk.bf16.mxu1 %vm2234_vm5, %v7773_v41  ;;  %v11319_v63 = vadd.f32 %v11181_v50, %v2337_v57  ;;  %v5297_v16 = vrot.slane %v5296_v43, 4  ;;  %v5315_v39 = vrot.slane %v5313_v7, 5  ;;  %v5319_v2 = vrot.slane %v5317_v14, 4  ;;  %v11331_v50 = vld [vmem:[#allocation2 + $0x74] sm:$0x1] }
 0x324   : > { %v5325_v28 = vrot.slane %v5323_v35, 5  ;;  %v5292_v49 = vsel %vm9848_vm8, %v5287_v46, %v5291_v42  ;;  %v5310_v40 = vor.u32 %v5309_v58, %v5306_v3  ;;  %v11326_v41 = vadd.f32 %v11194_v12, %v8348_v37  ;;  %v5135_v37 = vld [vmem:[#allocation2 + $0x78] sm:$0xf]  ;;  %v11342_v3 = vld [vmem:[#allocation2 + $0x7c] sm:$0xf] }
 0x325   : > { %12903 = vst [vmem:[#allocation23_spill] sm:$0xff] %v11319_v63  ;;  %v11329_v51 = vadd.f32 %v11208_v62, %v2340_v26  ;;  %v5302_v57 = vsel %vm9848_vm8, %v5297_v16, %v5301_v45  ;;  %8550 = vmatmul.mubr.msk.bf16.gmra.mxu0 %vm2234_vm5, %v8822_v23  ;;  %v5320_v20 = vor.u32 %v5319_v2, %v5315_v39  ;;  %v5328_v0 = vshrl.u32 %v5132_v61, 16  ;;  %v11336_v7 = vpop.f32.mrf.mxu1  ;;  %v11352_v2 = vld [vmem:[#allocation2 + $0x80] sm:$0x1] }
 0x326   : > { %12904 = vst [vmem:[#allocation24_spill] sm:$0xff] %v11326_v41  ;;  %v5331_v43 = vshll.u32 %v5132_v61, 16  ;;  %v7774_v42 = vcombine.low %v5292_v49, %v5302_v57  ;;  %v5311_v14 = vrot.slane %v5310_v40, 4  ;;  %8553 = vmatprep.mubr.msk.bf16.mxu0 %vm2234_vm5, %v8823_v54  ;;  %v5337_v12 = vshll.u32 %v11321_v13, 16 }
 0x327   : > { %12905 = vst [vmem:[#allocation25_spill] sm:$0xff] %v11329_v51  ;;  %v5341_v62 = vshrl.u32 %v11321_v13, 16  ;;  %v5321_v35 = vrot.slane %v5320_v20, 4  ;;  %v5330_v26 = vrot.slane %v5328_v0, 4  ;;  %v5347_v45 = vshll.u32 %v11331_v50, 16  ;;  %v8351_v23 = vpop.f32.mrf.mxu0  ;;  %v11344_v58 = vpop.f32.mrf.mxu1 }
 0x328   : > { %v5333_v46 = vrot.slane %v5331_v43, 5  ;;  %8588 = vmatmul.mubr.msk.bf16.gmra.mxu1 %vm2234_vm5, %v7774_v42  ;;  %v5316_v54 = vsel %vm9848_vm8, %v5311_v14, %v5315_v39  ;;  %v5339_v40 = vrot.slane %v5337_v12, 5  ;;  %v11350_v16 = vadd.f32 %v11219_v4, %v8351_v23 }
 0x329   : > { %v5343_v61 = vrot.slane %v5341_v62, 4  ;;  %v5326_v49 = vsel %vm9848_vm8, %v5321_v35, %v5325_v28  ;;  %v5349_v20 = vrot.slane %v5347_v45, 5  ;;  %v5352_v0 = vshrl.u32 %v5135_v37, 16  ;;  %v2353_v43 = vpop.f32.mrf.mxu0  ;;  %v11356_v1 = vpop.f32.mrf.mxu1  ;;  %v5138_v28 = vld [vmem:[#allocation2 + $0x84] sm:$0xf] }
 0x32a   : > { %12906 = vst [vmem:[#allocation26_spill] sm:$0xff] %v11350_v16  ;;  %v5334_v57 = vor.u32 %v5333_v46, %v5330_v26  ;;  %v7775_v42 = vcombine.low %v5316_v54, %v5326_v49  ;;  %v5355_v39 = vshll.u32 %v5135_v37, 16  ;;  %v5361_v14 = vshll.u32 %v11342_v3, 16  ;;  %v8825_v54 = vld [vmem:[#allocation2 + $0x60] sm:$0xff]  }
 0x32b   : > { %v5344_v21 = vor.u32 %v5343_v61, %v5339_v40  ;;  %v5354_v4 = vrot.slane %v5352_v0, 4  ;;  %v5365_v62 = vshrl.u32 %v11342_v3, 16  ;;  %v5371_v23 = vshll.u32 %v11352_v2, 16  ;;  %v8352_v52 = vpop.f32.mrf.mxu0  ;;  %v11361_v35 = vpop.f32.mrf.mxu1  ;;  %v11367_v61 = vld [vmem:[#allocation2 + $0x88] sm:$0xf] }
 0x32c   : > { %v5335_v12 = vrot.slane %v5334_v57, 4  ;;  %12907 = vst [vmem:[#allocation27_spill] sm:$0xff] %v11361_v35  ;;  %8591 = vmatprep.mubr.msk.bf16.mxu1 %vm2234_vm5, %v7775_v42  ;;  %v5357_v46 = vrot.slane %v5355_v39, 5  ;;  %v5363_v45 = vrot.slane %v5361_v14, 5  ;;  %v11365_v37 = vadd.f32 %v11231_v59, %v2353_v43 }
 0x32d   : > { %v5345_v26 = vrot.slane %v5344_v21, 4  ;;  %8554 = vmatmul.mubr.msk.bf16.gmra.mxu0 %vm2234_vm5, %v8824_v18  ;;  %v5367_v57 = vrot.slane %v5365_v62, 4  ;;  %v5373_v0 = vrot.slane %v5371_v23, 5  ;;  %v11373_v35 = vadd.f32 %v11242_v56, %v8352_v52  ;;  %v2356_v42 = vpop.f32.mrf.mxu0  ;;  %v11375_v21 = vld [vmem:[#allocation2 + $0x8c] sm:$0x1] }
 0x32e   : > { %12908 = vst [vmem:[#allocation28_spill] sm:$0xff] %v11365_v37  ;;  %v5340_v49 = vsel %vm9848_vm8, %v5335_v12, %v5339_v40  ;;  %12910 = vst [vmem:[#allocation30_spill] sm:$0xff] %v11375_v21  ;;  %v5358_v59 = vor.u32 %v5357_v46, %v5354_v4  ;;  %8557 = vmatprep.mubr.msk.bf16.mxu0 %vm2234_vm5, %v8825_v54  ;;  %v11381_v43 = vadd.f32 %v11260_v22, %v2356_v42  ;;  %v11383_v14 = vpop.f32.mrf.mxu1  ;;  %v5141_v52 = vld [vmem:[#allocation2 + $0x90] sm:$0xf] }
 0x32f   : > { %12909 = vst [vmem:[#allocation29_spill] sm:$0xff] %v11373_v35  ;;  %v5350_v39 = vsel %vm9848_vm8, %v5345_v26, %v5349_v20  ;;  %v5376_v40 = vshrl.u32 %v5138_v28, 16  ;;  %v5368_v12 = vor.u32 %v5367_v57, %v5363_v45  ;;  %v5379_v62 = vshll.u32 %v5138_v28, 16  ;;  %v11388_v26 = vld [vmem:[#allocation2 + $0x94] sm:$0xf] }
 0x330   : > { %12911 = vst [vmem:[#allocation31_spill] sm:$0xff] %v11381_v43  ;;  %v7776_v18 = vcombine.low %v5340_v49, %v5350_v39  ;;  %v5385_v56 = vshll.u32 %v11367_v61, 16  ;;  %v5359_v23 = vrot.slane %v5358_v59, 4  ;;  %v5389_v37 = vshrl.u32 %v11367_v61, 16  ;;  %v11390_v22 = vpop.f32.mrf.mxu1  ;;  %v11398_v59 = vld [vmem:[#allocation2 + $0x98] sm:$0x1] }
 0x331   : > { %v5378_v35 = vrot.slane %v5376_v40, 4  ;;  %v5395_v20 = vshll.u32 %v11375_v21, 16  ;;  %v8355_v4 = vpop.f32.mrf.mxu0  ;;  %v5369_v46 = vrot.slane %v5368_v12, 4  ;;  %v5381_v54 = vrot.slane %v5379_v62, 5  ;;  %12913 = vst [vmem:[#allocation33_spill] sm:$0xff] %v11398_v59  ;;  %v8826_v62 = vld [vmem:[#allocation2 + $0x6c] sm:$0xff]  }
 0x332   : > { %8592 = vmatmul.mubr.msk.bf16.gmra.mxu1 %vm2234_vm5, %v7776_v18  ;;  %v5387_v49 = vrot.slane %v5385_v56, 5  ;;  %v11394_v28 = vadd.f32 %v11282_v24, %v8355_v4  ;;  %v5364_v57 = vsel %vm9848_vm8, %v5359_v23, %v5363_v45  ;;  %v5391_v42 = vrot.slane %v5389_v37, 4  ;;  %v11400_v16 = vpop.f32.mrf.mxu1  ;;  %v8827_v37 = vld [vmem:[#allocation2 + $0x78] sm:$0xff]  }
 0x333   : > { %v5397_v39 = vrot.slane %v5395_v20, 5  ;;  %v5400_v40 = vshrl.u32 %v5141_v52, 16  ;;  %v2369_v43 = vpop.f32.mrf.mxu0  ;;  %v5374_v18 = vsel %vm9848_vm8, %v5369_v46, %v5373_v0  ;;  %v5382_v12 = vor.u32 %v5381_v54, %v5378_v35  ;;  %v5144_v0 = vld [vmem:[#allocation2 + $0x9c] sm:$0xf] }
 0x334   : > { %12912 = vst [vmem:[#allocation32_spill] sm:$0xff] %v11394_v28  ;;  %v5403_v56 = vshll.u32 %v5141_v52, 16  ;;  %v5409_v24 = vshll.u32 %v11388_v26, 16  ;;  %v7777_v4 = vcombine.low %v5364_v57, %v5374_v18  ;;  %v5392_v28 = vor.u32 %v5391_v42, %v5387_v49  ;;  %v11406_v20 = vpop.f32.mrf.mxu1 }
 0x335   : > { %v5402_v51 = vrot.slane %v5400_v40, 4  ;;  %v5413_v45 = vshrl.u32 %v11388_v26, 16  ;;  %v8356_v23 = vpop.f32.mrf.mxu0  ;;  %12914 = vst [vmem:[#allocation34_spill] sm:$0xff] %v11406_v20  ;;  %v5383_v41 = vrot.slane %v5382_v12, 4  ;;  %8558 = vmatmul.mubr.msk.bf16.gmra.mxu0 %vm2234_vm5, %v8826_v62  ;;  %v5419_v35 = vshll.u32 %v11398_v59, 16 }
 0x336   : > { %v5405_v21 = vrot.slane %v5403_v56, 5  ;;  %v5411_v63 = vrot.slane %v5409_v24, 5  ;;  %8595 = vmatprep.mubr.msk.bf16.mxu1 %vm2234_vm5, %v7777_v4  ;;  %v5393_v52 = vrot.slane %v5392_v28, 4  ;;  %8561 = vmatprep.mubr.msk.bf16.mxu0 %vm2234_vm5, %v8827_v37  ;;  %v11413_v54 = vadd.f32 %v11294_v36, %v2369_v43  ;;  %v11418_v40 = vld [vmem:[#allocation2 + $0xa0] sm:$0xf] }
 0x337   : > { %v5415_v46 = vrot.slane %v5413_v45, 4  ;;  %v11416_v57 = vadd.f32 %v11308_v55, %v8356_v23  ;;  %v2372_v42 = vpop.f32.mrf.mxu0  ;;  %12917 = vst [vmem:[#allocation37_spill] sm:$0xff] %v11418_v40  ;;  %v5388_v18 = vsel %vm9848_vm8, %v5383_v41, %v5387_v49  ;;  %v5421_v62 = vrot.slane %v5419_v35, 5  ;;  %v11425_v28 = vld [vmem:[#allocation2 + $0xa4] sm:$0x1]  ;;  %v11427_v24 = vpop.f32.mrf.mxu1 }
 0x338   : > { %12915 = vst [vmem:[#allocation35_spill] sm:$0xff] %v11413_v54  ;;  %v5406_v12 = vor.u32 %v5405_v21, %v5402_v51  ;;  %v11423_v56 = vadd.f32 %v11315_v8, %v2372_v42  ;;  %12919 = vst [vmem:[#allocation39_spill] sm:$0xff] %v11425_v28  ;;  %v5398_v36 = vsel %vm9848_vm8, %v5393_v52, %v5397_v39  ;;  %v5424_v43 = vshrl.u32 %v5144_v0, 16  ;;  %v5147_v21 = vld [vmem:[#allocation2 + $0xa8] sm:$0xf]  ;;  %v8829_v54 = vld [vmem:[#allocation2 + $0x90] sm:$0xff]  }
 0x339   : > { %12916 = vst [vmem:[#allocation36_spill] sm:$0xff] %v11416_v57  ;;  %v5416_v55 = vor.u32 %v5415_v46, %v5411_v63  ;;  %v5427_v4 = vshll.u32 %v5144_v0, 16  ;;  %v7778_v45 = vcombine.low %v5388_v18, %v5398_v36  ;;  %v5433_v23 = vshll.u32 %v11418_v40, 16  ;;  %v8359_v51 = vpop.f32.mrf.mxu0  ;;  %v11433_v8 = vpop.f32.mrf.mxu1  ;;  %v8828_v18 = vld [vmem:[#allocation2 + $0x84] sm:$0xff]  }
 0x33a   : > { %12918 = vst [vmem:[#allocation38_spill] sm:$0xff] %v11423_v56  ;;  %v5407_v37 = vrot.slane %v5406_v12, 4  ;;  %v5437_v41 = vshrl.u32 %v11418_v40, 16  ;;  %v5426_v35 = vrot.slane %v5424_v43, 4  ;;  %v5443_v20 = vshll.u32 %v11425_v28, 16 }
 0x33b   : > { %v5417_v49 = vrot.slane %v5416_v55, 4  ;;  %v5429_v42 = vrot.slane %v5427_v4, 5  ;;  %v11436_v56 = vld [vmem:[#allocation2 + $0xac] sm:$0xf]  ;;  %8596 = vmatmul.mubr.msk.bf16.gmra.mxu1 %vm2234_vm5, %v7778_v45  ;;  %v5435_v0 = vrot.slane %v5433_v23, 5  ;;  %v11442_v46 = vadd.f32 %v11336_v7, %v8359_v51  ;;  %v2385_v36 = vpop.f32.mrf.mxu0  ;;  %v11446_v55 = vpop.f32.mrf.mxu1 }
 0x33c   : > { %12920 = vst [vmem:[#allocation40_spill] sm:$0xff] %v11436_v56  ;;  %v5412_v39 = vsel %vm9848_vm8, %v5407_v37, %v5411_v63  ;;  %v5439_v52 = vrot.slane %v5437_v41, 4  ;;  %v11444_v12 = vld [vmem:[#allocation2 + $0xb0] sm:$0x1]  ;;  %v5445_v57 = vrot.slane %v5443_v20, 5  ;;  %v5448_v45 = vshrl.u32 %v5147_v21, 16 }
 0x33d   : > { %12921 = vst [vmem:[#allocation41_spill] sm:$0xff] %v11442_v46  ;;  %12922 = vst [vmem:[#allocation42_spill] sm:$0xff] %v11444_v12  ;;  %v5422_v43 = vsel %vm9848_vm8, %v5417_v49, %v5421_v62  ;;  %v5430_v4 = vor.u32 %v5429_v42, %v5426_v35  ;;  %8562 = vmatmul.mubr.msk.bf16.gmra.mxu0 %vm2234_vm5, %v8828_v18  ;;  %v5451_v37 = vshll.u32 %v5147_v21, 16  ;;  %v5457_v7 = vshll.u32 %v11436_v56, 16  ;;  %v8360_v23 = vpop.f32.mrf.mxu0  ;;  %v11452_v41 = vpop.f32.mrf.mxu1  ;;  %v5150_v20 = vld [vmem:[#allocation2 + $0xb4] sm:$0xf] }
 0x33e   : > { %v7779_v28 = vcombine.low %v5412_v39, %v5422_v43  ;;  %v5440_v63 = vor.u32 %v5439_v52, %v5435_v0  ;;  %12923 = vst [vmem:[#allocation43_spill] sm:$0xff] %v11452_v41  ;;  %v5450_v46 = vrot.slane %v5448_v45, 4  ;;  %v5461_v40 = vshrl.u32 %v11436_v56, 16  ;;  %8565 = vmatprep.mubr.msk.bf16.mxu0 %vm2234_vm5, %v8829_v54  ;;  %v11463_v52 = vld [vmem:[#allocation2 + $0xb8] sm:$0xf] }
 0x33f   : > { %v5431_v51 = vrot.slane %v5430_v4, 4  ;;  %v5467_v62 = vshll.u32 %v11444_v12, 16  ;;  %v5453_v35 = vrot.slane %v5451_v37, 5  ;;  %v5459_v42 = vrot.slane %v5457_v7, 5  ;;  %v11461_v39 = vpop.f32.mrf.mxu0  ;;  %12926 = vst [vmem:[#allocation46_spill] sm:$0xff] %v11463_v52 }
 0x340   : > { %8599 = vmatprep.mubr.msk.bf16.mxu1 %vm2234_vm5, %v7779_v28  ;;  %v5441_v49 = vrot.slane %v5440_v63, 4  ;;  %v11459_v21 = vadd.f32 %v11344_v58, %v2385_v36  ;;  %12925 = vst [vmem:[#allocation45_spill] sm:$0xff] %v11461_v39  ;;  %v11465_v18 = vpop.f32.mrf.mxu1  ;;  %v5463_v4 = vrot.slane %v5461_v40, 4  ;;  %v11470_v54 = vadd.f32 %v11356_v1, %v8360_v23  ;;  %v11472_v28 = vld [vmem:[#allocation2 + $0xbc] sm:$0x1] }
 0x341   : > { %v5436_v43 = vsel %vm9848_vm8, %v5431_v51, %v5435_v0  ;;  %12928 = vst [vmem:[#allocation48_spill] sm:$0xff] %v11472_v28  ;;  %v5454_v58 = vor.u32 %v5453_v35, %v5450_v46  ;;  %v5469_v36 = vrot.slane %v5467_v62, 5  ;;  %v5472_v63 = vshrl.u32 %v5150_v20, 16  ;;  %v8830_v40 = vld [vmem:[#allocation2 + $0x9c] sm:$0xff]   ;;  %v11492_v56 = vld [vmem:[#allocation2 + $0xc8] sm:$0x1] }
 0x342   : > { %12924 = vst [vmem:[#allocation44_spill] sm:$0xff] %v11459_v21  ;;  %12927 = vst [vmem:[#allocation47_spill] sm:$0xff] %v11470_v54  ;;  %v5446_v45 = vsel %vm9848_vm8, %v5441_v49, %v5445_v57  ;;  %v11476_v37 = vpop.f32.mrf.mxu1  ;;  %v5464_v41 = vor.u32 %v5463_v4, %v5459_v42  ;;  %v5475_v12 = vshll.u32 %v5150_v20, 16  ;;  %v5481_v39 = vshll.u32 %v11463_v52, 16  ;;  %v5153_v51 = vld [vmem:[#allocation2 + $0xc0] sm:$0xf] }
 0x343   : > { %v7780_v7 = vcombine.low %v5436_v43, %v5446_v45  ;;  %v8363_v0 = vpop.f32.mrf.mxu0  ;;  %v5455_v1 = vrot.slane %v5454_v58, 4  ;;  %v5474_v23 = vrot.slane %v5472_v63, 4  ;;  %v5485_v54 = vshrl.u32 %v11463_v52, 16  ;;  %v11481_v57 = vld [vmem:[#allocation2 + $0xc4] sm:$0xf]  ;;  %v8831_v43 = vld [vmem:[#allocation2 + $0xa8] sm:$0xff]  }
 0x344   : > { %v5491_v21 = vshll.u32 %v11472_v28, 16  ;;  %v11483_v46 = vpop.f32.mrf.mxu1  ;;  %v5465_v62 = vrot.slane %v5464_v41, 4  ;;  %v5477_v49 = vrot.slane %v5475_v12, 5  ;;  %v5483_v20 = vrot.slane %v5481_v39, 5  ;;  %12930 = vst [vmem:[#allocation50_spill] sm:$0xff] %v11492_v56 }
 0x345   : > { %8600 = vmatmul.mubr.msk.bf16.gmra.mxu1 %vm2234_vm5, %v7780_v7  ;;  %v11487_v35 = vadd.f32 %v11383_v14, %v8363_v0  ;;  %v2401_v4 = vpop.f32.mrf.mxu0  ;;  %v5460_v45 = vsel %vm9848_vm8, %v5455_v1, %v5459_v42  ;;  %v5487_v58 = vrot.slane %v5485_v54, 4  ;;  %8566 = vmatmul.mubr.msk.bf16.gmra.mxu0 %vm2234_vm5, %v8830_v40  ;;  %v5496_v28 = vshrl.u32 %v5153_v51, 16 }
 0x346   : > { %v5493_v63 = vrot.slane %v5491_v21, 5  ;;  %v11494_v52 = vpop.f32.mrf.mxu1  ;;  %v5470_v12 = vsel %vm9848_vm8, %v5465_v62, %v5469_v36  ;;  %v5478_v41 = vor.u32 %v5477_v49, %v5474_v23  ;;  %v5499_v14 = vshll.u32 %v5153_v51, 16  ;;  %8569 = vmatprep.mubr.msk.bf16.mxu0 %vm2234_vm5, %v8831_v43  ;;  %v5837_v43 = vld [vmem:[#allocation2 + $0x18] sm:$0xe] }
 0x347   : > { %12929 = vst [vmem:[#allocation49_spill] sm:$0xff] %v11487_v35  ;;  %12931 = vst [vmem:[#allocation51_spill] sm:$0xff] %v11494_v52  ;;  %v5505_v39 = vshll.u32 %v11481_v57, 16  ;;  %v8364_v7 = vpop.f32.mrf.mxu0  ;;  %v7781_v42 = vcombine.low %v5460_v45, %v5470_v12  ;;  %v5488_v54 = vor.u32 %v5487_v58, %v5483_v20  ;;  %v5498_v21 = vrot.slane %v5496_v28, 4 }
 0x348   : > { %v5509_v0 = vshrl.u32 %v11481_v57, 16  ;;  %v11501_v40 = vpop.f32.mrf.mxu1  ;;  %v5479_v1 = vrot.slane %v5478_v41, 4  ;;  %v5501_v35 = vrot.slane %v5499_v14, 5  ;;  %v5515_v59 = vshll.u32 %v11492_v56, 16  ;;  %v5156_v41 = vld [vmem:[#allocation2 + $0xcc] sm:$0xf] }
 0x349   : > { %v5507_v52 = vrot.slane %v5505_v39, 5  ;;  %v11504_v36 = vpop.f32.mrf.mxu0  ;;  %8603 = vmatprep.mubr.msk.bf16.mxu1 %vm2234_vm5, %v7781_v42  ;;  %v5489_v51 = vrot.slane %v5488_v54, 4  ;;  %v11508_v62 = vadd.f32 %v11390_v22, %v2401_v4  ;;  %v11511_v28 = vadd.f32 %v11400_v16, %v8364_v7  ;;  %v8832_v4 = vld [vmem:[#allocation2 + $0xb4] sm:$0xff]   ;;  %v11522_v16 = vld [vmem:[#allocation2 + $0xd0] sm:$0xf]  ;;  %v8833_v56 = vld [vmem:[#allocation2 + $0xc0] sm:$0xff]  }
 0x34a   : > { %v5511_v23 = vrot.slane %v5509_v0, 4  ;;  %v11513_v49 = vpop.f32.mrf.mxu1  ;;  %v5484_v45 = vsel %vm9848_vm8, %v5479_v1, %v5483_v20  ;;  %v5502_v58 = vor.u32 %v5501_v35, %v5498_v21  ;;  %v5517_v42 = vrot.slane %v5515_v59, 5 }
 0x34b   : > { %v8367_v12 = vpop.f32.mrf.mxu0  ;;  %v5494_v14 = vsel %vm9848_vm8, %v5489_v51, %v5493_v63  ;;  %v7801_v35 = vrot.slane %v5837_v43, 9  ;;  %v5903_v21 = vrot.slane %v11156_v17, 5  ;;  %v5523_v63 = vshll.u32 %v5156_v41, 16 }
 0x34c   : > { %v5512_v39 = vor.u32 %v5511_v23, %v5507_v52  ;;  %v11520_v22 = vadd.f32 %v11427_v24, %v8367_v12  ;;  %v11524_v7 = vpop.f32.mrf.mxu1  ;;  %v7782_v54 = vcombine.low %v5484_v45, %v5494_v14  ;;  %v5503_v0 = vrot.slane %v5502_v58, 4  ;;  %v11538_v58 = vld [vmem:[#allocation2 + $0xd4] sm:$0x1] }
 0x34d   : > { %v2417_v20 = vpop.f32.mrf.mxu0  ;;  %8570 = vmatmul.mubr.msk.bf16.gmra.mxu0 %vm2234_vm5, %v8832_v4  ;;  %v5520_v24 = vshrl.u32 %v5156_v41, 16  ;;  %v5905_v45 = vrot.slane %v5903_v21, 4  ;;  %v5906_v17 = vrot.slane %v11164_v53, 5 }
 0x34e   : > { %12932 = vst [vmem:[#allocation52_spill] sm:$0xff] %v11520_v22  ;;  %v5513_v1 = vrot.slane %v5512_v39, 4  ;;  %v11529_v59 = vadd.f32 %v11433_v8, %v2417_v20  ;;  %v11531_v51 = vpop.f32.mrf.mxu1  ;;  %8604 = vmatmul.mubr.msk.bf16.gmra.mxu1 %vm2234_vm5, %v7782_v54  ;;  %v5508_v23 = vsel %vm9848_vm8, %v5503_v0, %v5507_v52  ;;  %8573 = vmatprep.mubr.msk.bf16.mxu0 %vm2234_vm5, %v8833_v56  ;;  %v5529_v8 = vshll.u32 %v11522_v16, 16  ;;  %v5838_v52 = vld [vmem:[#allocation2 + $0x24] sm:$0xe] }
 0x34f   : > { %12934 = vst [vmem:[#allocation54_spill] sm:$0xff] %v11531_v51  ;;  %v8368_v43 = vpop.f32.mrf.mxu0  ;;  %v5522_v14 = vrot.slane %v5520_v24, 4  ;;  %v5525_v39 = vrot.slane %v5523_v63, 5  ;;  %v5907_v53 = vsel %vm10456_vm14, %v5905_v45, %v5906_v17  ;;  %v5533_v20 = vshrl.u32 %v11522_v16, 16  ;;  %v5839_v51 = vld [vmem:[#allocation2 + $0x30] sm:$0xe] }
 0x350   : > { %12933 = vst [vmem:[#allocation53_spill] sm:$0xff] %v11529_v59  ;;  %v5518_v12 = vsel %vm9848_vm8, %v5513_v1, %v5517_v42  ;;  %v11544_v41 = vadd.f32 %v11446_v55, %v8368_v43  ;;  %v11546_v4 = vpop.f32.mrf.mxu1  ;;  %v5531_v0 = vrot.slane %v5529_v8, 5  ;;  %v8834_v59 = vld [vmem:[#allocation2 + $0xcc] sm:$0xff]   ;;  %v5904_v55 = vsel %vm10456_vm14, %v7801_v35, %v5903_v21 }
 0x351   : > { %v7783_v56 = vcombine.low %v5508_v23, %v5518_v12  ;;  %v11548_v54 = vpop.f32.mrf.mxu0  ;;  %v5526_v42 = vor.u32 %v5525_v39, %v5522_v14  ;;  %v5539_v1 = vshll.u32 %v11538_v58, 16  ;;  %v7818_v23 = vcombine.low %v5904_v55, %v5907_v53  ;;  %v5840_v14 = vld [vmem:[#allocation2 + $0x3c] sm:$0xe] }
 0x352   : > { %12935 = vst [vmem:[#allocation55_spill] sm:$0xff] %v11544_v41  ;;  %12936 = vst [vmem:[#allocation56_spill] sm:$0xff] %v11548_v54  ;;  %v11556_v24 = vpop.f32.mrf.mxu1  ;;  %v5535_v43 = vrot.slane %v5533_v20, 4  ;;  %v7802_v12 = vrot.slane %v5838_v52, 9  ;;  %v5910_v45 = vrot.slane %v11179_v47, 5  ;;  %v5913_v41 = vrot.slane %v11189_v34, 5 }
 0x353   : > { %8607 = vmatprep.mubr.msk.bf16.mxu1 %vm2234_vm5, %v7783_v56  ;;  %v8371_v63 = vpop.f32.mrf.mxu0  ;;  %v5527_v8 = vrot.slane %v5526_v42, 4  ;;  %v7803_v35 = vrot.slane %v5839_v51, 9  ;;  %v5541_v22 = vrot.slane %v5539_v1, 5  ;;  %v5917_v53 = vrot.slane %v11206_v11, 5  ;;  %v5841_v20 = vld [vmem:[#allocation2 + $0x48] sm:$0xe] }
 0x354   : > { %v11561_v17 = vadd.f32 %v11465_v18, %v8371_v63  ;;  %v11564_v21 = vpop.f32.mrf.mxu1  ;;  %v5536_v54 = vor.u32 %v5535_v43, %v5531_v0  ;;  %v5912_v56 = vrot.slane %v5910_v45, 4  ;;  %v11569_v52 = vadd.f32 %v11158_v15, %v11240_v19  ;;  %v5842_v43 = vld [vmem:[#allocation2 + $0x54] sm:$0xe] }
 0x355   : > { %v2433_v39 = vpop.f32.mrf.mxu0  ;;  %8574 = vmatmul.mubr.msk.bf16.gmra.mxu0 %vm2234_vm5, %v8834_v59  ;;  %v5532_v34 = vsel %vm9848_vm8, %v5527_v8, %v5531_v0  ;;  %v5920_v18 = vrot.slane %v11214_v32, 5  ;;  %v5919_v19 = vrot.slane %v5917_v53, 4  ;;  %v7804_v59 = vrot.slane %v5840_v14, 9 }
 0x356   : > { %v11573_v47 = vadd.f32 %v11476_v37, %v2433_v39  ;;  %v11578_v51 = vpop.f32.mrf.mxu1  ;;  %8613 = vmatprep.mubr.msk.bf16.mxu0 %vm2234_vm5, %v7818_v23  ;;  %v5537_v11 = vrot.slane %v5536_v54, 4  ;;  %v5914_v15 = vsel %vm10456_vm14, %v5912_v56, %v5913_v41  ;;  %v5911_v0 = vsel %vm10456_vm14, %v7802_v12, %v5910_v45 }
 0x357   : > { %v8372_v55 = vpop.f32.mrf.mxu0  ;;  %v5918_v32 = vsel %vm10456_vm14, %v7803_v35, %v5917_v53  ;;  %v5924_v1 = vrot.slane %v11224_v44, 5  ;;  %v5921_v41 = vsel %vm10456_vm14, %v5919_v19, %v5920_v18  ;;  %v5931_v23 = vrot.slane %v11245_v30, 5  ;;  %v5843_v44 = vld [vmem:[#allocation2 + $0x60] sm:$0xe] }
 0x358   : > { %v11584_v37 = vadd.f32 %v11483_v46, %v8372_v55  ;;  %v11590_v42 = vpop.f32.mrf.mxu1  ;;  %v5542_v54 = vsel %vm9848_vm8, %v5537_v11, %v5541_v22  ;;  %v7805_v46 = vrot.slane %v5841_v20, 9  ;;  %v7819_v45 = vcombine.low %v5911_v0, %v5914_v15 }
 0x359   : > { %v11595_v63 = vpop.f32.mrf.mxu0  ;;  %v7784_v12 = vcombine.low %v5532_v34, %v5542_v54  ;;  %v7820_v8 = vcombine.low %v5918_v32, %v5921_v41  ;;  %v5927_v35 = vrot.slane %v11233_v27, 5  ;;  %v5925_v31 = vsel %vm10456_vm14, %v7804_v59, %v5924_v1  ;;  %v5845_v54 = vld [vmem:[#allocation2 + $0x78] sm:$0xe] }
 0x35a   : > { %v11601_v14 = vpop.f32.mrf.mxu1  ;;  %v5926_v22 = vrot.slane %v5924_v1, 4  ;;  %v5933_v56 = vrot.slane %v5931_v23, 4  ;;  %v5934_v53 = vrot.slane %v11254_v6, 5  ;;  %v5932_v34 = vsel %vm10456_vm14, %v7805_v46, %v5931_v23 }
 0x35b   : > { %v8411_v39 = vpop.f32.mrf.mxu0  ;;  %8608 = vmatmul.mubr.msk.bf16.gmra.mxu1 %vm2234_vm5, %v7784_v12  ;;  %v7806_v18 = vrot.slane %v5842_v43, 9  ;;  %v5938_v20 = vrot.slane %v11272_v38, 5  ;;  %v7807_v15 = vrot.slane %v5843_v44, 9  ;;  %v5945_v19 = vrot.slane %v11302_v48, 5 }
 0x35c   : > { %v11608_v30 = vadd.f32 %v8411_v39, %v11251_v60  ;;  %v11612_v27 = vpop.f32.mrf.mxu1  ;;  %v5928_v55 = vsel %vm10456_vm14, %v5926_v22, %v5927_v35  ;;  %v5935_v6 = vsel %vm10456_vm14, %v5933_v56, %v5934_v53  ;;  %v5844_v60 = vld [vmem:[#allocation2 + $0x6c] sm:$0xe]  ;;  %v5941_v38 = vrot.slane %v11274_v9, 5 }
 0x35d   : > { %v3038_v11 = vpop.f32.mrf.mxu0  ;;  %8614 = vmatmul.mubr.msk.bf16.vlgmr.msra.gmra.mxu0 %vm2234_vm5, %v7819_v45  ;;  %v7821_v0 = vcombine.low %v5925_v31, %v5928_v55  ;;  %v7822_v32 = vcombine.low %v5932_v34, %v5935_v6  ;;  %v11630_v46 = vsel %vm10456_vm14, %v7806_v18, %v5938_v20  ;;  %v5940_v48 = vrot.slane %v5938_v20, 4  ;;  %v5846_v31 = vld [vmem:[#allocation2 + $0x84] sm:$0xe]  ;;  %v5847_v18 = vld [vmem:[#allocation2 + $0x90] sm:$0xe] }
 0x35e   : > { %v11622_v59 = vadd.f32 %v3038_v11, %v11270_v33  ;;  %v11624_v1 = vpop.f32.mrf.mxu1  ;;  %8617 = vmatprep.mubr.msk.bf16.mxu0 %vm2234_vm5, %v7820_v8  ;;  %v5947_v23 = vrot.slane %v5945_v19, 4  ;;  %v5948_v43 = vrot.slane %v11304_v25, 5  ;;  %v11640_v9 = vsel %vm10456_vm14, %v7807_v15, %v5945_v19 }
 0x35f   : > { %12937 = vst [vmem:[#allocation57_spill] sm:$0xff] %v11624_v1  ;;  %v8412_v41 = vpop.f32.mrf.mxu0  ;;  %v7808_v45 = vrot.slane %v5844_v60, 9  ;;  %v5952_v8 = vrot.slane %v11321_v13, 5  ;;  %v11645_v44 = vsel %vm10456_vm14, %v5940_v48, %v5941_v38  ;;  %v5959_v39 = vrot.slane %v11342_v3, 5 }
 0x360   : > { %v11634_v33 = vadd.f32 %v8412_v41, %v11280_v29  ;;  %v11636_v12 = vpop.f32.mrf.mxu1  ;;  %v11649_v25 = vsel %vm10456_vm14, %v5947_v23, %v5948_v43  ;;  %v7809_v29 = vrot.slane %v5845_v54, 9  ;;  %v7823_v56 = vcombine.low %v11630_v46, %v11645_v44  ;;  %v12938_v46 = vld [vmem:[#allocation23_spill] sm:$0xff]  ;;  %v12948_v43 = vld [vmem:[#allocation28_spill] sm:$0xff] }
 0x361   : > { %v3041_v35 = vpop.f32.mrf.mxu0  ;;  %v7824_v53 = vcombine.low %v11640_v9, %v11649_v25  ;;  %v5955_v34 = vrot.slane %v11331_v50, 5  ;;  %v11664_v11 = vsel %vm10456_vm14, %v7808_v45, %v5952_v8  ;;  %v5954_v3 = vrot.slane %v5952_v8, 4  ;;  %v5848_v9 = vld [vmem:[#allocation2 + $0x9c] sm:$0xe]  ;;  %v12941_v25 = vld [vmem:[#allocation33_spill] sm:$0xff] }
 0x362   : > { %v11653_v22 = vadd.f32 %v3041_v35, %v11569_v52  ;;  %v11657_v13 = vpop.f32.mrf.mxu1  ;;  %v5961_v55 = vrot.slane %v5959_v39, 4  ;;  %v5962_v52 = vrot.slane %v11352_v2, 5  ;;  %v11674_v19 = vsel %vm10456_vm14, %v7809_v29, %v5959_v39  ;;  %v12940_v35 = vld [vmem:[#allocation30_spill] sm:$0xff]  ;;  %v12942_v29 = vld [vmem:[#allocation24_spill] sm:$0xff] }
 0x363   : > { %v8415_v20 = vpop.f32.mrf.mxu0  ;;  %v7810_v50 = vrot.slane %v5846_v31, 9  ;;  %v5966_v60 = vrot.slane %v11367_v61, 5  ;;  %v11679_v54 = vsel %vm10456_vm14, %v5954_v3, %v5955_v34  ;;  %v5973_v41 = vrot.slane %v11388_v26, 5 }
 0x364   : > { %v11668_v6 = vadd.f32 %v8415_v20, %v11300_v10  ;;  %v11670_v15 = vpop.f32.mrf.mxu1  ;;  %v11683_v2 = vsel %vm10456_vm14, %v5961_v55, %v5962_v52  ;;  %v7811_v10 = vrot.slane %v5847_v18, 9  ;;  %v5969_v44 = vrot.slane %v12940_v35, 5  ;;  %v12943_v18 = vld [vmem:[#allocation37_spill] sm:$0xff] }
 0x365   : > { %v3054_v38 = vpop.f32.mrf.mxu0  ;;  %8618 = vmatmul.mubr.msk.bf16.gmra.mxu0 %vm2234_vm5, %v7821_v0  ;;  %v5968_v8 = vrot.slane %v5966_v60, 4  ;;  %v5975_v26 = vrot.slane %v5973_v41, 4  ;;  %v5976_v0 = vrot.slane %v12941_v25, 5  ;;  %v11702_v34 = vsel %vm10456_vm14, %v7810_v50, %v5966_v60  ;;  %v5850_v35 = vld [vmem:[#allocation2 + $0xb4] sm:$0xe] }
 0x366   : > { %v3169_v48 = vadd.f32 %v3054_v38, %v12938_v46  ;;  %v11688_v23 = vpop.f32.mrf.mxu1  ;;  %8621 = vmatprep.mubr.msk.bf16.mxu0 %vm2234_vm5, %v7822_v32  ;;  %v5980_v20 = vrot.slane %v12943_v18, 5  ;;  %v11711_v55 = vsel %vm10456_vm14, %v7811_v10, %v5973_v41  ;;  %v7812_v38 = vrot.slane %v5848_v9, 9  ;;  %v12944_v46 = vld [vmem:[#allocation25_spill] sm:$0xff]  ;;  %v12945_v41 = vld [vmem:[#allocation39_spill] sm:$0xff]  ;;  %v12947_v9 = vld [vmem:[#allocation46_spill] sm:$0xff] }
 0x367   : > { %12939 = vst [vmem:[#allocation23_spill] sm:$0xff] %v11688_v23  ;;  %v8416_v45 = vpop.f32.mrf.mxu0  ;;  %v11707_v32 = vsel %vm10456_vm14, %v5968_v8, %v5969_v44  ;;  %v11715_v52 = vsel %vm10456_vm14, %v5975_v26, %v5976_v0  ;;  %v5983_v25 = vrot.slane %v12945_v41, 5  ;;  %v5994_v18 = vrot.slane %v12947_v9, 5  ;;  %v12950_v23 = vld [vmem:[#allocation29_spill] sm:$0xff] }
 0x368   : > { %v3172_v39 = vadd.f32 %v8416_v45, %v12942_v29  ;;  %v11698_v31 = vpop.f32.mrf.mxu1  ;;  %v5982_v10 = vrot.slane %v5980_v20, 4  ;;  %v12946_v29 = vld [vmem:[#allocation26_spill] sm:$0xff]  ;;  %v7814_v8 = vrot.slane %v5850_v35, 9 }
 0x369   : > { %v3057_v3 = vpop.f32.mrf.mxu0  ;;  %v5996_v9 = vrot.slane %v5994_v18, 4 }
 0x36a   : > { %v11718_v45 = vadd.f32 %v3057_v3, %v12944_v46  ;;  %v11720_v50 = vpop.f32.mrf.mxu1  ;;  %v11733_v46 = vsel %vm10456_vm14, %v7812_v38, %v5980_v20  ;;  %v11737_v60 = vsel %vm10456_vm14, %v5982_v10, %v5983_v25  ;;  %v12949_v20 = vld [vmem:[#allocation48_spill] sm:$0xff]  ;;  %v12951_v25 = vld [vmem:[#allocation22_spill] sm:$0xff] }
 0x36b   : > { %v8419_v44 = vpop.f32.mrf.mxu0  ;;  %v5997_v38 = vrot.slane %v12949_v20, 5  ;;  %v12952_v20 = vld [vmem:[#allocation31_spill] sm:$0xff] }
 0x36c   : > { %v3175_v26 = vadd.f32 %v8419_v44, %v12946_v29  ;;  %v11728_v0 = vpop.f32.mrf.mxu1 }
 0x36d   : > { %v3070_v3 = vpop.f32.mrf.mxu0  ;;  %8622 = vmatmul.mubr.msk.bf16.gmra.mxu0 %vm2234_vm5, %v7823_v56  ;;  %v11752_v56 = vsel %vm10456_vm14, %v7814_v8, %v5994_v18  ;;  %v12967_v8 = vld [vmem:[#allocation42_spill] sm:$0xff] }
 0x36e   : > { %v3173_v41 = vadd.f32 %v3070_v3, %v12948_v43  ;;  %v11741_v61 = vpop.f32.mrf.mxu1  ;;  %8625 = vmatprep.mubr.msk.bf16.mxu0 %vm2234_vm5, %v7824_v53  ;;  %v11756_v43 = vsel %vm10456_vm14, %v5996_v9, %v5997_v38  ;;  %v6769_v53 = vsel %vm529_vm0, %v12951_v25, 0  ;;  %v11762_v3 = vadd.f32 %v11501_v40, %v11608_v30  ;;  %v12953_v40 = vld [vmem:[#allocation32_spill] sm:$0xff] }
 0x36f   : > { %v8420_v29 = vpop.f32.mrf.mxu0  ;;  %8680 = vmatpush3.bf16.msra.mxu0 %v6769_v53  ;;  %v11773_v9 = vadd.f32 %v11513_v49, %v11622_v59  ;;  %v11777_v38 = vadd.f32 %v11524_v7, %v11634_v33  ;;  %v11790_v53 = vadd.f32 %v11564_v21, %v3172_v39  ;;  %v11793_v59 = vadd.f32 %v11590_v42, %v3175_v26 }
 0x370   : > { %v3176_v1 = vadd.f32 %v8420_v29, %v12950_v23  ;;  %v11748_v10 = vpop.f32.mrf.mxu1  ;;  %v11796_v7 = vadd.f32 %v11601_v14, %v3173_v41  ;;  %v12954_v33 = vcombine.low %v11664_v11, %v11679_v54  ;;  %v12956_v21 = vcombine.low %v11674_v19, %v11683_v2  ;;  %v12958_v41 = vld [vmem:[#allocation38_spill] sm:$0xff]  ;;  %v12959_v19 = vld [vmem:[#allocation40_spill] sm:$0xff] }
 0x371   : > { %v3073_v35 = vpop.f32.mrf.mxu0  ;;  %v5987_v2 = vrot.slane %v12959_v19, 5 }
 0x372   : > { %v11765_v23 = vadd.f32 %v3073_v35, %v12952_v20  ;;  %v11767_v29 = vpop.f32.mrf.mxu1  ;;  %v11784_v35 = vadd.f32 %v11546_v4, %v11668_v6  ;;  %v11787_v20 = vadd.f32 %v11556_v24, %v3169_v48  ;;  %v12955_v4 = vld [vmem:[#allocation35_spill] sm:$0xff]  ;;  %v11806_v24 = vadd.f32 %v11612_v27, %v3176_v1  ;;  %v12957_v48 = vld [vmem:[#allocation36_spill] sm:$0xff] }
 0x373   : > { %v8423_v18 = vpop.f32.mrf.mxu0 }
 0x374   : > { %v3179_v30 = vadd.f32 %v8423_v18, %v12953_v40  ;;  %v11780_v25 = vpop.f32.mrf.mxu1 }
 0x375   : > { %v3086_v49 = vpop.f32.mrf.mxu0  ;;  %8626 = vmatmul.mubr.msk.bf16.gmra.mxu0 %vm2234_vm5, %v12954_v33 }
 0x376   : > { %v3177_v6 = vadd.f32 %v3086_v49, %v12955_v4  ;;  %v11803_v18 = vpop.f32.mrf.mxu1  ;;  %8629 = vmatprep.mubr.msk.bf16.mxu0 %vm2234_vm5, %v12956_v21  ;;  %v11813_v14 = vadd.f32 %v11636_v12, %v3179_v30  ;;  %v12960_v30 = vld [vmem:[#allocation41_spill] sm:$0xff]  ;;  %v5849_v21 = vld [vmem:[#allocation2 + $0xa8] sm:$0xe] }
 0x377   : > { %v8424_v42 = vpop.f32.mrf.mxu0 }
 0x378   : > { %v3180_v11 = vadd.f32 %v8424_v42, %v12957_v48  ;;  %v11816_v54 = vpop.f32.mrf.mxu1  ;;  %v11819_v39 = vadd.f32 %v11657_v13, %v3177_v6  ;;  %v12961_v13 = vcombine.low %v11702_v34, %v11707_v32  ;;  %v12962_v6 = vld [vmem:[#allocation44_spill] sm:$0xff]  ;;  %v5989_v48 = vrot.slane %v5987_v2, 4  ;;  %v12966_v34 = vld [vmem:[#allocation47_spill] sm:$0xff] }
 0x379   : > { %v3089_v26 = vpop.f32.mrf.mxu0 }
 0x37a   : > { %v11822_v27 = vadd.f32 %v3089_v26, %v12958_v41  ;;  %v11824_v1 = vpop.f32.mrf.mxu1  ;;  %v11828_v40 = vadd.f32 %v11670_v15, %v3180_v11  ;;  %v12963_v11 = vld [vmem:[#allocation45_spill] sm:$0xff]  ;;  %v12964_v41 = vld [vmem:[#allocation27_spill] sm:$0xff] }
 0x37b   : > { %v8427_v12 = vpop.f32.mrf.mxu0  ;;  %v2681_v19 = vadd.f32 %v12964_v41, %v12963_v11 }
 0x37c   : > { %v3183_v49 = vadd.f32 %v8427_v12, %v12960_v30  ;;  %v11831_v33 = vpop.f32.mrf.mxu1  ;;  %v12965_v12 = vcombine.low %v11711_v55, %v11715_v52  ;;  %v6001_v55 = vrot.slane %v11481_v57, 5  ;;  %v12969_v57 = vcombine.low %v11733_v46, %v11737_v60 }
 0x37d   : > { %v3102_v4 = vpop.f32.mrf.mxu0  ;;  %8630 = vmatmul.mubr.msk.bf16.gmra.mxu0 %vm2234_vm5, %v12961_v13  ;;  %v7813_v13 = vrot.slane %v5849_v21, 9 }
 0x37e   : > { %v3181_v42 = vadd.f32 %v3102_v4, %v12962_v6  ;;  %v11838_v26 = vpop.f32.mrf.mxu1  ;;  %v11841_v15 = vadd.f32 %v11698_v31, %v3183_v49  ;;  %8633 = vmatprep.mubr.msk.bf16.mxu0 %vm2234_vm5, %v12965_v12  ;;  %v5990_v4 = vrot.slane %v12967_v8, 5  ;;  %v12968_v12 = vld [vmem:[#allocation49_spill] sm:$0xff] }
 0x37f   : > { %v8428_v30 = vpop.f32.mrf.mxu0 }
 0x380   : > { %v3184_v32 = vadd.f32 %v8428_v30, %v12966_v34  ;;  %v11851_v6 = vpop.f32.mrf.mxu1  ;;  %v11854_v44 = vadd.f32 %v11720_v50, %v3181_v42  ;;  %v5991_v11 = vsel %vm10456_vm14, %v5989_v48, %v5990_v4  ;;  %v5988_v30 = vsel %vm10456_vm14, %v7813_v13, %v5987_v2  ;;  %v5851_v34 = vld [vmem:[#allocation2 + $0xc0] sm:$0xe]  ;;  %v12970_v13 = vld [vmem:[#allocation34_spill] sm:$0xff] }
 0x381   : > { %v3105_v31 = vpop.f32.mrf.mxu0  ;;  %v7815_v46 = vrot.slane %v5851_v34, 9 }
 0x382   : > { %v3182_v49 = vadd.f32 %v3105_v31, %v2681_v19  ;;  %v11858_v41 = vpop.f32.mrf.mxu1  ;;  %v11862_v52 = vadd.f32 %v11728_v0, %v3184_v32  ;;  %v7830_v19 = vcombine.low %v5988_v30, %v5991_v11  ;;  %v6003_v32 = vrot.slane %v6001_v55, 4  ;;  %v12971_v11 = vld [vmem:[#allocation50_spill] sm:$0xff] }
 0x383   : > { %v8431_v21 = vpop.f32.mrf.mxu0 }
 0x384   : > { %v3187_v8 = vadd.f32 %v8431_v21, %v12968_v12  ;;  %v11867_v50 = vpop.f32.mrf.mxu1  ;;  %v11870_v42 = vadd.f32 %v11741_v61, %v3182_v49  ;;  %v2697_v61 = vadd.f32 %v12970_v13, %v11504_v36  ;;  %v6008_v49 = vrot.slane %v11522_v16, 5  ;;  %v5852_v12 = vld [vmem:[#allocation2 + $0xcc] sm:$0xe] }
 0x385   : > { %v3118_v48 = vpop.f32.mrf.mxu0  ;;  %8634 = vmatmul.mubr.msk.bf16.gmra.mxu0 %vm2234_vm5, %v12969_v57  ;;  %v6004_v21 = vrot.slane %v12971_v11, 5  ;;  %v6011_v57 = vrot.slane %v11538_v58, 5  ;;  %v12972_v13 = vld [vmem:[#allocation52_spill] sm:$0xff] }
 0x386   : > { %v3185_v0 = vadd.f32 %v3118_v48, %v11508_v62  ;;  %v11877_v4 = vpop.f32.mrf.mxu1  ;;  %v11880_v2 = vadd.f32 %v11748_v10, %v3187_v8  ;;  %8637 = vmatprep.mubr.msk.bf16.mxu0 %vm2234_vm5, %v7830_v19  ;;  %v7816_v48 = vrot.slane %v5852_v12, 9  ;;  %v6010_v34 = vrot.slane %v6008_v49, 4 }
 0x387   : > { %v8432_v31 = vpop.f32.mrf.mxu0  ;;  %v6005_v36 = vsel %vm10456_vm14, %v6003_v32, %v6004_v21 }
 0x388   : > { %v3188_v60 = vadd.f32 %v8432_v31, %v11511_v28  ;;  %v11888_v62 = vpop.f32.mrf.mxu1  ;;  %v11891_v30 = vadd.f32 %v11767_v29, %v3185_v0  ;;  %v6002_v29 = vsel %vm10456_vm14, %v7815_v46, %v6001_v55  ;;  %v6012_v46 = vsel %vm10456_vm14, %v6010_v34, %v6011_v57 }
 0x389   : > { %v3121_v10 = vpop.f32.mrf.mxu0  ;;  %v7832_v32 = vcombine.low %v6002_v29, %v6005_v36 }
 0x38a   : > { %v3186_v8 = vadd.f32 %v3121_v10, %v2697_v61  ;;  %v11895_v19 = vpop.f32.mrf.mxu1  ;;  %v11898_v16 = vadd.f32 %v11780_v25, %v3188_v60  ;;  %v12973_v25 = vcombine.low %v11752_v56, %v11756_v43  ;;  %v12974_v60 = vld [vmem:[#allocation53_spill] sm:$0xff]  ;;  %v12975_v10 = vld [vmem:[#allocation56_spill] sm:$0xff]  ;;  %v12976_v56 = vld [vmem:[#allocation43_spill] sm:$0xff] }
 0x38b   : > { %v8435_v28 = vpop.f32.mrf.mxu0  ;;  %v2713_v43 = vadd.f32 %v12976_v56, %v12975_v10 }
 0x38c   : > { %v3191_v31 = vadd.f32 %v8435_v28, %v12972_v13  ;;  %v11904_v0 = vpop.f32.mrf.mxu1  ;;  %v11907_v61 = vadd.f32 %v11803_v18, %v3186_v8  ;;  %v6009_v18 = vsel %vm10456_vm14, %v7816_v48, %v6008_v49  ;;  %v12977_v8 = vld [vmem:[#allocation55_spill] sm:$0xff] }
 0x38d   : > { %v3134_v11 = vpop.f32.mrf.mxu0  ;;  %8638 = vmatmul.mubr.msk.bf16.gmra.mxu0 %vm2234_vm5, %v12973_v25  ;;  %v7833_v29 = vcombine.low %v6009_v18, %v6012_v46 }
 0x38e   : > { %v3189_v21 = vadd.f32 %v3134_v11, %v12974_v60  ;;  %v11914_v58 = vpop.f32.mrf.mxu1  ;;  %v11917_v12 = vadd.f32 %v11816_v54, %v3191_v31  ;;  %8641 = vmatprep.mubr.msk.bf16.mxu0 %vm2234_vm5, %v7832_v32 }
 0x38f   : > { %v8436_v55 = vpop.f32.mrf.mxu0 }
 0x390   : > { %v3192_v36 = vadd.f32 %v8436_v55, %v12977_v8  ;;  %v8517_v28 = vpop.f32.mrf.mxu1  ;;  %v11928_v13 = vadd.f32 %v11824_v1, %v3189_v21  ;;  %v6555_v1 = vld [vmem:[%s12841_s8] sm:$0x3] }
 0x391   : > { %v3137_v54 = vpop.f32.mrf.mxu0  ;;  %8727 = vmatprep.subr.msk.bf16.mxu1 %vm2283_vm4, %v6555_v1  ;;  %v12979_v55 = vld [vmem:[#allocation51_spill] sm:$0xff] }
 0x392   : > { %v3190_v31 = vadd.f32 %v3137_v54, %v2713_v43  ;;  %v4609_v32 = vpop.f32.mrf.mxu1  ;;  %v11931_v11 = vadd.f32 %v11831_v33, %v3192_v36  ;;  %v2729_v18 = vadd.f32 %v12979_v55, %v11595_v63 }
 0x394   : > { %v8439_v49 = vpop.f32.mrf.mxu0  ;;  %v11934_v48 = vpop.f32.mrf.mxu1  ;;  %v11937_v34 = vadd.f32 %v11838_v26, %v3190_v31  ;;  %v12978_v26 = vld [vmem:[#allocation6_spill] sm:$0xff] }
 0x395   : > { %v3195_v5 = vadd.f32 %v8439_v49, %v11561_v17  ;;  %8642 = vmatmul.mubr.msk.bf16.gmra.mxu0 %vm2234_vm5, %v7833_v29  ;;  %v6605_v17 = vsel %vm2283_vm4, %v6555_v1, 0  ;;  %v12980_v49 = vld [vmem:[#allocation7_spill] sm:$0xff] }
 0x396   : > { %v3150_v57 = vpop.f32.mrf.mxu0  ;;  %v11944_v60 = vpop.f32.mrf.mxu1  ;;  %8681 = vmatprep.mubr.msk.bf16.mxu0 %vm480_vm1, %v12978_v26  ;;  %8646 = vmatpush3.bf16.msra.mxu1 %v6605_v17 }
 0x397   : > { %v3193_v25 = vadd.f32 %v3150_v57, %v11573_v47  ;;  %v11947_v33 = vadd.f32 %v11851_v6, %v3195_v5 }
 0x398   : > { %v8440_v21 = vpop.f32.mrf.mxu0  ;;  %v8521_v47 = vpop.f32.mrf.mxu1 }
 0x399   : > { %v3196_v46 = vadd.f32 %v8440_v21, %v11584_v37  ;;  %v11957_v10 = vadd.f32 %v11858_v41, %v3193_v25 }
 0x39a   : > { %v3153_v6 = vpop.f32.mrf.mxu0  ;;  %v4625_v43 = vpop.f32.mrf.mxu1 }
 0x39b   : > { %v3194_v56 = vadd.f32 %v3153_v6, %v2729_v18  ;;  %v11960_v8 = vadd.f32 %v11867_v50, %v3196_v46  ;;  %v12981_v50 = vld [vmem:[#allocation8_spill] sm:$0xff]  ;;  %v12983_v6 = vld [vmem:[#allocation9_spill] sm:$0xff] }
 0x39c   : > { %v8479_v36 = vpop.f32.mrf.mxu0  ;;  %v8522_v31 = vpop.f32.mrf.mxu1 }
 0x39d   : > { %v4252_v54 = vadd.f32 %v8479_v36, %v11762_v3  ;;  %v11964_v29 = vadd.f32 %v11877_v4, %v3194_v56  ;;  %8682 = vmatmul.mubr.msk.bf16.vlgmr.msra.gmra.mxu0 %vm480_vm1, %v12980_v49  ;;  %v12982_v4 = vld [vmem:[#allocation54_spill] sm:$0xff] }
 0x39e   : > { %v4123_v63 = vpop.f32.mrf.mxu0  ;;  %v11969_v41 = vpop.f32.mrf.mxu1  ;;  %8685 = vmatprep.mubr.msk.bf16.mxu0 %vm480_vm1, %v12981_v50  ;;  %v3525_v1 = vadd.f32 %v12982_v4, %v11653_v22 }
 0x39f   : > { %v4250_v37 = vadd.f32 %v4123_v63, %v11773_v9  ;;  %v11972_v5 = vadd.f32 %v11888_v62, %v4252_v54 }
 0x3a0   : > { %v8480_v57 = vpop.f32.mrf.mxu0  ;;  %v8525_v25 = vpop.f32.mrf.mxu1 }
 0x3a1   : > { %v11977_v3 = vadd.f32 %v8480_v57, %v11777_v38  ;;  %v11982_v17 = vadd.f32 %v11895_v19, %v4250_v37  ;;  %v12984_v19 = vld [vmem:[#allocation10_spill] sm:$0xff] }
 0x3a2   : > { %v4126_v9 = vpop.f32.mrf.mxu0  ;;  %v4641_v21 = vpop.f32.mrf.mxu1 }
 0x3a3   : > { %v11984_v26 = vadd.f32 %v4126_v9, %v3525_v1  ;;  %v12985_v9 = vld [vmem:[#allocation11_spill] sm:$0xff] }
 0x3a4   : > { %v8483_v62 = vpop.f32.mrf.mxu0  ;;  %v8526_v18 = vpop.f32.mrf.mxu1 }
 0x3a5   : > { %v4256_v55 = vadd.f32 %v8483_v62, %v11784_v35  ;;  %8686 = vmatmul.mubr.msk.bf16.gmra.mxu0 %vm480_vm1, %v12983_v6  ;;  %v3529_v35 = vadd.f32 %v11578_v51, %v11718_v45  ;;  %v12986_v45 = vld [vmem:[#allocation12_spill] sm:$0xff] }
 0x3a6   : > { %v4139_v46 = vpop.f32.mrf.mxu0  ;;  %v11990_v56 = vpop.f32.mrf.mxu1  ;;  %8689 = vmatprep.mubr.msk.bf16.mxu0 %vm480_vm1, %v12984_v19 }
 0x3a7   : > { %v4254_v38 = vadd.f32 %v4139_v46, %v11787_v20  ;;  %v11992_v22 = vadd.f32 %v8517_v28, %v4256_v55  ;;  %v12987_v46 = vld [vmem:[#allocation57_spill] sm:$0xff] }
 0x3a8   : > { %v8484_v36 = vpop.f32.mrf.mxu0  ;;  %v8529_v63 = vpop.f32.mrf.mxu1 }
 0x3a9   : > { %v11997_v54 = vadd.f32 %v8484_v36, %v11790_v53  ;;  %v12001_v49 = vadd.f32 %v4609_v32, %v4254_v38 }
 0x3aa   : > { %v4142_v37 = vpop.f32.mrf.mxu0  ;;  %v4657_v20 = vpop.f32.mrf.mxu1 }
 0x3ab   : > { %v12003_v50 = vadd.f32 %v4142_v37, %v3529_v35 }
 0x3ac   : > { %v8487_v57 = vpop.f32.mrf.mxu0  ;;  %v8530_v4 = vpop.f32.mrf.mxu1 }
 0x3ad   : > { %v4260_v28 = vadd.f32 %v8487_v57, %v11793_v59  ;;  %8690 = vmatmul.mubr.msk.bf16.gmra.mxu0 %vm480_vm1, %v12985_v9  ;;  %v3533_v59 = vadd.f32 %v12987_v46, %v11765_v23  ;;  %v12989_v9 = vld [vmem:[#allocation14_spill] sm:$0xff] }
 0x3ae   : > { %v4155_v1 = vpop.f32.mrf.mxu0  ;;  %v12009_v62 = vpop.f32.mrf.mxu1  ;;  %8693 = vmatprep.mubr.msk.bf16.mxu0 %vm480_vm1, %v12986_v45  ;;  %v12990_v45 = vld [vmem:[#allocation23_spill] sm:$0xff] }
 0x3af   : > { %v4258_v53 = vadd.f32 %v4155_v1, %v11796_v7  ;;  %v12011_v51 = vadd.f32 %v8521_v47, %v4260_v28  ;;  %v12988_v1 = vld [vmem:[#allocation13_spill] sm:$0xff] }
 0x3b0   : > { %v8488_v32 = vpop.f32.mrf.mxu0  ;;  %v8533_v6 = vpop.f32.mrf.mxu1 }
 0x3b1   : > { %v4261_v55 = vadd.f32 %v8488_v32, %v11806_v24  ;;  %v12018_v38 = vadd.f32 %v4625_v43, %v4258_v53 }
 0x3b2   : > { %v4158_v19 = vpop.f32.mrf.mxu0  ;;  %v4673_v7 = vpop.f32.mrf.mxu1 }
 0x3b3   : > { %v12020_v36 = vadd.f32 %v4158_v19, %v3533_v59  ;;  %v12022_v35 = vadd.f32 %v8522_v31, %v4261_v55 }
 0x3b4   : > { %v8491_v47 = vpop.f32.mrf.mxu0  ;;  %v8534_v57 = vpop.f32.mrf.mxu1 }
 0x3b5   : > { %v4264_v37 = vadd.f32 %v8491_v47, %v11813_v14  ;;  %8694 = vmatmul.mubr.msk.bf16.gmra.mxu0 %vm480_vm1, %v12988_v1  ;;  %v3537_v14 = vadd.f32 %v12990_v45, %v11822_v27  ;;  %v12991_v1 = vld [vmem:[#allocation15_spill] sm:$0xff] }
 0x3b6   : > { %v4171_v28 = vpop.f32.mrf.mxu0  ;;  %v12028_v23 = vpop.f32.mrf.mxu1  ;;  %8697 = vmatprep.mubr.msk.bf16.mxu0 %vm480_vm1, %v12989_v9 }
 0x3b7   : > { %v4262_v24 = vadd.f32 %v4171_v28, %v11819_v39  ;;  %v12030_v43 = vadd.f32 %v8525_v25, %v4264_v37 }
 0x3b8   : > { %v8492_v53 = vpop.f32.mrf.mxu0  ;;  %v8537_v32 = vpop.f32.mrf.mxu1 }
 0x3b9   : > { %v4265_v31 = vadd.f32 %v8492_v53, %v11828_v40  ;;  %v12037_v55 = vadd.f32 %v4641_v21, %v4262_v24  ;;  %v12992_v21 = vld [vmem:[#allocation16_spill] sm:$0xff] }
 0x3ba   : > { %v4174_v46 = vpop.f32.mrf.mxu0  ;;  %v4689_v39 = vpop.f32.mrf.mxu1 }
 0x3bb   : > { %v12039_v59 = vadd.f32 %v4174_v46, %v3537_v14  ;;  %v12041_v19 = vadd.f32 %v8526_v18, %v4265_v31 }
 0x3bc   : > { %v8495_v25 = vpop.f32.mrf.mxu0  ;;  %v8538_v37 = vpop.f32.mrf.mxu1 }
 0x3bd   : > { %v4268_v47 = vadd.f32 %v8495_v25, %v11841_v15  ;;  %8698 = vmatmul.mubr.msk.bf16.gmra.mxu0 %vm480_vm1, %v12991_v1  ;;  %v12993_v25 = vld [vmem:[#allocation17_spill] sm:$0xff] }
 0x3be   : > { %v4187_v28 = vpop.f32.mrf.mxu0  ;;  %8701 = vmatprep.mubr.msk.bf16.mxu0 %vm480_vm1, %v12992_v21  ;;  %v4692_v9 = vpop.f32.mrf.mxu1 }
 0x3bf   : > { %v4266_v40 = vadd.f32 %v4187_v28, %v11854_v44  ;;  %v12047_v27 = vadd.f32 %v8529_v63, %v4268_v47 }
 0x3c0   : > { %v8496_v24 = vpop.f32.mrf.mxu0  ;;  %v8541_v46 = vpop.f32.mrf.mxu1 }
 0x3c1   : > { %v4269_v18 = vadd.f32 %v8496_v24, %v11862_v52  ;;  %v12052_v53 = vadd.f32 %v4657_v20, %v4266_v40  ;;  %v12994_v52 = vld [vmem:[#allocation18_spill] sm:$0xff] }
 0x3c2   : > { %v4190_v31 = vpop.f32.mrf.mxu0 }
 0x3c3   : > { %v12055_v15 = vadd.f32 %v4190_v31, %v11870_v42  ;;  %v12057_v45 = vadd.f32 %v8530_v4, %v4269_v18  ;;  %v4705_v42 = vpop.f32.mrf.mxu1  ;;  %v12995_v31 = vld [vmem:[#allocation19_spill] sm:$0xff] }
 0x3c4   : > { %v8499_v14 = vpop.f32.mrf.mxu0 }
 0x3c5   : > { %v4272_v44 = vadd.f32 %v8499_v14, %v11880_v2  ;;  %8702 = vmatmul.mubr.msk.bf16.gmra.mxu0 %vm480_vm1, %v12993_v25  ;;  %v8542_v18 = vpop.f32.mrf.mxu1 }
 0x3c6   : > { %v4203_v63 = vpop.f32.mrf.mxu0  ;;  %8705 = vmatprep.mubr.msk.bf16.mxu0 %vm480_vm1, %v12994_v52 }
 0x3c7   : > { %v4270_v47 = vadd.f32 %v4203_v63, %v11891_v30  ;;  %v12063_v28 = vadd.f32 %v8533_v6, %v4272_v44 }
 0x3c8   : > { %v8500_v20 = vpop.f32.mrf.mxu0 }
 0x3c9   : > { %v4273_v4 = vadd.f32 %v8500_v20, %v11898_v16  ;;  %v12068_v1 = vadd.f32 %v4673_v7, %v4270_v47  ;;  %v12996_v16 = vld [vmem:[#allocation20_spill] sm:$0xff] }
 0x3ca   : > { %v4206_v40 = vpop.f32.mrf.mxu0 }
 0x3cb   : > { %v12071_v2 = vadd.f32 %v4206_v40, %v11907_v61  ;;  %v12073_v21 = vadd.f32 %v8534_v57, %v4273_v4  ;;  %v4708_v61 = vpop.f32.mrf.mxu1  ;;  %v12997_v4 = vld [vmem:[#allocation21_spill] sm:$0xff] }
 0x3cc   : > { %v8503_v24 = vpop.f32.mrf.mxu0 }
 0x3cd   : > { %v4276_v30 = vadd.f32 %v8503_v24, %v11917_v12  ;;  %8706 = vmatmul.mubr.msk.bf16.gmra.mxu0 %vm480_vm1, %v12995_v31 }
 0x3ce   : > { %v4219_v6 = vpop.f32.mrf.mxu0  ;;  %8709 = vmatprep.mubr.msk.bf16.mxu0 %vm480_vm1, %v12996_v16 }
 0x3cf   : > { %v4274_v14 = vadd.f32 %v4219_v6, %v11928_v13  ;;  %v12079_v44 = vadd.f32 %v8537_v32, %v4276_v30 }
 0x3d0   : > { %v8504_v7 = vpop.f32.mrf.mxu0 }
 0x3d1   : > { %v4277_v57 = vadd.f32 %v8504_v7, %v11931_v11  ;;  %v12084_v63 = vadd.f32 %v4689_v39, %v4274_v14 }
 0x3d2   : > { %v4222_v25 = vpop.f32.mrf.mxu0  ;;  %v12089_v52 = vpop.f32.mrf.mxu1 }
 0x3d3   : > { %v4275_v12 = vadd.f32 %v4222_v25, %v11937_v34  ;;  %v12087_v47 = vadd.f32 %v8538_v37, %v4277_v57 }
 0x3d4   : > { %v12093_v13 = vpop.f32.mrf.mxu1 }
 0x3d5   : > { %v12091_v20 = vadd.f32 %v4692_v9, %v4275_v12  ;;  %v8507_v32 = vpop.f32.mrf.mxu0  ;;  %8710 = vmatmul.mubr.msk.bf16.gmra.mxu0 %vm480_vm1, %v12997_v4 }
 0x3d6   : > { %v4280_v40 = vadd.f32 %v8507_v32, %v11947_v33  ;;  %v12098_v39 = vpop.f32.mrf.mxu1 }
 0x3d7   : > { %v4235_v11 = vpop.f32.mrf.mxu0 }
 0x3d8   : > { %v4278_v24 = vadd.f32 %v4235_v11, %v11957_v10  ;;  %v12101_v34 = vadd.f32 %v8541_v46, %v4280_v40  ;;  %v12106_v6 = vpop.f32.mrf.mxu1 }
 0x3d9   : > { %v8508_v37 = vpop.f32.mrf.mxu0 }
 0x3da   : > { %v4281_v30 = vadd.f32 %v8508_v37, %v11960_v8  ;;  %v12104_v9 = vadd.f32 %v4705_v42, %v4278_v24 }
 0x3db   : > { %v4238_v31 = vpop.f32.mrf.mxu0 }
 0x3dc   : > { %v4279_v14 = vadd.f32 %v4238_v31, %v11964_v29  ;;  %v12109_v16 = vadd.f32 %v8542_v18, %v4281_v30 }
 0x3dd   : > { %v8547_v33 = vpop.f32.mrf.mxu0 }
 0x3de   : > { %v12112_v7 = vadd.f32 %v8547_v33, %v11972_v5  ;;  %v12114_v57 = vadd.f32 %v4708_v61, %v4279_v14  ;;  %v12116_v10 = vpop.f32.mrf.mxu1 }
 0x3df   : > { %v4952_v46 = vpop.f32.mrf.mxu0 }
 0x3e0   : > { %v12119_v8 = vadd.f32 %v4952_v46, %v11982_v17  ;;  %v12123_v25 = vpop.f32.mrf.mxu1 }
 0x3e1   : > { %v12121_v42 = vpop.f32.mrf.mxu0 }
 0x3e2   : > { %v12130_v5 = vpop.f32.mrf.mxu1 }
 0x3e3   : > { %v12125_v12 = vpop.f32.mrf.mxu0 }
 0x3e4   : > { %v12137_v17 = vpop.f32.mrf.mxu1 }
 0x3e5   : > { %v8551_v29 = vpop.f32.mrf.mxu0 }
 0x3e6   : > { %v12128_v18 = vadd.f32 %v8551_v29, %v11992_v22 }
 0x3e7   : > { %v4968_v61 = vpop.f32.mrf.mxu0 }
 0x3e8   : > { %v12133_v32 = vadd.f32 %v4968_v61, %v12001_v49  ;;  %v12144_v37 = vpop.f32.mrf.mxu1 }
 0x3e9   : > { %v12135_v4 = vpop.f32.mrf.mxu0 }
 0x3ea   : > { %v12152_v14 = vpop.f32.mrf.mxu1 }
 0x3eb   : > { %v12139_v40 = vpop.f32.mrf.mxu0  ;;  %12999 = vst [vmem:[#allocation33_spill] sm:$0xff] %v12152_v14 }
 0x3ed   : > { %v8555_v11 = vpop.f32.mrf.mxu0 }
 0x3ee   : > { %v12142_v24 = vadd.f32 %v8555_v11, %v12011_v51  ;;  %v12159_v51 = vpop.f32.mrf.mxu1 }
 0x3ef   : > { %v4984_v22 = vpop.f32.mrf.mxu0 }
 0x3f0   : > { %v12147_v30 = vadd.f32 %v4984_v22, %v12018_v38 }
 0x3f1   : > { %v8556_v31 = vpop.f32.mrf.mxu0 }
 0x3f2   : > { %v12150_v49 = vadd.f32 %v8556_v31, %v12022_v35  ;;  %v12167_v35 = vpop.f32.mrf.mxu1 }
 0x3f3   : > { %v12154_v33 = vpop.f32.mrf.mxu0 }
 0x3f4   : > { %12998 = vst [vmem:[#allocation30_spill] sm:$0xff] %v12150_v49 }
 0x3f5   : > { %v8559_v46 = vpop.f32.mrf.mxu0 }
 0x3f6   : > { %v12157_v29 = vadd.f32 %v8559_v46, %v12030_v43  ;;  %v12174_v43 = vpop.f32.mrf.mxu1 }
 0x3f7   : > { %v5000_v61 = vpop.f32.mrf.mxu0 }
 0x3f8   : > { %13000 = vst [vmem:[#allocation24_spill] sm:$0xff] %v12157_v29  ;;  %v12162_v11 = vadd.f32 %v5000_v61, %v12037_v55 }
 0x3f9   : > { %v8560_v38 = vpop.f32.mrf.mxu0 }
 0x3fa   : > { %13001 = vst [vmem:[#allocation37_spill] sm:$0xff] %v12162_v11  ;;  %v12165_v22 = vadd.f32 %v8560_v38, %v12041_v19  ;;  %v12182_v19 = vpop.f32.mrf.mxu1 }
 0x3fb   : > { %v12169_v31 = vpop.f32.mrf.mxu0 }
 0x3fc   : > { %13002 = vst [vmem:[#allocation25_spill] sm:$0xff] %v12165_v22 }
 0x3fd   : > { %v8563_v49 = vpop.f32.mrf.mxu0 }
 0x3fe   : > { %v12172_v14 = vadd.f32 %v8563_v49, %v12047_v27  ;;  %v12189_v27 = vpop.f32.mrf.mxu1 }
 0x3ff   : > { %v5016_v46 = vpop.f32.mrf.mxu0 }
 0x400   : > { %13003 = vst [vmem:[#allocation39_spill] sm:$0xff] %v12172_v14  ;;  %v12177_v29 = vadd.f32 %v5016_v46, %v12052_v53 }
 0x401   : > { %v8564_v55 = vpop.f32.mrf.mxu0 }
 0x402   : > { %13004 = vst [vmem:[#allocation26_spill] sm:$0xff] %v12177_v29  ;;  %v12180_v61 = vadd.f32 %v8564_v55, %v12057_v45  ;;  %v12197_v45 = vpop.f32.mrf.mxu1 }
 0x403   : > { %v12184_v38 = vpop.f32.mrf.mxu0 }
 0x404   : > { %13005 = vst [vmem:[#allocation46_spill] sm:$0xff] %v12180_v61 }
 0x405   : > { %v8567_v22 = vpop.f32.mrf.mxu0 }
 0x406   : > { %v12187_v11 = vadd.f32 %v8567_v22, %v12063_v28  ;;  %v12204_v28 = vpop.f32.mrf.mxu1 }
 0x407   : > { %v5032_v49 = vpop.f32.mrf.mxu0 }
 0x408   : > { %13006 = vst [vmem:[#allocation28_spill] sm:$0xff] %v12187_v11  ;;  %v12192_v14 = vadd.f32 %v5032_v49, %v12068_v1 }
 0x409   : > { %v8568_v53 = vpop.f32.mrf.mxu0 }
 0x40a   : > { %13007 = vst [vmem:[#allocation48_spill] sm:$0xff] %v12192_v14  ;;  %v12195_v46 = vadd.f32 %v8568_v53, %v12073_v21  ;;  %v12212_v21 = vpop.f32.mrf.mxu1 }
 0x40b   : > { %v12199_v55 = vpop.f32.mrf.mxu0 }
 0x40c   : > { %13008 = vst [vmem:[#allocation29_spill] sm:$0xff] %v12195_v46 }
 0x40d   : > { %v8571_v61 = vpop.f32.mrf.mxu0 }
 0x40e   : > { %v12202_v29 = vadd.f32 %v8571_v61, %v12079_v44  ;;  %v12220_v61 = vpop.f32.mrf.mxu1 }
 0x40f   : > { %v5048_v22 = vpop.f32.mrf.mxu0 }
 0x410   : > { %13009 = vst [vmem:[#allocation22_spill] sm:$0xff] %v12202_v29  ;;  %v12207_v11 = vadd.f32 %v5048_v22, %v12084_v63 }
 0x411   : > { %v8572_v1 = vpop.f32.mrf.mxu0 }
 0x412   : > { %v12210_v49 = vadd.f32 %v8572_v1, %v12087_v47  ;;  %v4723_v47 = vadd.f32 %v11904_v0, %v11977_v3  ;;  %v12243_v0 = vld [vmem:[%s12839_s6] ss:$0 sm:$0xff] }
 0x413   : > { %v5051_v53 = vpop.f32.mrf.mxu0 }
 0x414   : > { %13010 = vst [vmem:[#allocation31_spill] sm:$0xff] %v12210_v49  ;;  %v12215_v46 = vadd.f32 %v5051_v53, %v12091_v20  ;;  %v12230_v49 = vpop.f32.mrf.mxu1  ;;  %v5082_v53 = vadd.f32 %v12121_v42, %v4723_v47  ;;  %v5805_v42 = vadd.f32 %v12093_v13, %v12119_v8 }
 0x415   : > { %v8575_v14 = vpop.f32.mrf.mxu0 }
 0x416   : > { %v12218_v44 = vadd.f32 %v8575_v14, %v12101_v34  ;;  %v4721_v34 = vadd.f32 %v11914_v58, %v11984_v26 }
 0x417   : > { %v5064_v29 = vpop.f32.mrf.mxu0 }
 0x418   : > { %v12223_v63 = vadd.f32 %v5064_v29, %v12104_v9  ;;  %v5807_v9 = vadd.f32 %v12089_v52, %v12112_v7  ;;  %v5080_v3 = vadd.f32 %v12125_v12, %v4721_v34  ;;  %v5808_v52 = vadd.f32 %v12098_v39, %v5082_v53 }
 0x419   : > { %v8576_v22 = vpop.f32.mrf.mxu0  ;;  %v4727_v7 = vadd.f32 %v11934_v48, %v11997_v54 }
 0x41a   : > { %v12228_v1 = vadd.f32 %v8576_v22, %v12109_v16  ;;  %v12248_v22 = vpop.f32.mrf.mxu1  ;;  %v5806_v13 = vadd.f32 %v12106_v6, %v5080_v3  ;;  %v4729_v6 = vadd.f32 %v11969_v41, %v12020_v36  ;;  %v4737_v41 = vadd.f32 %v12009_v62, %v12055_v15 }
 0x41b   : > { %v5067_v20 = vpop.f32.mrf.mxu0  ;;  %v5086_v8 = vadd.f32 %v12135_v4, %v4727_v7  ;;  %v5811_v4 = vadd.f32 %v12116_v10, %v12128_v18 }
 0x41c   : > { %v12236_v14 = vadd.f32 %v5067_v20, %v12114_v57 }
 0x41d   : > { %v8615_v29 = vpop.f32.mrf.mxu0  ;;  %v5812_v18 = vadd.f32 %v12130_v5, %v5086_v8 }
 0x41e   : > { %v6277_v16 = vadd.f32 %v8615_v29, %v5807_v9  ;;  %v4725_v9 = vadd.f32 %v11944_v60, %v12003_v50  ;;  %v12264_v29 = vpop.f32.mrf.mxu1  ;;  %v5809_v60 = vadd.f32 %v12123_v25, %v12133_v32 }
 0x41f   : > { %v6148_v58 = vpop.f32.mrf.mxu0 }
 0x420   : > { %v12251_v26 = vadd.f32 %v12243_v0, %v6277_v16  ;;  %v6275_v57 = vadd.f32 %v6148_v58, %v5805_v42  ;;  %v5084_v42 = vadd.f32 %v12139_v40, %v4725_v9  ;;  %v4733_v40 = vadd.f32 %v11990_v56, %v12039_v59 }
 0x421   : > { %v8616_v47 = vpop.f32.mrf.mxu0 }
 0x422   : > { %v6348_v20 = vsub.f32 0.0, %v12251_v26  ;;  %v12258_v12 = vadd.f32 %v12243_v0, %v6275_v57  ;;  %v6278_v34 = vadd.f32 %v8616_v47, %v5808_v52  ;;  %v12283_v52 = vpop.f32.mrf.mxu1  ;;  %v5088_v47 = vadd.f32 %v12154_v33, %v4729_v6 }
 0x423   : > { %v6151_v39 = vpop.f32.mrf.mxu0  ;;  %v5810_v62 = vadd.f32 %v12137_v17, %v5084_v42  ;;  %v5092_v42 = vadd.f32 %v12169_v31, %v4733_v40  ;;  %v13014_v40 = vld [vmem:[#allocation37_spill] sm:$0xff] }
 0x424   : > { %v6382_v53 = vmul.f32 1.442695, %v6348_v20  ;;  %v6346_v48 = vsub.f32 0.0, %v12258_v12  ;;  %v12268_v54 = vadd.f32 %v12243_v0, %v6278_v34  ;;  %v6276_v16 = vadd.f32 %v6151_v39, %v5806_v13  ;;  %v12299_v13 = vpop.f32.mrf.mxu1  ;;  %v13012_v39 = vld [vmem:[#allocation30_spill] sm:$0xff] }
 0x425   : > { %v8619_v3 = vpop.f32.mrf.mxu0  ;;  %v4741_v20 = vadd.f32 %v12028_v23, %v12071_v2  ;;  %v5815_v23 = vadd.f32 %v12144_v37, %v12142_v24  ;;  %v13011_v2 = vld [vmem:[#allocation33_spill] sm:$0xff]  ;;  %v5816_v17 = vadd.f32 %v12159_v51, %v13012_v39  ;;  %v13013_v24 = vld [vmem:[#allocation24_spill] sm:$0xff] }
 0x426   : > { %9091 = vpow2.f32 %v6382_v53  ;;  %v6378_v50 = vmul.f32 1.442695, %v6346_v48  ;;  %v6349_v58 = vsub.f32 0.0, %v12268_v54  ;;  %v12279_v57 = vadd.f32 %v12243_v0, %v6276_v16 }
 0x427   : > { %v6281_v36 = vadd.f32 %v8619_v3, %v5811_v4  ;;  %v6164_v10 = vpop.f32.mrf.mxu0  ;;  %v5813_v9 = vadd.f32 %v13011_v2, %v12147_v30  ;;  %v5814_v3 = vadd.f32 %v12167_v35, %v5088_v47  ;;  %v5819_v37 = vadd.f32 %v12174_v43, %v13013_v24  ;;  %v13015_v35 = vld [vmem:[#allocation25_spill] sm:$0xff] }
 0x428   : > { %9093 = vpow2.f32 %v6378_v50  ;;  %v6384_v25 = vmul.f32 1.442695, %v6349_v58  ;;  %v6347_v32 = vsub.f32 0.0, %v12279_v57  ;;  %v6279_v7 = vadd.f32 %v6164_v10, %v5809_v60 }
 0x429   : > { %v12293_v56 = vadd.f32 %v12243_v0, %v6281_v36  ;;  %v8620_v59 = vpop.f32.mrf.mxu0  ;;  %v5096_v58 = vadd.f32 %v12184_v38, %v4737_v41  ;;  %v12321_v36 = vpop.f32.mrf.mxu1  ;;  %v5817_v10 = vadd.f32 %v12182_v19, %v13014_v40  ;;  %v5818_v38 = vadd.f32 %v12197_v45, %v5092_v42  ;;  %v13016_v41 = vld [vmem:[#allocation39_spill] sm:$0xff]  ;;  %v13018_v45 = vld [vmem:[#allocation46_spill] sm:$0xff] }
 0x42a   : > { %9095 = vpow2.f32 %v6384_v25  ;;  %v6380_v15 = vmul.f32 1.442695, %v6347_v32  ;;  %v12297_v5 = vadd.f32 %v12243_v0, %v6279_v7  ;;  %v6282_v34 = vadd.f32 %v8620_v59, %v5812_v18 }
 0x42b   : > { %v6352_v8 = vsub.f32 0.0, %v12293_v56  ;;  %v6167_v33 = vpop.f32.mrf.mxu0  ;;  %v5820_v18 = vadd.f32 %v12189_v27, %v13015_v35  ;;  %v12334_v59 = vadd.f32 %v12204_v28, %v13016_v41  ;;  %v12349_v28 = vadd.f32 %v12230_v49, %v5096_v58 }
 0x42c   : > { %9097 = vpow2.f32 %v6380_v15  ;;  %v6350_v53 = vsub.f32 0.0, %v12297_v5  ;;  %v12310_v48 = vadd.f32 %v12243_v0, %v6282_v34  ;;  %v6280_v16 = vadd.f32 %v6167_v33, %v5810_v62  ;;  %v13017_v62 = vld [vmem:[#allocation26_spill] sm:$0xff]  ;;  %v5774_v33 = vpop.f32.mrf.mxu1 }
 0x42d   : > { %v6390_v6 = vmul.f32 1.442695, %v6352_v8  ;;  %v8623_v4 = vpop.f32.mrf.mxu0  ;;  %v12338_v19 = vadd.f32 %v12212_v21, %v13017_v62  ;;  %v13019_v21 = vld [vmem:[#allocation28_spill] sm:$0xff] }
 0x42e   : > { %v6386_v30 = vmul.f32 1.442695, %v6350_v53  ;;  %v6353_v60 = vsub.f32 0.0, %v12310_v48  ;;  %v12318_v51 = vadd.f32 %v12243_v0, %v6280_v16  ;;  %v6285_v50 = vadd.f32 %v8623_v4, %v5815_v23 }
 0x42f   : > { %9099 = vpow2.f32 %v6390_v6  ;;  %v6180_v31 = vpop.f32.mrf.mxu0  ;;  %v12353_v39 = vadd.f32 %v12248_v22, %v13019_v21  ;;  %v5100_v6 = vadd.f32 %v12199_v55, %v4741_v20  ;;  %v13021_v20 = vld [vmem:[#allocation29_spill] sm:$0xff]  ;;  %v13022_v21 = vld [vmem:[#allocation22_spill] sm:$0xff] }
 0x430   : > { %9101 = vpow2.f32 %v6386_v30  ;;  %v6392_v43 = vmul.f32 1.442695, %v6353_v60  ;;  %v6351_v25 = vsub.f32 0.0, %v12318_v51  ;;  %v12329_v32 = vadd.f32 %v12243_v0, %v6285_v50  ;;  %v13020_v30 = vld [vmem:[#allocation48_spill] sm:$0xff] }
 0x431   : > { %v6283_v7 = vadd.f32 %v6180_v31, %v5813_v9  ;;  %v8624_v47 = vpop.f32.mrf.mxu0  ;;  %v12346_v9 = vadd.f32 %v12220_v61, %v13018_v45  ;;  %v12362_v49 = vadd.f32 %v12264_v29, %v13020_v30  ;;  %v8606_v31 = vpop.f32.mrf.mxu1  ;;  %v12377_v62 = vadd.f32 %v12299_v13, %v5100_v6 }
 0x432   : > { %9103 = vpow2.f32 %v6392_v43  ;;  %v6388_v27 = vmul.f32 1.442695, %v6351_v25  ;;  %v6356_v15 = vsub.f32 0.0, %v12329_v32  ;;  %v6286_v34 = vadd.f32 %v8624_v47, %v5816_v17 }
 0x433   : > { %v9092_v8 = vpop.eup %9091  ;;  %v12342_v23 = vadd.f32 %v12243_v0, %v6283_v7  ;;  %v6183_v2 = vpop.f32.mrf.mxu0  ;;  %v12392_v30 = vadd.f32 %v5774_v33, %v12207_v11 }
 0x434   : > { %v6444_v53 = vadd.f32 1.0, %v9092_v8  ;;  %9105 = vpow2.f32 %v6388_v27  ;;  %v6398_v17 = vmul.f32 1.442695, %v6356_v15  ;;  %v12356_v16 = vadd.f32 %v12243_v0, %v6286_v34  ;;  %v5777_v34 = vpop.f32.mrf.mxu1 }
 0x435   : > { %v9094_v42 = vpop.eup %9093  ;;  %v6354_v4 = vsub.f32 0.0, %v12342_v23  ;;  %v6284_v61 = vadd.f32 %v6183_v2, %v5814_v3  ;;  %v8627_v24 = vpop.f32.mrf.mxu0  ;;  %v12370_v3 = vadd.f32 %v12283_v52, %v13021_v20 }
 0x436   : > { %9107 = vrcp.f32 %v6444_v53  ;;  %v6442_v22 = vadd.f32 1.0, %v9094_v42  ;;  %v6357_v60 = vsub.f32 0.0, %v12356_v16  ;;  %v6289_v50 = vadd.f32 %v8627_v24, %v5819_v37 }
 0x437   : > { %v9096_v58 = vpop.eup %9095  ;;  %9109 = vpow2.f32 %v6398_v17  ;;  %v6394_v40 = vmul.f32 1.442695, %v6354_v4  ;;  %v12366_v35 = vadd.f32 %v12243_v0, %v6284_v61  ;;  %v6196_v55 = vpop.f32.mrf.mxu0  ;;  %v12385_v53 = vadd.f32 %v12321_v36, %v13022_v21 }
 0x438   : > { %9111 = vrcp.f32 %v6442_v22  ;;  %v6445_v29 = vadd.f32 1.0, %v9096_v58  ;;  %v6400_v43 = vmul.f32 1.442695, %v6357_v60  ;;  %v12373_v25 = vadd.f32 %v12243_v0, %v6289_v50 }
 0x439   : > { %v9098_v7 = vpop.eup %9097  ;;  %9113 = vpow2.f32 %v6394_v40  ;;  %v6355_v37 = vsub.f32 0.0, %v12366_v35  ;;  %v6287_v47 = vadd.f32 %v6196_v55, %v5817_v10  ;;  %v8628_v41 = vpop.f32.mrf.mxu0  ;;  %v13023_v55 = vld [vmem:[#allocation31_spill] sm:$0xff] }
 0x43a   : > { %9115 = vrcp.f32 %v6445_v29  ;;  %v6443_v27 = vadd.f32 1.0, %v9098_v7  ;;  %v6360_v52 = vsub.f32 0.0, %v12373_v25  ;;  %v6290_v15 = vadd.f32 %v8628_v41, %v5820_v18  ;;  %v8609_v18 = vpop.f32.mrf.mxu1 }
 0x43b   : > { %9117 = vpow2.f32 %v6400_v43  ;;  %v6396_v8 = vmul.f32 1.442695, %v6355_v37  ;;  %v12381_v2 = vadd.f32 %v12243_v0, %v6287_v47  ;;  %v6199_v45 = vpop.f32.mrf.mxu0  ;;  %v12400_v20 = vadd.f32 %v8606_v31, %v13023_v55 }
 0x43c   : > { %v9100_v10 = vpop.eup %9099  ;;  %9119 = vrcp.f32 %v6443_v27  ;;  %v6406_v13 = vmul.f32 1.442695, %v6360_v52  ;;  %v12388_v17 = vadd.f32 %v12243_v0, %v6290_v15  ;;  %v6288_v42 = vadd.f32 %v6199_v45, %v5818_v38  ;;  %v5790_v7 = vpop.f32.mrf.mxu1 }
 0x43d   : > { %v9102_v6 = vpop.eup %9101  ;;  %v6448_v4 = vadd.f32 1.0, %v9100_v10  ;;  %9121 = vpow2.f32 %v6396_v8  ;;  %v6358_v61 = vsub.f32 0.0, %v12381_v2  ;;  %v8631_v24 = vpop.f32.mrf.mxu0  ;;  %v12412_v8 = vadd.f32 %v8609_v18, %v12218_v44 }
 0x43e   : > { %v6446_v22 = vadd.f32 1.0, %v9102_v6  ;;  %9123 = vpow2.f32 %v6406_v13  ;;  %v6361_v36 = vsub.f32 0.0, %v12388_v17  ;;  %v12396_v60 = vadd.f32 %v12243_v0, %v6288_v42 }
 0x43f   : > { %v9104_v50 = vpop.eup %9103  ;;  %9125 = vrcp.f32 %v6448_v4  ;;  %v6402_v38 = vmul.f32 1.442695, %v6358_v61  ;;  %v6293_v58 = vadd.f32 %v8631_v24, %v12334_v59  ;;  %v6212_v40 = vpop.f32.mrf.mxu0  ;;  %v12408_v59 = vadd.f32 %v5777_v34, %v12215_v46 }
 0x440   : > { %9127 = vrcp.f32 %v6446_v22  ;;  %v6449_v29 = vadd.f32 1.0, %v9104_v50  ;;  %v6408_v11 = vmul.f32 1.442695, %v6361_v36  ;;  %v6359_v33 = vsub.f32 0.0, %v12396_v60 }
 0x441   : > { %v9106_v43 = vpop.eup %9105  ;;  %9129 = vpow2.f32 %v6402_v38  ;;  %v12404_v37 = vadd.f32 %v12243_v0, %v6293_v58  ;;  %v6291_v47 = vadd.f32 %v6212_v40, %v12338_v19  ;;  %v8632_v41 = vpop.f32.mrf.mxu0  ;;  %v12419_v46 = vadd.f32 %v5790_v7, %v12223_v63 }
 0x442   : > { %9131 = vrcp.f32 %v6449_v29  ;;  %v6447_v31 = vadd.f32 1.0, %v9106_v43  ;;  %v6404_v27 = vmul.f32 1.442695, %v6359_v33  ;;  %v6294_v52 = vadd.f32 %v8632_v41, %v12346_v9 }
 0x443   : > { %v9108_v15 = vpop.eup %9107  ;;  %9133 = vpow2.f32 %v6408_v11  ;;  %v6364_v45 = vsub.f32 0.0, %v12404_v37  ;;  %v12416_v21 = vadd.f32 %v12243_v0, %v6291_v47  ;;  %v6215_v19 = vpop.f32.mrf.mxu0 }
 0x444   : > { %v9110_v10 = vpop.eup %9109  ;;  %9135 = vrcp.f32 %v6447_v31  ;;  %v12422_v34 = vadd.f32 %v12243_v0, %v6294_v52  ;;  %v6292_v9 = vadd.f32 %v6215_v19, %v12349_v28  ;;  %v6508_v61 = vmul.f32 %v9108_v15, %v12251_v26 }
 0x445   : > { %v9112_v13 = vpop.eup %9111  ;;  %v6452_v44 = vadd.f32 1.0, %v9110_v10  ;;  %9137 = vpow2.f32 %v6404_v27  ;;  %v6414_v42 = vmul.f32 1.442695, %v6364_v45  ;;  %v6362_v6 = vsub.f32 0.0, %v12416_v21  ;;  %v8635_v18 = vpop.f32.mrf.mxu0 }
 0x446   : > { %v9114_v4 = vpop.eup %9113  ;;  %v6365_v24 = vsub.f32 0.0, %v12422_v34  ;;  %v12429_v63 = vadd.f32 %v12243_v0, %v6292_v9  ;;  %v6297_v22 = vadd.f32 %v8635_v18, %v12353_v39  ;;  %v6506_v28 = vmul.f32 %v9112_v13, %v12258_v12 }
 0x447   : > { %v9116_v36 = vpop.eup %9115  ;;  %9139 = vrcp.f32 %v6452_v44  ;;  %v6450_v50 = vadd.f32 1.0, %v9114_v4  ;;  %v6410_v38 = vmul.f32 1.442695, %v6362_v6  ;;  %v6228_v58 = vpop.f32.mrf.mxu0 }
 0x448   : > { %v9118_v40 = vpop.eup %9117  ;;  %v6509_v55 = vmul.f32 %v9116_v36, %v12268_v54  ;;  %9141 = vpow2.f32 %v6414_v42  ;;  %v6416_v29 = vmul.f32 1.442695, %v6365_v24  ;;  %v6363_v26 = vsub.f32 0.0, %v12429_v63 }
 0x449   : > { %v9120_v11 = vpop.eup %9119  ;;  %9143 = vrcp.f32 %v6450_v50  ;;  %v6453_v33 = vadd.f32 1.0, %v9118_v40  ;;  %v12436_v43 = vadd.f32 %v12243_v0, %v6297_v22  ;;  %v6295_v39 = vadd.f32 %v6228_v58, %v12362_v49  ;;  %v8636_v12 = vpop.f32.mrf.mxu0 }
 0x44a   : > { %v9122_v7 = vpop.eup %9121  ;;  %v6539_v47 = vpack.c.bf16 %v6509_v55, %v6508_v61  ;;  %v6507_v41 = vmul.f32 %v9120_v11, %v12279_v57  ;;  %9145 = vpow2.f32 %v6410_v38  ;;  %v6412_v31 = vmul.f32 1.442695, %v6363_v26  ;;  %v8610_v11 = vpop.f32.mrf.mxu1 }
 0x44b   : > { %v9124_v54 = vpop.eup %9123  ;;  %9147 = vrcp.f32 %v6453_v33  ;;  %v6451_v27 = vadd.f32 1.0, %v9122_v7  ;;  %v6368_v52 = vsub.f32 0.0, %v12436_v43  ;;  %v12442_v15 = vadd.f32 %v12243_v0, %v6295_v39  ;;  %v6231_v45 = vpop.f32.mrf.mxu0 }
 0x44c   : > { %v9126_v19 = vpop.eup %9125  ;;  %v6538_v10 = vpack.c.bf16 %v6507_v41, %v6506_v28  ;;  %v6456_v9 = vadd.f32 1.0, %v9124_v54  ;;  %9149 = vpow2.f32 %v6416_v29  ;;  %v6298_v49 = vadd.f32 %v8636_v12, %v12370_v3 }
 0x44d   : > { %v9128_v13 = vpop.eup %9127  ;;  %v12446_v57 = vmul.f32 %v9126_v19, %v12293_v56  ;;  %9151 = vrcp.f32 %v6451_v27  ;;  %v6422_v44 = vmul.f32 1.442695, %v6368_v52  ;;  %v6366_v42 = vsub.f32 0.0, %v12442_v15  ;;  %v8639_v6 = vpop.f32.mrf.mxu0 }
 0x44e   : > { %v9130_v18 = vpop.eup %9129  ;;  %v6510_v4 = vmul.f32 %v9128_v13, %v12297_v5  ;;  %9153 = vrcp.f32 %v6456_v9  ;;  %v12451_v61 = vadd.f32 %v12243_v0, %v6298_v49  ;;  %v6296_v24 = vadd.f32 %v6231_v45, %v12377_v62  ;;  %8647 = vmatprep.mubr.msk.bf16.mxu1 %vm2234_vm5, %v6538_v10 }
 0x44f   : > { %v9132_v3 = vpop.eup %9131  ;;  %v6454_v22 = vadd.f32 1.0, %v9130_v18  ;;  %9155 = vpow2.f32 %v6412_v31  ;;  %v6418_v56 = vmul.f32 1.442695, %v6366_v42  ;;  %v6301_v36 = vadd.f32 %v8639_v6, %v12385_v53  ;;  %v6244_v28 = vpop.f32.mrf.mxu0  ;;  %8648 = vmatmul.mubr.msk.bf16.vlgmr.msra.gmra.mxu1 %vm2234_vm5, %v6539_v47 }
 0x450   : > { %v9134_v50 = vpop.eup %9133  ;;  %v6513_v5 = vmul.f32 %v9132_v3, %v12310_v48  ;;  %9157 = vpow2.f32 %v6422_v44  ;;  %v6369_v38 = vsub.f32 0.0, %v12451_v61  ;;  %v12460_v58 = vadd.f32 %v12243_v0, %v6296_v24 }
 0x451   : > { %v9136_v62 = vpop.eup %9135  ;;  %9159 = vrcp.f32 %v6454_v22  ;;  %v6457_v40 = vadd.f32 1.0, %v9134_v50  ;;  %v12463_v55 = vadd.f32 %v12243_v0, %v6301_v36  ;;  %v6299_v53 = vadd.f32 %v6244_v28, %v12392_v30  ;;  %v8640_v29 = vpop.f32.mrf.mxu0 }
 0x452   : > { %v9138_v26 = vpop.eup %9137  ;;  %v6541_v33 = vpack.c.bf16 %v6513_v5, %v12446_v57  ;;  %v6511_v48 = vmul.f32 %v9136_v62, %v12318_v51  ;;  %9161 = vpow2.f32 %v6418_v56  ;;  %v6424_v39 = vmul.f32 1.442695, %v6369_v38  ;;  %v5793_v56 = vpop.f32.mrf.mxu1 }
 0x453   : > { %9163 = vrcp.f32 %v6457_v40  ;;  %v6455_v12 = vadd.f32 1.0, %v9138_v26  ;;  %v6367_v7 = vsub.f32 0.0, %v12460_v58  ;;  %v6372_v47 = vsub.f32 0.0, %v12463_v55  ;;  %v6247_v41 = vpop.f32.mrf.mxu0 }
 0x454   : > { %v9140_v31 = vpop.eup %9139  ;;  %v6540_v54 = vpack.c.bf16 %v6511_v48, %v6510_v4  ;;  %9165 = vpow2.f32 %v6424_v39  ;;  %v12471_v30 = vadd.f32 %v12243_v0, %v6299_v53  ;;  %v6302_v27 = vadd.f32 %v8640_v29, %v12400_v20 }
 0x455   : > { %v9142_v52 = vpop.eup %9141  ;;  %v5836_v51 = vadd.f32 %v8610_v11, %v12228_v1  ;;  %9167 = vrcp.f32 %v6455_v12  ;;  %v6420_v45 = vmul.f32 1.442695, %v6367_v7  ;;  %v6430_v19 = vmul.f32 1.442695, %v6372_v47  ;;  %v8643_v10 = vpop.f32.mrf.mxu0 }
 0x456   : > { %v9144_v9 = vpop.eup %9143  ;;  %v6460_v49 = vadd.f32 1.0, %v9142_v52  ;;  %v6370_v13 = vsub.f32 0.0, %v12471_v30  ;;  %v12477_v57 = vadd.f32 %v12243_v0, %v6302_v27  ;;  %v6300_v44 = vadd.f32 %v6247_v41, %v12408_v59  ;;  %8651 = vmatprep.mubr.msk.bf16.mxu1 %vm2234_vm5, %v6540_v54 }
 0x457   : > { %v9146_v42 = vpop.eup %9145  ;;  %v6516_v20 = vmul.f32 %v9140_v31, %v12329_v32  ;;  %v6514_v1 = vmul.f32 %v9144_v9, %v12342_v23  ;;  %9169 = vpow2.f32 %v6420_v45  ;;  %v6305_v6 = vadd.f32 %v8643_v10, %v12412_v8  ;;  %v6260_v18 = vpop.f32.mrf.mxu0  ;;  %8652 = vmatmul.mubr.msk.bf16.gmra.mxu1 %vm2234_vm5, %v6541_v33 }
 0x458   : > { %v9148_v4 = vpop.eup %9147  ;;  %9171 = vrcp.f32 %v6460_v49  ;;  %v6458_v24 = vadd.f32 1.0, %v9146_v42  ;;  %v6426_v3 = vmul.f32 1.442695, %v6370_v13  ;;  %v6373_v22 = vsub.f32 0.0, %v12477_v57 }
 0x459   : > { %v9150_v59 = vpop.eup %9149  ;;  %v6517_v36 = vmul.f32 %v9148_v4, %v12356_v16  ;;  %9173 = vpow2.f32 %v6430_v19  ;;  %v12488_v32 = vadd.f32 %v12243_v0, %v6300_v44  ;;  %v12491_v23 = vadd.f32 %v12243_v0, %v6305_v6  ;;  %v8644_v8 = vpop.f32.mrf.mxu0 }
 0x45a   : > { %v9152_v28 = vpop.eup %9151  ;;  %9175 = vrcp.f32 %v6458_v24  ;;  %v6461_v50 = vadd.f32 1.0, %v9150_v59  ;;  %v6432_v5 = vmul.f32 1.442695, %v6373_v22  ;;  %v6303_v38 = vadd.f32 %v6260_v18, %v12419_v46 }
 0x45b   : > { %v9154_v62 = vpop.eup %9153  ;;  %v6543_v40 = vpack.c.bf16 %v6517_v36, %v6516_v20  ;;  %v6515_v53 = vmul.f32 %v9152_v28, %v12366_v35  ;;  %9177 = vpow2.f32 %v6426_v3  ;;  %v6371_v16 = vsub.f32 0.0, %v12488_v32  ;;  %v6263_v48 = vpop.f32.mrf.mxu0 }
 0x45c   : > { %v9156_v29 = vpop.eup %9155  ;;  %v5834_v26 = vadd.f32 %v5793_v56, %v12236_v14  ;;  %9179 = vrcp.f32 %v6461_v50  ;;  %v6376_v11 = vsub.f32 0.0, %v12491_v23  ;;  %v12499_v33 = vadd.f32 %v12243_v0, %v6303_v38 }
 0x45d   : > { %v9158_v39 = vpop.eup %9157  ;;  %v6542_v12 = vpack.c.bf16 %v6515_v53, %v6514_v1  ;;  %v6459_v46 = vadd.f32 1.0, %v9156_v29  ;;  %9181 = vpow2.f32 %v6432_v5  ;;  %v6428_v7 = vmul.f32 1.442695, %v6371_v16 }
 0x45e   : > { %v9160_v47 = vpop.eup %9159  ;;  %v6464_v35 = vadd.f32 1.0, %v9158_v39  ;;  %v6374_v41 = vsub.f32 0.0, %v12499_v33  ;;  %v6306_v31 = vadd.f32 %v8644_v8, %v5836_v51  ;;  %v6438_v14 = vmul.f32 1.442695, %v6376_v11 }
 0x45f   : > { %v9162_v54 = vpop.eup %9161  ;;  %9183 = vrcp.f32 %v6459_v46  ;;  %v6304_v27 = vadd.f32 %v6263_v48, %v5834_v26  ;;  %8655 = vmatprep.mubr.msk.bf16.mxu1 %vm2234_vm5, %v6542_v12  ;;  %v6520_v45 = vmul.f32 %v9154_v62, %v12373_v25  ;;  %v6518_v42 = vmul.f32 %v9160_v47, %v12381_v2 }
 0x460   : > { %v9164_v52 = vpop.eup %9163  ;;  %9185 = vrcp.f32 %v6464_v35  ;;  %v6462_v19 = vadd.f32 1.0, %v9162_v54  ;;  %v12505_v10 = vadd.f32 %v12243_v0, %v6306_v31  ;;  %8656 = vmatmul.mubr.msk.bf16.gmra.mxu1 %vm2234_vm5, %v6543_v40  ;;  %v6434_v51 = vmul.f32 1.442695, %v6374_v41 }
 0x461   : > { %v9166_v9 = vpop.eup %9165  ;;  %v6521_v49 = vmul.f32 %v9164_v52, %v12388_v17  ;;  %9187 = vpow2.f32 %v6428_v7  ;;  %v12510_v13 = vadd.f32 %v12243_v0, %v6304_v27 }
 0x462   : > { %v9168_v44 = vpop.eup %9167  ;;  %9189 = vrcp.f32 %v6462_v19  ;;  %v6465_v25 = vadd.f32 1.0, %v9166_v9  ;;  %v6377_v20 = vsub.f32 0.0, %v12505_v10 }
 0x463   : > { %v6545_v1 = vpack.c.bf16 %v6521_v49, %v6520_v45  ;;  %v6519_v6 = vmul.f32 %v9168_v44, %v12396_v60  ;;  %9191 = vpow2.f32 %v6438_v14  ;;  %v6375_v18 = vsub.f32 0.0, %v12510_v13 }
 0x464   : > { %v9170_v4 = vpop.eup %9169  ;;  %9193 = vrcp.f32 %v6465_v25  ;;  %v6440_v17 = vmul.f32 1.442695, %v6377_v20 }
 0x465   : > { %v9172_v24 = vpop.eup %9171  ;;  %v6544_v3 = vpack.c.bf16 %v6519_v6, %v6518_v42  ;;  %v6463_v0 = vadd.f32 1.0, %v9170_v4  ;;  %9195 = vpow2.f32 %v6434_v51  ;;  %v6436_v22 = vmul.f32 1.442695, %v6375_v18 }
 0x466   : > { %v9174_v59 = vpop.eup %9173  ;;  %9197 = vpow2.f32 %v6440_v17  ;;  %v6524_v28 = vmul.f32 %v9172_v24, %v12404_v37 }
 0x467   : > { %v9176_v2 = vpop.eup %9175  ;;  %9199 = vrcp.f32 %v6463_v0  ;;  %v6468_v56 = vadd.f32 1.0, %v9174_v59  ;;  %8659 = vmatprep.mubr.msk.bf16.mxu1 %vm2234_vm5, %v6544_v3 }
 0x468   : > { %v9178_v36 = vpop.eup %9177  ;;  %9201 = vpow2.f32 %v6436_v22  ;;  %8660 = vmatmul.mubr.msk.bf16.gmra.mxu1 %vm2234_vm5, %v6545_v1  ;;  %v6522_v16 = vmul.f32 %v9176_v2, %v12416_v21 }
 0x469   : > { %v9180_v60 = vpop.eup %9179  ;;  %9203 = vrcp.f32 %v6468_v56  ;;  %v6466_v5 = vadd.f32 1.0, %v9178_v36 }
 0x46a   : > { %v9182_v8 = vpop.eup %9181  ;;  %v6525_v50 = vmul.f32 %v9180_v60, %v12422_v34 }
 0x46b   : > { %v6469_v38 = vadd.f32 1.0, %v9182_v8 }
 0x46c   : > { %v9184_v62 = vpop.eup %9183  ;;  %v6547_v40 = vpack.c.bf16 %v6525_v50, %v6524_v28  ;;  %v12555_v50 = vld [vmem:[%s12842_s9] ss:$0 sm:$0xff] }
 0x46d   : > { %v9186_v53 = vpop.eup %9185  ;;  %v6523_v29 = vmul.f32 %v9184_v62, %v12429_v63  ;;  %9205 = vrcp.f32 %v6469_v38 }
 0x46e   : > { %v9188_v26 = vpop.eup %9187  ;;  %9207 = vrcp.f32 %v6466_v5  ;;  %v6528_v7 = vmul.f32 %v9186_v53, %v12436_v43 }
 0x46f   : > { %v9190_v11 = vpop.eup %9189  ;;  %v6546_v48 = vpack.c.bf16 %v6523_v29, %v6522_v16  ;;  %v6467_v39 = vadd.f32 1.0, %v9188_v26 }
 0x470   : > { %v9192_v12 = vpop.eup %9191  ;;  %v6526_v14 = vmul.f32 %v9190_v11, %v12442_v15 }
 0x471   : > { %v9194_v37 = vpop.eup %9193  ;;  %9209 = vrcp.f32 %v6467_v39  ;;  %v6472_v34 = vadd.f32 1.0, %v9192_v12  ;;  %8663 = vmatprep.mubr.msk.bf16.mxu1 %vm2234_vm5, %v6546_v48 }
 0x472   : > { %v9196_v46 = vpop.eup %9195  ;;  %v6529_v47 = vmul.f32 %v9194_v37, %v12451_v61  ;;  %8664 = vmatmul.mubr.msk.bf16.gmra.mxu1 %vm2234_vm5, %v6547_v40 }
 0x473   : > { %v9198_v21 = vpop.eup %9197  ;;  %v6470_v63 = vadd.f32 1.0, %v9196_v46  ;;  %9211 = vrcp.f32 %v6472_v34 }
 0x474   : > { %v9200_v35 = vpop.eup %9199  ;;  %v6549_v41 = vpack.c.bf16 %v6529_v47, %v6528_v7  ;;  %v6473_v31 = vadd.f32 1.0, %v9198_v21 }
 0x475   : > { %v9202_v54 = vpop.eup %9201  ;;  %v6527_v27 = vmul.f32 %v9200_v35, %v12460_v58  ;;  %9213 = vrcp.f32 %v6470_v63 }
 0x476   : > { %9215 = vrcp.f32 %v6473_v31  ;;  %v6471_v52 = vadd.f32 1.0, %v9202_v54  ;;  %v9204_v43 = vpop.eup %9203 }
 0x477   : > { %v6548_v45 = vpack.c.bf16 %v6527_v27, %v6526_v14  ;;  %v6532_v19 = vmul.f32 %v9204_v43, %v12463_v55 }
 0x478   : > { %9217 = vrcp.f32 %v6471_v52 }
 0x479   : > { %8667 = vmatprep.mubr.msk.bf16.mxu1 %vm2234_vm5, %v6548_v45 }
 0x47a   : > { %v9206_v61 = vpop.eup %9205  ;;  %8668 = vmatmul.mubr.msk.bf16.gmra.mxu1 %vm2234_vm5, %v6549_v41 }
 0x47b   : > { %v6533_v9 = vmul.f32 %v9206_v61, %v12477_v57  ;;  %v9208_v49 = vpop.eup %9207 }
 0x47c   : > { %v6530_v58 = vmul.f32 %v9208_v49, %v12471_v30 }
 0x47d   : > { %v6551_v51 = vpack.c.bf16 %v6533_v9, %v6532_v19 }
 0x47e   : > { %v9210_v15 = vpop.eup %9209 }
 0x47f   : > { %v6531_v44 = vmul.f32 %v9210_v15, %v12488_v32  ;;  %v8683_v32 = vpop.f32.mrf.mxu0 }
 0x480   : > { %v9212_v42 = vpop.eup %9211 }
 0x481   : > { %v6550_v25 = vpack.c.bf16 %v6531_v44, %v6530_v58  ;;  %v6536_v6 = vmul.f32 %v9212_v42, %v12491_v23  ;;  %v6805_v24 = vpop.f32.mrf.mxu0 }
 0x482   : > { %v9214_v20 = vpop.eup %9213 }
 0x483   : > { %v9216_v1 = vpop.eup %9215  ;;  %8671 = vmatprep.mubr.msk.bf16.mxu1 %vm2234_vm5, %v6550_v25  ;;  %v6534_v57 = vmul.f32 %v9214_v20, %v12499_v33  ;;  %v8684_v3 = vpop.f32.mrf.mxu0 }
 0x484   : > { %v6537_v18 = vmul.f32 %v9216_v1, %v12505_v10  ;;  %8672 = vmatmul.mubr.msk.bf16.gmra.mxu1 %vm2234_vm5, %v6551_v51 }
 0x485   : > { %v9218_v55 = vpop.eup %9217  ;;  %v6808_v0 = vpop.f32.mrf.mxu0 }
 0x486   : > { %v6553_v4 = vpack.c.bf16 %v6537_v18, %v6536_v6  ;;  %v6535_v30 = vmul.f32 %v9218_v55, %v12510_v13 }
 0x487   : > { %v8687_v23 = vpop.f32.mrf.mxu0 }
 0x488   : > { %v6552_v17 = vpack.c.bf16 %v6535_v30, %v6534_v57 }
 0x489   : > { %v6821_v22 = vpop.f32.mrf.mxu0 }
 0x48a   : > { %8675 = vmatprep.mubr.msk.bf16.mxu1 %vm2234_vm5, %v6552_v17 }
 0x48b   : > { %v8688_v10 = vpop.f32.mrf.mxu0 }
 0x48c   : > { %8676 = vmatmul.mubr.msk.bf16.gmra.mxu1 %vm2234_vm5, %v6553_v4 }
 0x48d   : > { %v6824_v59 = vpop.f32.mrf.mxu0 }
 0x48f   : > { %v8691_v2 = vpop.f32.mrf.mxu0 }
 0x491   : > { %v6837_v56 = vpop.f32.mrf.mxu0 }
 0x493   : > { %v12542_v36 = vpop.f32.mrf.mxu0 }
 0x495   : > { %v12544_v33 = vpop.f32.mrf.mxu0 }
 0x497   : > { %v12546_v13 = vpop.f32.mrf.mxu0 }
 0x499   : > { %v12548_v60 = vpop.f32.mrf.mxu0 }
 0x49b   : > { %v12550_v8 = vpop.f32.mrf.mxu0 }
 0x49d   : > { %v12557_v62 = vpop.f32.mrf.mxu0 }
 0x49f   : > { %v12566_v39 = vpop.f32.mrf.mxu0 }
 0x4a1   : > { %v12576_v31 = vpop.f32.mrf.mxu0 }
 0x4a3   : > { %v12586_v51 = vpop.f32.mrf.mxu0 }
 0x4a5   : > { %v12596_v55 = vpop.f32.mrf.mxu0 }
 0x50f   : > { %v8649_v28 = vpop.f32.mrf.mxu1 }
 0x510   : > { %v6814_v5 = vadd.f32 %v8683_v32, %v8649_v28 }
 0x511   : > { %v6641_v38 = vpop.f32.mrf.mxu1 }
 0x512   : > { %v12560_v40 = vadd.f32 %v12555_v50, %v6814_v5  ;;  %v6806_v53 = vadd.f32 %v6805_v24, %v6641_v38 }
 0x513   : > { %v8650_v16 = vpop.f32.mrf.mxu1 }
 0x514   : > { %v6973_v29 = vsub.f32 0.0, %v12560_v40  ;;  %v12564_v26 = vadd.f32 %v12555_v50, %v6806_v53  ;;  %v6817_v11 = vadd.f32 %v8684_v3, %v8650_v16 }
 0x515   : > { %v6644_v48 = vpop.f32.mrf.mxu1 }
 0x516   : > { %v7007_v12 = vmul.f32 1.442695, %v6973_v29  ;;  %v6971_v37 = vsub.f32 0.0, %v12564_v26  ;;  %v12570_v34 = vadd.f32 %v12555_v50, %v6817_v11  ;;  %v6809_v46 = vadd.f32 %v6808_v0, %v6644_v48 }
 0x517   : > { %v8653_v7 = vpop.f32.mrf.mxu1 }
 0x518   : > { %9219 = vpow2.f32 %v7007_v12  ;;  %v7003_v47 = vmul.f32 1.442695, %v6971_v37  ;;  %v6974_v21 = vsub.f32 0.0, %v12570_v34  ;;  %v12574_v63 = vadd.f32 %v12555_v50, %v6809_v46 }
 0x519   : > { %v6830_v35 = vadd.f32 %v8687_v23, %v8653_v7  ;;  %v6657_v41 = vpop.f32.mrf.mxu1 }
 0x51a   : > { %9221 = vpow2.f32 %v7003_v47  ;;  %v7009_v54 = vmul.f32 1.442695, %v6974_v21  ;;  %v6972_v14 = vsub.f32 0.0, %v12574_v63  ;;  %v6822_v27 = vadd.f32 %v6821_v22, %v6657_v41 }
 0x51b   : > { %v12580_v52 = vadd.f32 %v12555_v50, %v6830_v35  ;;  %v8654_v45 = vpop.f32.mrf.mxu1 }
 0x51c   : > { %9223 = vpow2.f32 %v7009_v54  ;;  %v7005_v43 = vmul.f32 1.442695, %v6972_v14  ;;  %v12583_v61 = vadd.f32 %v12555_v50, %v6822_v27  ;;  %v6833_v19 = vadd.f32 %v8688_v10, %v8654_v45 }
 0x51d   : > { %v6977_v9 = vsub.f32 0.0, %v12580_v52  ;;  %v6660_v49 = vpop.f32.mrf.mxu1 }
 0x51e   : > { %9225 = vpow2.f32 %v7005_v43  ;;  %v6975_v15 = vsub.f32 0.0, %v12583_v61  ;;  %v12590_v58 = vadd.f32 %v12555_v50, %v6833_v19  ;;  %v6825_v44 = vadd.f32 %v6824_v59, %v6660_v49  ;;  %v12607_v59 = vpop.f32.mrf.mxu0 }
 0x51f   : > { %v7015_v42 = vmul.f32 1.442695, %v6977_v9 }
 0x520   : > { %v7011_v25 = vmul.f32 1.442695, %v6975_v15  ;;  %v6978_v20 = vsub.f32 0.0, %v12590_v58  ;;  %v12594_v1 = vadd.f32 %v12555_v50, %v6825_v44  ;;  %v8657_v6 = vpop.f32.mrf.mxu1  ;;  %v12618_v46 = vpop.f32.mrf.mxu0 }
 0x521   : > { %9227 = vpow2.f32 %v7015_v42  ;;  %v6846_v18 = vadd.f32 %v8691_v2, %v8657_v6 }
 0x522   : > { %9229 = vpow2.f32 %v7011_v25  ;;  %v7017_v57 = vmul.f32 1.442695, %v6978_v20  ;;  %v6976_v4 = vsub.f32 0.0, %v12594_v1  ;;  %v6673_v30 = vpop.f32.mrf.mxu1  ;;  %v12630_v49 = vpop.f32.mrf.mxu0 }
 0x523   : > { %v12600_v17 = vadd.f32 %v12555_v50, %v6846_v18  ;;  %v6838_v32 = vadd.f32 %v6837_v56, %v6673_v30 }
 0x524   : > { %9231 = vpow2.f32 %v7017_v57  ;;  %v7013_v24 = vmul.f32 1.442695, %v6976_v4  ;;  %v8658_v3 = vpop.f32.mrf.mxu1 }
 0x525   : > { %v9220_v0 = vpop.eup %9219  ;;  %v6981_v23 = vsub.f32 0.0, %v12600_v17  ;;  %v12604_v22 = vadd.f32 %v12555_v50, %v6838_v32  ;;  %v6849_v10 = vadd.f32 %v12542_v36, %v8658_v3  ;;  %v12639_v32 = vpop.f32.mrf.mxu0 }
 0x526   : > { %v7069_v2 = vadd.f32 1.0, %v9220_v0  ;;  %9233 = vpow2.f32 %v7013_v24  ;;  %v6676_v28 = vpop.f32.mrf.mxu1 }
 0x527   : > { %v9222_v5 = vpop.eup %9221  ;;  %v7023_v38 = vmul.f32 1.442695, %v6981_v23  ;;  %v6979_v56 = vsub.f32 0.0, %v12604_v22  ;;  %v12611_v53 = vadd.f32 %v12555_v50, %v6849_v10  ;;  %v6841_v16 = vadd.f32 %v12544_v33, %v6676_v28 }
 0x528   : > { %9235 = vrcp.f32 %v7069_v2  ;;  %v7067_v29 = vadd.f32 1.0, %v9222_v5  ;;  %v8661_v11 = vpop.f32.mrf.mxu1 }
 0x529   : > { %v9224_v48 = vpop.eup %9223  ;;  %9237 = vpow2.f32 %v7023_v38  ;;  %v7019_v36 = vmul.f32 1.442695, %v6979_v56  ;;  %v6982_v12 = vsub.f32 0.0, %v12611_v53  ;;  %v12616_v37 = vadd.f32 %v12555_v50, %v6841_v16 }
 0x52a   : > { %9239 = vrcp.f32 %v7067_v29  ;;  %v7070_v7 = vadd.f32 1.0, %v9224_v48  ;;  %v6862_v47 = vadd.f32 %v12546_v13, %v8661_v11  ;;  %v6689_v21 = vpop.f32.mrf.mxu1  ;;  %v12651_v11 = vpop.f32.mrf.mxu0 }
 0x52b   : > { %v9226_v35 = vpop.eup %9225  ;;  %9241 = vpow2.f32 %v7019_v36  ;;  %v7025_v33 = vmul.f32 1.442695, %v6982_v12  ;;  %v6980_v41 = vsub.f32 0.0, %v12616_v37  ;;  %v6854_v54 = vadd.f32 %v12548_v60, %v6689_v21 }
 0x52c   : > { %9243 = vrcp.f32 %v7070_v7  ;;  %v7068_v14 = vadd.f32 1.0, %v9226_v35  ;;  %v12624_v27 = vadd.f32 %v12555_v50, %v6862_v47  ;;  %v8662_v45 = vpop.f32.mrf.mxu1 }
 0x52d   : > { %9245 = vpow2.f32 %v7025_v33  ;;  %v7021_v43 = vmul.f32 1.442695, %v6980_v41  ;;  %v12627_v19 = vadd.f32 %v12555_v50, %v6854_v54  ;;  %v6865_v13 = vadd.f32 %v12550_v8, %v8662_v45 }
 0x52e   : > { %v9228_v9 = vpop.eup %9227  ;;  %9247 = vrcp.f32 %v7068_v14  ;;  %v6985_v15 = vsub.f32 0.0, %v12624_v27  ;;  %v6692_v60 = vpop.f32.mrf.mxu1 }
 0x52f   : > { %v9230_v44 = vpop.eup %9229  ;;  %v7073_v42 = vadd.f32 1.0, %v9228_v9  ;;  %9249 = vpow2.f32 %v7021_v43  ;;  %v6983_v25 = vsub.f32 0.0, %v12627_v19  ;;  %v12635_v20 = vadd.f32 %v12555_v50, %v6865_v13  ;;  %v12664_v13 = vpop.f32.mrf.mxu0 }
 0x530   : > { %v7071_v6 = vadd.f32 1.0, %v9230_v44  ;;  %v7031_v18 = vmul.f32 1.442695, %v6985_v15  ;;  %v6857_v57 = vadd.f32 %v12557_v62, %v6692_v60 }
 0x531   : > { %v9232_v8 = vpop.eup %9231  ;;  %9251 = vrcp.f32 %v7073_v42  ;;  %v7027_v4 = vmul.f32 1.442695, %v6983_v25  ;;  %v6986_v30 = vsub.f32 0.0, %v12635_v20 }
 0x532   : > { %9253 = vrcp.f32 %v7071_v6  ;;  %v7074_v24 = vadd.f32 1.0, %v9232_v8  ;;  %v12642_v3 = vadd.f32 %v12555_v50, %v6857_v57  ;;  %v8665_v0 = vpop.f32.mrf.mxu1 }
 0x533   : > { %v9234_v23 = vpop.eup %9233  ;;  %9255 = vpow2.f32 %v7031_v18  ;;  %v7033_v10 = vmul.f32 1.442695, %v6986_v30  ;;  %v6878_v2 = vadd.f32 %v12566_v39, %v8665_v0  ;;  %v12681_v0 = vpop.f32.mrf.mxu0 }
 0x534   : > { %9257 = vrcp.f32 %v7074_v24  ;;  %v7072_v62 = vadd.f32 1.0, %v9234_v23  ;;  %v6984_v28 = vsub.f32 0.0, %v12642_v3  ;;  %v6705_v5 = vpop.f32.mrf.mxu1 }
 0x535   : > { %v9236_v38 = vpop.eup %9235  ;;  %9259 = vpow2.f32 %v7027_v4  ;;  %v12648_v56 = vadd.f32 %v12555_v50, %v6878_v2  ;;  %v6870_v16 = vadd.f32 %v12576_v31, %v6705_v5 }
 0x536   : > { %v9238_v29 = vpop.eup %9237  ;;  %9261 = vrcp.f32 %v7072_v62  ;;  %v7029_v48 = vmul.f32 1.442695, %v6984_v28  ;;  %v8666_v39 = vpop.f32.mrf.mxu1  ;;  %v7133_v35 = vmul.f32 %v9236_v38, %v12560_v40 }
 0x537   : > { %v9240_v36 = vpop.eup %9239  ;;  %v7077_v12 = vadd.f32 1.0, %v9238_v29  ;;  %9263 = vpow2.f32 %v7033_v10  ;;  %v6989_v7 = vsub.f32 0.0, %v12648_v56  ;;  %v12655_v47 = vadd.f32 %v12555_v50, %v6870_v16 }
 0x538   : > { %v9242_v21 = vpop.eup %9241  ;;  %9265 = vpow2.f32 %v7029_v48  ;;  %v6881_v31 = vadd.f32 %v12586_v51, %v8666_v39  ;;  %v6708_v33 = vpop.f32.mrf.mxu1  ;;  %v7131_v9 = vmul.f32 %v9240_v36, %v12564_v26 }
 0x539   : > { %v9244_v41 = vpop.eup %9243  ;;  %9267 = vrcp.f32 %v7077_v12  ;;  %v7075_v54 = vadd.f32 1.0, %v9242_v21  ;;  %v7039_v14 = vmul.f32 1.442695, %v6989_v7  ;;  %v6987_v45 = vsub.f32 0.0, %v12655_v47  ;;  %v6904_v21 = vpop.f32.mrf.mxu0 }
 0x53a   : > { %v9246_v43 = vpop.eup %9245  ;;  %v7134_v40 = vmul.f32 %v9244_v41, %v12570_v34  ;;  %v12669_v15 = vadd.f32 %v12555_v50, %v6881_v31  ;;  %v6873_v60 = vadd.f32 %v12596_v55, %v6708_v33  ;;  %v8669_v51 = vpop.f32.mrf.mxu1 }
 0x53b   : > { %v9248_v44 = vpop.eup %9247  ;;  %9269 = vrcp.f32 %v7075_v54  ;;  %v7078_v42 = vadd.f32 1.0, %v9246_v43  ;;  %v7035_v25 = vmul.f32 1.442695, %v6987_v45  ;;  %v6894_v6 = vadd.f32 %v12607_v59, %v8669_v51 }
 0x53c   : > { %v9250_v18 = vpop.eup %9249  ;;  %v7963_v57 = vpack.c.bf16 %v7134_v40, %v7133_v35  ;;  %v7132_v8 = vmul.f32 %v9248_v44, %v12574_v63  ;;  %9271 = vpow2.f32 %v7039_v14  ;;  %v6990_v26 = vsub.f32 0.0, %v12669_v15  ;;  %v6721_v34 = vpop.f32.mrf.mxu1 }
 0x53d   : > { %9273 = vrcp.f32 %v7078_v42  ;;  %v7076_v4 = vadd.f32 1.0, %v9250_v18  ;;  %v12676_v55 = vadd.f32 %v12555_v50, %v6873_v60  ;;  %v12679_v30 = vadd.f32 %v12555_v50, %v6894_v6  ;;  %v8711_v42 = vpop.f32.mrf.mxu0 }
 0x53e   : > { %v9252_v24 = vpop.eup %9251  ;;  %8035 = vst [vmem:[%s12684_s21 + $0x8] sm:$0xff] %v7963_v57   ;;  %v7958_v63 = vpack.c.bf16 %v7132_v8, %v7131_v9  ;;  %9275 = vpow2.f32 %v7035_v25  ;;  %v7041_v59 = vmul.f32 1.442695, %v6990_v26  ;;  %v6886_v23 = vadd.f32 %v12618_v46, %v6721_v34  ;;  %v8670_v10 = vpop.f32.mrf.mxu1 }
 0x53f   : > { %v9254_v2 = vpop.eup %9253  ;;  %9277 = vrcp.f32 %v7076_v4  ;;  %v6988_v62 = vsub.f32 0.0, %v12676_v55  ;;  %v6993_v28 = vsub.f32 0.0, %v12679_v30  ;;  %v6897_v16 = vadd.f32 %v12630_v49, %v8670_v10 }
 0x540   : > { %v9256_v5 = vpop.eup %9255  ;;  %7959 = vst [vmem:[%s12684_s21] sm:$0xff] %v7958_v63   ;;  %9279 = vpow2.f32 %v7041_v59  ;;  %v12692_v38 = vadd.f32 %v12555_v50, %v6886_v23  ;;  %v6724_v29 = vpop.f32.mrf.mxu1  ;;  %v7137_v39 = vmul.f32 %v9252_v24, %v12580_v52  ;;  %v7135_v49 = vmul.f32 %v9254_v2, %v12583_v61 }
 0x541   : > { %v9258_v48 = vpop.eup %9257  ;;  %v7081_v46 = vadd.f32 1.0, %v9256_v5  ;;  %v7037_v36 = vmul.f32 1.442695, %v6988_v62  ;;  %v6889_v12 = vadd.f32 %v12639_v32, %v6724_v29  ;;  %v7047_v31 = vmul.f32 1.442695, %v6993_v28  ;;  %v6917_v2 = vpop.f32.mrf.mxu0 }
 0x542   : > { %v9260_v7 = vpop.eup %9259  ;;  %v7138_v35 = vmul.f32 %v9258_v48, %v12590_v58  ;;  %v6991_v33 = vsub.f32 0.0, %v12692_v38  ;;  %v12700_v41 = vadd.f32 %v12555_v50, %v6897_v16 }
 0x543   : > { %v9262_v54 = vpop.eup %9261  ;;  %9281 = vrcp.f32 %v7081_v46  ;;  %v7079_v52 = vadd.f32 1.0, %v9260_v7  ;;  %v12704_v14 = vadd.f32 %v12555_v50, %v6889_v12 }
 0x544   : > { %v9264_v32 = vpop.eup %9263  ;;  %v7973_v45 = vpack.c.bf16 %v7138_v35, %v7137_v39  ;;  %v7136_v43 = vmul.f32 %v9262_v54, %v12594_v1  ;;  %9283 = vpow2.f32 %v7037_v36  ;;  %v7043_v58 = vmul.f32 1.442695, %v6991_v33  ;;  %v8673_v9 = vpop.f32.mrf.mxu1 }
 0x545   : > { %v9266_v40 = vpop.eup %9265  ;;  %9285 = vrcp.f32 %v7079_v52  ;;  %v7082_v60 = vadd.f32 1.0, %v9264_v32  ;;  %v6994_v51 = vsub.f32 0.0, %v12700_v41  ;;  %v6992_v61 = vsub.f32 0.0, %v12704_v14  ;;  %v8712_v33 = vpop.f32.mrf.mxu0 }
 0x546   : > { %v9268_v44 = vpop.eup %9267  ;;  %8037 = vst [vmem:[%s12684_s21 + $0x18] sm:$0xff] %v7973_v45   ;;  %v7968_v25 = vpack.c.bf16 %v7136_v43, %v7135_v49  ;;  %v7080_v6 = vadd.f32 1.0, %v9266_v40  ;;  %9287 = vpow2.f32 %v7047_v31  ;;  %v6910_v18 = vadd.f32 %v12651_v11, %v8673_v9  ;;  %v6737_v1 = vpop.f32.mrf.mxu1 }
 0x547   : > { %9289 = vrcp.f32 %v7082_v60  ;;  %v7049_v57 = vmul.f32 1.442695, %v6994_v51  ;;  %v7045_v8 = vmul.f32 1.442695, %v6992_v61  ;;  %v6902_v4 = vadd.f32 %v12664_v13, %v6737_v1 }
 0x548   : > { %v9270_v26 = vpop.eup %9269  ;;  %8036 = vst [vmem:[%s12684_s21 + $0x10] sm:$0xff] %v7968_v25   ;;  %9291 = vrcp.f32 %v7080_v6  ;;  %v12713_v34 = vadd.f32 %v12555_v50, %v6910_v18  ;;  %v8674_v24 = vpop.f32.mrf.mxu1  ;;  %v7141_v59 = vmul.f32 %v9268_v44, %v12600_v17 }
 0x549   : > { %v9272_v63 = vpop.eup %9271  ;;  %v7139_v23 = vmul.f32 %v9270_v26, %v12604_v22  ;;  %9293 = vpow2.f32 %v7043_v58  ;;  %v6913_v11 = vadd.f32 %v12681_v0, %v8674_v24  ;;  %v12721_v5 = vadd.f32 %v12555_v50, %v6902_v4 }
 0x54a   : > { %v9274_v10 = vpop.eup %9273  ;;  %v7085_v62 = vadd.f32 1.0, %v9272_v63  ;;  %9295 = vpow2.f32 %v7049_v57  ;;  %v6997_v28 = vsub.f32 0.0, %v12713_v34  ;;  %v6740_v16 = vpop.f32.mrf.mxu1 }
 0x54b   : > { %v9276_v13 = vpop.eup %9275  ;;  %v7142_v29 = vmul.f32 %v9274_v10, %v12611_v53  ;;  %9297 = vpow2.f32 %v7045_v8  ;;  %v12725_v17 = vadd.f32 %v12555_v50, %v6913_v11  ;;  %v6905_v22 = vadd.f32 %v6904_v21, %v6740_v16 }
 0x54c   : > { %v9278_v48 = vpop.eup %9277  ;;  %9299 = vrcp.f32 %v7085_v62  ;;  %v7083_v0 = vadd.f32 1.0, %v9276_v13  ;;  %v7055_v39 = vmul.f32 1.442695, %v6997_v28  ;;  %v6995_v46 = vsub.f32 0.0, %v12721_v5  ;;  %v8677_v36 = vpop.f32.mrf.mxu1 }
 0x54d   : > { %v9280_v12 = vpop.eup %9279  ;;  %v7983_v7 = vpack.c.bf16 %v7142_v29, %v7141_v59  ;;  %v7140_v35 = vmul.f32 %v9278_v48, %v12616_v37  ;;  %v6998_v31 = vsub.f32 0.0, %v12725_v17  ;;  %v12731_v53 = vadd.f32 %v12555_v50, %v6905_v22 }
 0x54e   : > { %9301 = vrcp.f32 %v7083_v0  ;;  %v7086_v21 = vadd.f32 1.0, %v9280_v12  ;;  %v7051_v54 = vmul.f32 1.442695, %v6995_v46  ;;  %v6926_v49 = vadd.f32 %v8711_v42, %v8677_v36  ;;  %v6753_v52 = vpop.f32.mrf.mxu1  ;;  %v6920_v42 = vpop.f32.mrf.mxu0 }
 0x54f   : > { %8039 = vst [vmem:[%s12684_s21 + $0x28] sm:$0xff] %v7983_v7   ;;  %v7978_v32 = vpack.c.bf16 %v7140_v35, %v7139_v23  ;;  %9303 = vpow2.f32 %v7055_v39  ;;  %v7057_v45 = vmul.f32 1.442695, %v6998_v31  ;;  %v6996_v43 = vsub.f32 0.0, %v12731_v53 }
 0x550   : > { %v9282_v58 = vpop.eup %9281  ;;  %9305 = vrcp.f32 %v7086_v21  ;;  %v12736_v37 = vadd.f32 %v12555_v50, %v6926_v49  ;;  %v6918_v9 = vadd.f32 %v6917_v2, %v6753_v52  ;;  %v8678_v40 = vpop.f32.mrf.mxu1 }
 0x551   : > { %v9284_v60 = vpop.eup %9283  ;;  %8038 = vst [vmem:[%s12684_s21 + $0x20] sm:$0xff] %v7978_v32   ;;  %9307 = vpow2.f32 %v7051_v54  ;;  %v7053_v51 = vmul.f32 1.442695, %v6996_v43  ;;  %v6929_v61 = vadd.f32 %v8712_v33, %v8678_v40  ;;  %v7145_v11 = vmul.f32 %v9282_v58, %v12624_v27 }
 0x552   : > { %v9286_v44 = vpop.eup %9285  ;;  %v7084_v25 = vadd.f32 1.0, %v9284_v60  ;;  %9309 = vpow2.f32 %v7057_v45  ;;  %v7001_v6 = vsub.f32 0.0, %v12736_v37  ;;  %v12741_v18 = vadd.f32 %v12555_v50, %v6918_v9  ;;  %v6756_v1 = vpop.f32.mrf.mxu1 }
 0x553   : > { %v9288_v57 = vpop.eup %9287  ;;  %9311 = vpow2.f32 %v7053_v51  ;;  %v12744_v8 = vadd.f32 %v12555_v50, %v6929_v61  ;;  %v6921_v26 = vadd.f32 %v6920_v42, %v6756_v1  ;;  %v7143_v16 = vmul.f32 %v9286_v44, %v12627_v19 }
 0x554   : > { %v9290_v4 = vpop.eup %9289  ;;  %9313 = vrcp.f32 %v7084_v25  ;;  %v7089_v24 = vadd.f32 1.0, %v9288_v57  ;;  %v7063_v63 = vmul.f32 1.442695, %v7001_v6  ;;  %v6999_v59 = vsub.f32 0.0, %v12741_v18 }
 0x555   : > { %v9292_v23 = vpop.eup %9291  ;;  %v7146_v10 = vmul.f32 %v9290_v4, %v12635_v20  ;;  %v7002_v2 = vsub.f32 0.0, %v12744_v8  ;;  %v12751_v62 = vadd.f32 %v12555_v50, %v6921_v26 }
 0x556   : > { %v9294_v28 = vpop.eup %9293  ;;  %v7144_v13 = vmul.f32 %v9292_v23, %v12642_v3  ;;  %9315 = vrcp.f32 %v7089_v24  ;;  %v7059_v29 = vmul.f32 1.442695, %v6999_v59 }
 0x557   : > { %v9296_v22 = vpop.eup %9295  ;;  %v7993_v48 = vpack.c.bf16 %v7146_v10, %v7145_v11  ;;  %v7087_v0 = vadd.f32 1.0, %v9294_v28  ;;  %9317 = vpow2.f32 %v7063_v63  ;;  %v7065_v27 = vmul.f32 1.442695, %v7002_v2 }
 0x558   : > { %v9298_v20 = vpop.eup %9297  ;;  %v7988_v39 = vpack.c.bf16 %v7144_v13, %v7143_v16  ;;  %v7090_v46 = vadd.f32 1.0, %v9296_v22  ;;  %9319 = vpow2.f32 %v7059_v29  ;;  %v7000_v50 = vsub.f32 0.0, %v12751_v62 }
 0x559   : > { %v9300_v36 = vpop.eup %9299  ;;  %8041 = vst [vmem:[%s12684_s21 + $0x38] sm:$0xff] %v7993_v48   ;;  %9321 = vrcp.f32 %v7087_v0  ;;  %v7088_v19 = vadd.f32 1.0, %v9298_v20 }
 0x55a   : > { %8040 = vst [vmem:[%s12684_s21 + $0x30] sm:$0xff] %v7988_v39   ;;  %9323 = vrcp.f32 %v7090_v46  ;;  %v7061_v3 = vmul.f32 1.442695, %v7000_v50  ;;  %v7149_v21 = vmul.f32 %v9300_v36, %v12648_v56 }
 0x55b   : > { %v9302_v12 = vpop.eup %9301  ;;  %9325 = vrcp.f32 %v7088_v19 }
 0x55c   : > { %v9304_v7 = vpop.eup %9303  ;;  %9327 = vpow2.f32 %v7065_v27  ;;  %v7147_v40 = vmul.f32 %v9302_v12, %v12655_v47 }
 0x55d   : > { %v9306_v35 = vpop.eup %9305  ;;  %v7093_v31 = vadd.f32 1.0, %v9304_v7  ;;  %9329 = vpow2.f32 %v7061_v3 }
 0x55e   : > { %v9308_v33 = vpop.eup %9307  ;;  %v7150_v54 = vmul.f32 %v9306_v35, %v12669_v15 }
 0x55f   : > { %v9310_v49 = vpop.eup %9309  ;;  %v7091_v52 = vadd.f32 1.0, %v9308_v33  ;;  %9331 = vrcp.f32 %v7093_v31 }
 0x560   : > { %v9312_v32 = vpop.eup %9311  ;;  %v8003_v45 = vpack.c.bf16 %v7150_v54, %v7149_v21  ;;  %v7094_v43 = vadd.f32 1.0, %v9310_v49 }
 0x561   : > { %v9314_v58 = vpop.eup %9313  ;;  %9333 = vrcp.f32 %v7091_v52  ;;  %v7092_v9 = vadd.f32 1.0, %v9312_v32 }
 0x562   : > { %8043 = vst [vmem:[%s12684_s21 + $0x48] sm:$0xff] %v8003_v45   ;;  %v7148_v60 = vmul.f32 %v9314_v58, %v12676_v55  ;;  %9335 = vrcp.f32 %v7094_v43 }
 0x563   : > { %v9316_v51 = vpop.eup %9315  ;;  %9337 = vrcp.f32 %v7092_v9 }
 0x564   : > { %v9318_v56 = vpop.eup %9317  ;;  %v7998_v15 = vpack.c.bf16 %v7148_v60, %v7147_v40  ;;  %v7153_v57 = vmul.f32 %v9316_v51, %v12679_v30 }
 0x565   : > { %v9320_v61 = vpop.eup %9319  ;;  %v7097_v42 = vadd.f32 1.0, %v9318_v56 }
 0x566   : > { %v9322_v44 = vpop.eup %9321  ;;  %8042 = vst [vmem:[%s12684_s21 + $0x40] sm:$0xff] %v7998_v15   ;;  %v7095_v6 = vadd.f32 1.0, %v9320_v61 }
 0x567   : > { %v9324_v25 = vpop.eup %9323  ;;  %v7151_v55 = vmul.f32 %v9322_v44, %v12692_v38  ;;  %9339 = vrcp.f32 %v7097_v42 }
 0x568   : > { %v9326_v1 = vpop.eup %9325  ;;  %v7154_v47 = vmul.f32 %v9324_v25, %v12700_v41  ;;  %9341 = vrcp.f32 %v7095_v6 }
 0x569   : > { %v9328_v26 = vpop.eup %9327  ;;  %v7152_v4 = vmul.f32 %v9326_v1, %v12704_v14 }
 0x56a   : > { %v9330_v24 = vpop.eup %9329  ;;  %v8013_v63 = vpack.c.bf16 %v7154_v47, %v7153_v57  ;;  %v7098_v59 = vadd.f32 1.0, %v9328_v26 }
 0x56b   : > { %v8008_v23 = vpack.c.bf16 %v7152_v4, %v7151_v55  ;;  %v7096_v11 = vadd.f32 1.0, %v9330_v24 }
 0x56c   : > { %8045 = vst [vmem:[%s12684_s21 + $0x58] sm:$0xff] %v8013_v63   ;;  %9343 = vrcp.f32 %v7098_v59  ;;  %v9332_v10 = vpop.eup %9331 }
 0x56d   : > { %8044 = vst [vmem:[%s12684_s21 + $0x50] sm:$0xff] %v8008_v23   ;;  %9345 = vrcp.f32 %v7096_v11  ;;  %v7157_v14 = vmul.f32 %v9332_v10, %v12713_v34 }
 0x56e   : > { %v9334_v30 = vpop.eup %9333 }
 0x56f   : > { %v9336_v38 = vpop.eup %9335  ;;  %v7155_v28 = vmul.f32 %v9334_v30, %v12721_v5 }
 0x570   : > { %v9338_v41 = vpop.eup %9337  ;;  %v7158_v2 = vmul.f32 %v9336_v38, %v12725_v17 }
 0x571   : > { %v7156_v16 = vmul.f32 %v9338_v41, %v12731_v53 }
 0x572   : > { %v8023_v13 = vpack.c.bf16 %v7158_v2, %v7157_v14 }
 0x573   : > { %v8018_v29 = vpack.c.bf16 %v7156_v16, %v7155_v28 }
 0x574   : > { %8047 = vst [vmem:[%s12684_s21 + $0x68] sm:$0xff] %v8023_v13   ;;  %v9340_v22 = vpop.eup %9339 }
 0x575   : > { %8046 = vst [vmem:[%s12684_s21 + $0x60] sm:$0xff] %v8018_v29   ;;  %v9342_v48 = vpop.eup %9341  ;;  %v7161_v17 = vmul.f32 %v9340_v22, %v12736_v37 }
 0x576   : > { %v7159_v53 = vmul.f32 %v9342_v48, %v12741_v18 }
 0x579   : > { %v9344_v0 = vpop.eup %9343 }
 0x57a   : > { %v9346_v34 = vpop.eup %9345  ;;  %v7162_v5 = vmul.f32 %v9344_v0, %v12744_v8 }
 0x57b   : > { %v7160_v27 = vmul.f32 %v9346_v34, %v12751_v62 }
 0x57c   : > { %v8033_v20 = vpack.c.bf16 %v7162_v5, %v7161_v17 }
 0x57d   : > { %v8028_v39 = vpack.c.bf16 %v7160_v27, %v7159_v53 }
 0x57e   : > { %8049 = vst [vmem:[%s12684_s21 + $0x78] sm:$0xff] %v8033_v20  }
 0x57f   : > { %8048 = vst [vmem:[%s12684_s21 + $0x70] sm:$0xff] %v8028_v39  }
 0x580   : > { %9366 = shalt.err (!%p9363_p3)
}
 0x581   : > { %s9367_s18 = scalar_lea.hbm %s12785_s29, 2048  ;;  %s9371_s27 = scalar_lea.hbm %s12843_s10, 4096 }
 0x582   : > { %p9368_p4 = scmp.ne.s32.totalorder %s12785_s29, %s9367_s18  ;;  %p9372_p9 = scmp.lt.s32.totalorder %s12785_s29, %s12843_s10 }
 0x583   : > { %p9373_p10 = scmp.lt.s32.totalorder %s9371_s27, %s9367_s18 }
 0x584   : > { %p9369_p7 = pnand %p9368_p4, %p9512_p5 }
 0x585   : > { %p9374_p11 = por %p9373_p10, %p9372_p9 }
 0x586   : > { %p9370_p8 = pneg %p9369_p7 }
 0x588   : > { %p9375_p12 = pnand %p9374_p11, %p9370_p8 }
 0x58a   : > { %9378 = shalt.err (!%p9375_p12)
}
 0x58b   : > { %s9417_s30 = smov 64   ;;  %s9418_s12 = smov 4  }
 0x58c   : > { %8729 = dma.vmem_to_hbm [thread:$0]  (%p9512_p5), %s12787_s26, 2048, %s12785_s29, %s12793_s17, %s9417_s30, %s9417_s30, %s9418_s12  }
 0x58d PF: > { %p8735_p13 = scmp.ge.s32.totalorder %s9413_s16, 2  ;;  %s7352_s20 = sand.u32 1, %s9401_s13  }
 0x58e   : > { %s7353_s18 = scalar_lea.sflag [#allocation4], %s7352_s20 }
 0x58f   : > { %p8732_p0 = pnand %p8735_p13, %p9516_p6 }
 0x591   : > { %p8733_p1 = pneg %p8732_p0 }
 0x593   : > { %9396 = dma.done.wait (%p8733_p1), %s7353_s18, 2048  }
 0x594   : > { %9398 = vsyncadd (%p8733_p1), %s7353_s18, 4294965248  ;;  %p20_p2 = scmp.ge.s32.totalorder %s9499_s19, 4   ;;  %s13024_s13 = smov %s9405_s14 }
 0x595   : > { %s13025_s14 = smov %s9409_s15  ;;  %s13026_s15 = smov %s9510_s22 }
 0x596   : > { %s13027_s16 = smov %s9499_s19  ;;  %22 = sbr.rel (!%p20_p2) target bundleno = 3 (0x3), region = 105 }
 0x59b   :  { %7358 = vsyncpa [#allocation4], 1 }
 0x59c   :  { %7360 = vsyncpa [#allocation4 + $0x1], 1 }

</bundles_post_ra>
